<compile_context>
chip_gen: v7x
topology: tpu7x:2x2x1
jax: 0.10.0
libtpu: 0.0.40
codegen_flags: <defaults>
</compile_context>

<pallas_src>
import math

import jax
import jax.numpy as jnp
import numpy as np
from jax.experimental import pallas as pl
from jax.experimental.pallas import tpu as pltpu

# ---------------------------------------------------------------------------
# Small-shape config consistent with BrainNetwork.__init__ defaults
# (seq_len=2, n_blocks=4, out_dim == clip_size -> 1 backbone token), with the
# hidden sizes shrunk (h=4096 -> 128, clip_size=768 -> 128) for a small test.
# ---------------------------------------------------------------------------
B = 2
SEQ = 2                  # seq_len
H = 128                  # h
N_BLOCKS = 4
OUT_DIM = 128            # backbone_linear output
CLIP = 128               # clip_size (OUT_DIM // CLIP == 1 token, as in defaults)
D_FLAT = SEQ * H

F32 = jnp.float32
BF16 = jnp.bfloat16


# ---------------------------------------------------------------------------
# helpers traced into the kernel body
# ---------------------------------------------------------------------------
def _layer_norm(x, gamma, beta, eps=1e-5):
    # One-pass LN: sum(x) and sum(x*x) are independent cross-lane reductions, so the
    # XLU issues them back-to-back (no mean -> var serialization). unbiased=False.
    n = x.shape[-1]
    s1 = jnp.sum(x, axis=-1, keepdims=True)
    s2 = jnp.sum(x * x, axis=-1, keepdims=True)
    m = s1 * (1.0 / n)
    var = s2 * (1.0 / n) - m * m
    return (x - m) * jax.lax.rsqrt(var + eps) * gamma + beta


def _gelu(x):
    # tanh-approx GELU: transcendental goes to the EUP (its own VLIW slot) instead of a
    # long VALU erf polynomial. Deviates <~1e-3 from torch's exact erf GELU (documented).
    return 0.5 * x * (1.0 + jnp.tanh(0.7978845608028654 * (x + 0.044715 * x * x * x)))


# ---------------------------------------------------------------------------
# single fused kernel: mixer blocks + backbone_linear + clip_proj
# ---------------------------------------------------------------------------
def brain_kernel(x_ref,
                 ln1g_ref, ln1b_ref, w1a_ref, b1a_ref, w1b_ref, b1b_ref,
                 ln2g_ref, ln2b_ref, w2a_ref, b2a_ref, w2b_ref, b2b_ref,
                 wback_ref, bback_ref,
                 lnpg_ref, lnpb_ref, wp_ref, bp_ref,
                 backbone_ref, c_ref):
    n_blocks = w1a_ref.shape[0]
    seq = ln2g_ref.shape[0] // n_blocks
    hdim = x_ref.shape[1]
    bsz = x_ref.shape[0] // seq

    # ---- one in-kernel sublane shuffle: token-major rows (b*seq + s) from the natural
    #      input layout -> seq-major rows (s*bsz + b) used by all the math below.
    x_tok = x_ref[...]                                             # (B*SEQ, H) f32
    x2d = jnp.concatenate(
        [x_tok[b * seq + s: b * seq + s + 1, :]
         for s in range(seq) for b in range(bsz)],
        axis=0)                                                    # (SEQ*B, H) f32

    # NOTE: res1/res2 are intentionally "stale" (previous block1 / block2 outputs, not the
    # current input) -- this matches the PyTorch residual bookkeeping and must be kept.
    res1 = x2d
    res2 = x2d                                                     # permute is a relabel here

    for blk in range(n_blocks):
        # ---- mixer_block1: LayerNorm(h) -> Linear(h,h) -> GELU -> [Dropout] -> Linear(h,h); + residual1
        g1 = ln1g_ref[blk]                                         # (1, H) f32
        be1 = ln1b_ref[blk]
        t = _layer_norm(x2d, g1, be1)
        t = jnp.dot(t.astype(BF16), w1a_ref[blk],
                    preferred_element_type=F32) + b1a_ref[blk]
        t = _gelu(t)
        t = jnp.dot(t.astype(BF16), w1b_ref[blk],
                    preferred_element_type=F32) + b1b_ref[blk]
        x2d = t + res1
        res1 = x2d

        # ---- mixer_block2 (acts on x.permute(0,2,1), a pure relabel in this layout):
        #      LayerNorm(seq) -> Linear(seq,seq) -> GELU -> [Dropout] -> Linear(seq,seq); + residual2
        rows = [x2d[s * bsz:(s + 1) * bsz, :] for s in range(seq)]  # each (B, H) f32
        s1 = rows[0]
        s2 = rows[0] * rows[0]
        for s in range(1, seq):
            s1 = s1 + rows[s]
            s2 = s2 + rows[s] * rows[s]
        mean = s1 * (1.0 / seq)
        var = s2 * (1.0 / seq) - mean * mean
        inv = jax.lax.rsqrt(var + 1e-5)
        xn = [(rows[s] - mean) * inv * ln2g_ref[blk * seq + s] + ln2b_ref[blk * seq + s]
              for s in range(seq)]
        hid = []
        for so in range(seq):                       # Linear(seq,seq)+GELU on VPU, SMEM scalar weights
            acc = xn[0] * w2a_ref[blk * seq * seq + so * seq]
            for si in range(1, seq):
                acc = acc + xn[si] * w2a_ref[blk * seq * seq + so * seq + si]
            hid.append(_gelu(acc + b2a_ref[blk * seq + so]))
        new_rows = []
        for so in range(seq):                       # second Linear(seq,seq) + residual2
            acc = hid[0] * w2b_ref[blk * seq * seq + so * seq]
            for si in range(1, seq):
                acc = acc + hid[si] * w2b_ref[blk * seq * seq + so * seq + si]
            new_rows.append(acc + b2b_ref[blk * seq + so]
                            + res2[so * bsz:(so + 1) * bsz, :])
        x2d = jnp.concatenate(new_rows, axis=0)
        res2 = x2d

    # ---- backbone_linear on flat = x.reshape(B, seq*h); flat[b] = concat_s x[b, s, :]
    #      single fused K = seq*h dot (lane-concat of the per-s slabs)
    flat = jnp.concatenate([x2d[s * bsz:(s + 1) * bsz, :] for s in range(seq)],
                           axis=1)                                  # (B, SEQ*H) f32
    back = jnp.dot(flat.astype(BF16), wback_ref[...],
                   preferred_element_type=F32) + bback_ref[...]
    backbone_ref[...] = back                        # (B, OUT_DIM), lane-dense

    # ---- clip_proj: 3 x (LayerNorm -> GELU -> Linear)
    t = back
    for i in range(3):
        t = _gelu(_layer_norm(t, lnpg_ref[i], lnpb_ref[i]))
        t = jnp.dot(t.astype(BF16), wp_ref[i],
                    preferred_element_type=F32) + bp_ref[i]
    c_ref[...] = t                                  # (B, CLIP), lane-dense


# ---------------------------------------------------------------------------
# wrapper: one pallas_call, no grid, whole batch per invocation
# ---------------------------------------------------------------------------
def brain_network(x, p):
    bn, seq, hdim = x.shape
    x_tok = x.reshape(bn * seq, hdim)               # free bitcast; token-major rows (b*seq + s)
    vmem = pl.BlockSpec(memory_space=pltpu.MemorySpace.VMEM)
    smem = pl.BlockSpec(memory_space=pltpu.MemorySpace.SMEM)
    backbone2d, c2d = pl.pallas_call(
        brain_kernel,
        out_shape=(jax.ShapeDtypeStruct((bn, OUT_DIM), F32),
                   jax.ShapeDtypeStruct((bn, CLIP), F32)),
        in_specs=[vmem] * 7 + [smem] * 6 + [vmem] * 6,
        out_specs=(vmem, vmem),
    )(x_tok,
      p['ln1_g'], p['ln1_b'], p['w1a'], p['b1a'], p['w1b'], p['b1b'],
      p['ln2_g'], p['ln2_b'], p['w2a'], p['b2a'], p['w2b'], p['b2b'],
      p['w_back'], p['b_back'],
      p['lnp_g'], p['lnp_b'], p['wp'], p['bp'])
    backbone = backbone2d.reshape(bn, -1, CLIP)     # (B, 1, clip_size)
    c = c2d.reshape(bn, -1, CLIP)
    return backbone, c


# ---------------------------------------------------------------------------
# deterministic parameter initialization (PyTorch-Linear-style uniform bounds)
# ---------------------------------------------------------------------------
def init_params(key):
    counter = [0]

    def uniform(shape, bound, dtype=F32):
        counter[0] += 1
        u = jax.random.uniform(jax.random.fold_in(key, counter[0]),
                               shape, F32, -bound, bound)
        return u.astype(dtype)

    p = {}
    bnd_h = 1.0 / math.sqrt(H)
    p['ln1_g'] = jnp.ones((N_BLOCKS, 1, H), F32)
    p['ln1_b'] = jnp.zeros((N_BLOCKS, 1, H), F32)
    p['w1a'] = uniform((N_BLOCKS, H, H), bnd_h, BF16)   # input-major: y = x @ W (bf16 MXU)
    p['b1a'] = uniform((N_BLOCKS, 1, H), bnd_h)
    p['w1b'] = uniform((N_BLOCKS, H, H), bnd_h, BF16)
    p['b1b'] = uniform((N_BLOCKS, 1, H), bnd_h)

    bnd_s = 1.0 / math.sqrt(SEQ)
    # 1-D SMEM-resident scalars (2-D SMEM would pad to 8x128 words each).
    p['ln2_g'] = jnp.ones((N_BLOCKS * SEQ,), F32)
    p['ln2_b'] = jnp.zeros((N_BLOCKS * SEQ,), F32)
    # seq mixers stored flat [blk*S*S + so*S + si]: out[so] = sum_si w[so,si] * in[si]
    p['w2a'] = uniform((N_BLOCKS * SEQ * SEQ,), bnd_s)
    p['b2a'] = uniform((N_BLOCKS * SEQ,), bnd_s)
    p['w2b'] = uniform((N_BLOCKS * SEQ * SEQ,), bnd_s)
    p['b2b'] = uniform((N_BLOCKS * SEQ,), bnd_s)

    bnd_f = 1.0 / math.sqrt(D_FLAT)
    p['w_back'] = uniform((D_FLAT, OUT_DIM), bnd_f, BF16)  # rows indexed by flat (s, h), s-major
    p['b_back'] = uniform((1, OUT_DIM), bnd_f)

    bnd_c = 1.0 / math.sqrt(CLIP)
    p['lnp_g'] = jnp.ones((3, 1, CLIP), F32)
    p['lnp_b'] = jnp.zeros((3, 1, CLIP), F32)
    p['wp'] = uniform((3, CLIP, CLIP), bnd_c, BF16)
    p['bp'] = uniform((3, 1, CLIP), bnd_c)
    return p


# ---------------------------------------------------------------------------
# plain-JAX reference (literal translation of the PyTorch forward, with permutes,
# exact-erf GELU, f32 weights, HIGHEST matmul precision)
# ---------------------------------------------------------------------------
def reference_forward(x, p):
    hp = jax.lax.Precision.HIGHEST

    def ln(t, g, b, eps=1e-5):
        m = t.mean(-1, keepdims=True)
        v = ((t - m) ** 2).mean(-1, keepdims=True)
        return g * (t - m) / jnp.sqrt(v + eps) + b

    def gelu(t):                                     # torch default: exact erf form
        return 0.5 * t * (1.0 + jax.lax.erf(t * 0.7071067811865476))

    bn = x.shape[0]
    ln2_g = p['ln2_g'].reshape(N_BLOCKS, SEQ)
    ln2_b = p['ln2_b'].reshape(N_BLOCKS, SEQ)
    w2a = p['w2a'].reshape(N_BLOCKS, SEQ, SEQ)
    b2a = p['b2a'].reshape(N_BLOCKS, SEQ)
    w2b = p['w2b'].reshape(N_BLOCKS, SEQ, SEQ)
    b2b = p['b2b'].reshape(N_BLOCKS, SEQ)

    y = x
    res1 = x
    res2 = jnp.transpose(x, (0, 2, 1))
    for blk in range(N_BLOCKS):
        t = ln(y, p['ln1_g'][blk, 0], p['ln1_b'][blk, 0])
        t = gelu(jnp.einsum('bsh,hk->bsk', t, p['w1a'][blk].astype(F32), precision=hp)
                 + p['b1a'][blk, 0])
        t = jnp.einsum('bsh,hk->bsk', t, p['w1b'][blk].astype(F32), precision=hp) + p['b1b'][blk, 0]
        y = t + res1
        res1 = y
        yt = jnp.transpose(y, (0, 2, 1))                       # (B, H, S)
        t = ln(yt, ln2_g[blk], ln2_b[blk])
        t = gelu(jnp.einsum('bhs,os->bho', t, w2a[blk], precision=hp) + b2a[blk])
        t = jnp.einsum('bhs,os->bho', t, w2b[blk], precision=hp) + b2b[blk]
        yt = t + res2
        res2 = yt
        y = jnp.transpose(yt, (0, 2, 1))
    flat = y.reshape(bn, -1)
    backbone = (jnp.dot(flat, p['w_back'].astype(F32), precision=hp)
                + p['b_back'][0]).reshape(bn, -1, CLIP)
    h = backbone
    for i in range(3):
        h = gelu(ln(h, p['lnp_g'][i, 0], p['lnp_b'][i, 0]))
        h = jnp.einsum('btc,cd->btd', h, p['wp'][i].astype(F32), precision=hp) + p['bp'][i, 0]
    return backbone, h


if __name__ == "__main__":
    key = jax.random.PRNGKey(0)
    params = init_params(jax.random.fold_in(key, 1))
    x = jax.random.normal(jax.random.fold_in(key, 2), (B, SEQ, H), F32)

    forward = jax.jit(brain_network)
    backbone, c = jax.block_until_ready(forward(x, params))

    rb, rc = reference_forward(x, params)
    # Tolerance covers bf16 MXU operands + tanh-approx GELU vs the f32 / exact-erf reference.
    np.testing.assert_allclose(np.asarray(backbone), np.asarray(rb), rtol=2e-2, atol=3e-2)
    np.testing.assert_allclose(np.asarray(c), np.asarray(rc), rtol=2e-2, atol=3e-2)

    assert backbone.shape == (B, OUT_DIM // CLIP, CLIP)
    assert c.shape == (B, OUT_DIM // CLIP, CLIP)
    print("KERNEL_OK")
</pallas_src>

<mosaic_0001>
module attributes {stable_mosaic.version = 11 : i64} {
  func.func @brain_kernel(%arg0: memref<4x128xf32, #tpu.memory_space<vmem>>, %arg1: memref<4x1x128xf32, #tpu.memory_space<vmem>>, %arg2: memref<4x1x128xf32, #tpu.memory_space<vmem>>, %arg3: memref<4x128x128xbf16, #tpu.memory_space<vmem>>, %arg4: memref<4x1x128xf32, #tpu.memory_space<vmem>>, %arg5: memref<4x128x128xbf16, #tpu.memory_space<vmem>>, %arg6: memref<4x1x128xf32, #tpu.memory_space<vmem>>, %arg7: memref<8xf32, #tpu.memory_space<smem>>, %arg8: memref<8xf32, #tpu.memory_space<smem>>, %arg9: memref<16xf32, #tpu.memory_space<smem>>, %arg10: memref<8xf32, #tpu.memory_space<smem>>, %arg11: memref<16xf32, #tpu.memory_space<smem>>, %arg12: memref<8xf32, #tpu.memory_space<smem>>, %arg13: memref<256x128xbf16, #tpu.memory_space<vmem>>, %arg14: memref<1x128xf32, #tpu.memory_space<vmem>>, %arg15: memref<3x1x128xf32, #tpu.memory_space<vmem>>, %arg16: memref<3x1x128xf32, #tpu.memory_space<vmem>>, %arg17: memref<3x128x128xbf16, #tpu.memory_space<vmem>>, %arg18: memref<3x1x128xf32, #tpu.memory_space<vmem>>, %arg19: memref<2x128xf32, #tpu.memory_space<vmem>>, %arg20: memref<2x128xf32, #tpu.memory_space<vmem>>) attributes {dimension_semantics = [], scalar_prefetch = 0 : i64, scratch_operands = 0 : i64, tpu.core_type = #tpu.core_type<tc>} {
    %c0 = arith.constant 0 : index
    %c0_0 = arith.constant 0 : index
    %0 = vector.load %arg0[%c0, %c0_0] : memref<4x128xf32, #tpu.memory_space<vmem>>, vector<4x128xf32>
    %1 = vector.extract_strided_slice %0 {offsets = [0, 0], sizes = [1, 128], strides = [1, 1]} : vector<4x128xf32> to vector<1x128xf32>
    %2 = vector.extract_strided_slice %0 {offsets = [2, 0], sizes = [1, 128], strides = [1, 1]} : vector<4x128xf32> to vector<1x128xf32>
    %3 = vector.extract_strided_slice %0 {offsets = [1, 0], sizes = [1, 128], strides = [1, 1]} : vector<4x128xf32> to vector<1x128xf32>
    %4 = vector.extract_strided_slice %0 {offsets = [3, 0], sizes = [1, 128], strides = [1, 1]} : vector<4x128xf32> to vector<1x128xf32>
    %5 = tpu.concatenate %1, %2, %3, %4 in 0 : vector<1x128xf32>, vector<1x128xf32>, vector<1x128xf32>, vector<1x128xf32> -> vector<4x128xf32>
    %c0_1 = arith.constant 0 : index
    %c0_2 = arith.constant 0 : index
    %c0_3 = arith.constant 0 : index
    %6 = vector.load %arg1[%c0_1, %c0_2, %c0_3] : memref<4x1x128xf32, #tpu.memory_space<vmem>>, vector<1x1x128xf32>
    %7 = vector.shape_cast %6 : vector<1x1x128xf32> to vector<1x128xf32>
    %c0_4 = arith.constant 0 : index
    %c0_5 = arith.constant 0 : index
    %c0_6 = arith.constant 0 : index
    %8 = vector.load %arg2[%c0_4, %c0_5, %c0_6] : memref<4x1x128xf32, #tpu.memory_space<vmem>>, vector<1x1x128xf32>
    %9 = vector.shape_cast %8 : vector<1x1x128xf32> to vector<1x128xf32>
    %cst = arith.constant dense<0.000000e+00> : vector<4xf32>
    %10 = vector.multi_reduction <add>, %5, %cst [1] : vector<4x128xf32> to vector<4xf32>
    %11 = vector.shape_cast %10 : vector<4xf32> to vector<4x1xf32>
    %12 = arith.mulf %5, %5 : vector<4x128xf32>
    %cst_7 = arith.constant dense<0.000000e+00> : vector<4xf32>
    %13 = vector.multi_reduction <add>, %12, %cst_7 [1] : vector<4x128xf32> to vector<4xf32>
    %14 = vector.shape_cast %13 : vector<4xf32> to vector<4x1xf32>
    %cst_8 = arith.constant 7.812500e-03 : f32
    %15 = vector.broadcast %cst_8 : f32 to vector<4x1xf32>
    %16 = arith.mulf %11, %15 : vector<4x1xf32>
    %cst_9 = arith.constant 7.812500e-03 : f32
    %17 = vector.broadcast %cst_9 : f32 to vector<4x1xf32>
    %18 = arith.mulf %14, %17 : vector<4x1xf32>
    %19 = arith.mulf %16, %16 : vector<4x1xf32>
    %20 = arith.subf %18, %19 : vector<4x1xf32>
    %21 = vector.broadcast %16 : vector<4x1xf32> to vector<4x128xf32>
    %22 = arith.subf %5, %21 : vector<4x128xf32>
    %cst_10 = arith.constant 9.99999974E-6 : f32
    %23 = vector.broadcast %cst_10 : f32 to vector<4x1xf32>
    %24 = arith.addf %20, %23 : vector<4x1xf32>
    %25 = math.rsqrt %24 : vector<4x1xf32>
    %26 = vector.broadcast %25 : vector<4x1xf32> to vector<4x128xf32>
    %27 = arith.mulf %22, %26 : vector<4x128xf32>
    %28 = vector.broadcast %7 : vector<1x128xf32> to vector<4x128xf32>
    %29 = arith.mulf %27, %28 : vector<4x128xf32>
    %30 = vector.broadcast %9 : vector<1x128xf32> to vector<4x128xf32>
    %31 = arith.addf %29, %30 : vector<4x128xf32>
    %32 = arith.truncf %31 : vector<4x128xf32> to vector<4x128xbf16>
    %c0_11 = arith.constant 0 : index
    %c0_12 = arith.constant 0 : index
    %c0_13 = arith.constant 0 : index
    %33 = vector.load %arg3[%c0_11, %c0_12, %c0_13] : memref<4x128x128xbf16, #tpu.memory_space<vmem>>, vector<1x128x128xbf16>
    %34 = vector.shape_cast %33 : vector<1x128x128xbf16> to vector<128x128xbf16>
    %cst_14 = arith.constant dense<0.000000e+00> : vector<4x128xf32>
    %35 = tpu.matmul %32, %34, %cst_14 {dimension_numbers = #tpu.dot_dimension_numbers<[1], [0], [0], [1], [0, 0, 1, 1], [], []>} : vector<4x128xbf16>, vector<128x128xbf16>, vector<4x128xf32> -> vector<4x128xf32>
    %c0_15 = arith.constant 0 : index
    %c0_16 = arith.constant 0 : index
    %c0_17 = arith.constant 0 : index
    %36 = vector.load %arg4[%c0_15, %c0_16, %c0_17] : memref<4x1x128xf32, #tpu.memory_space<vmem>>, vector<1x1x128xf32>
    %37 = vector.shape_cast %36 : vector<1x1x128xf32> to vector<1x128xf32>
    %38 = vector.broadcast %37 : vector<1x128xf32> to vector<4x128xf32>
    %39 = arith.addf %35, %38 : vector<4x128xf32>
    %cst_18 = arith.constant 5.000000e-01 : f32
    %40 = vector.broadcast %cst_18 : f32 to vector<4x128xf32>
    %41 = arith.mulf %40, %39 : vector<4x128xf32>
    %cst_19 = arith.constant 4.471500e-02 : f32
    %42 = vector.broadcast %cst_19 : f32 to vector<4x128xf32>
    %43 = arith.mulf %42, %39 : vector<4x128xf32>
    %44 = arith.mulf %43, %39 : vector<4x128xf32>
    %45 = arith.mulf %44, %39 : vector<4x128xf32>
    %46 = arith.addf %39, %45 : vector<4x128xf32>
    %cst_20 = arith.constant 0.797884583 : f32
    %47 = vector.broadcast %cst_20 : f32 to vector<4x128xf32>
    %48 = arith.mulf %47, %46 : vector<4x128xf32>
    %49 = math.tanh %48 : vector<4x128xf32>
    %cst_21 = arith.constant 1.000000e+00 : f32
    %50 = vector.broadcast %cst_21 : f32 to vector<4x128xf32>
    %51 = arith.addf %50, %49 : vector<4x128xf32>
    %52 = arith.mulf %41, %51 : vector<4x128xf32>
    %53 = arith.truncf %52 : vector<4x128xf32> to vector<4x128xbf16>
    %c0_22 = arith.constant 0 : index
    %c0_23 = arith.constant 0 : index
    %c0_24 = arith.constant 0 : index
    %54 = vector.load %arg5[%c0_22, %c0_23, %c0_24] : memref<4x128x128xbf16, #tpu.memory_space<vmem>>, vector<1x128x128xbf16>
    %55 = vector.shape_cast %54 : vector<1x128x128xbf16> to vector<128x128xbf16>
    %cst_25 = arith.constant dense<0.000000e+00> : vector<4x128xf32>
    %56 = tpu.matmul %53, %55, %cst_25 {dimension_numbers = #tpu.dot_dimension_numbers<[1], [0], [0], [1], [0, 0, 1, 1], [], []>} : vector<4x128xbf16>, vector<128x128xbf16>, vector<4x128xf32> -> vector<4x128xf32>
    %c0_26 = arith.constant 0 : index
    %c0_27 = arith.constant 0 : index
    %c0_28 = arith.constant 0 : index
    %57 = vector.load %arg6[%c0_26, %c0_27, %c0_28] : memref<4x1x128xf32, #tpu.memory_space<vmem>>, vector<1x1x128xf32>
    %58 = vector.shape_cast %57 : vector<1x1x128xf32> to vector<1x128xf32>
    %59 = vector.broadcast %58 : vector<1x128xf32> to vector<4x128xf32>
    %60 = arith.addf %56, %59 : vector<4x128xf32>
    %61 = arith.addf %60, %5 : vector<4x128xf32>
    %62 = vector.extract_strided_slice %61 {offsets = [0, 0], sizes = [2, 128], strides = [1, 1]} : vector<4x128xf32> to vector<2x128xf32>
    %63 = vector.extract_strided_slice %61 {offsets = [2, 0], sizes = [2, 128], strides = [1, 1]} : vector<4x128xf32> to vector<2x128xf32>
    %64 = arith.mulf %62, %62 : vector<2x128xf32>
    %65 = arith.addf %62, %63 : vector<2x128xf32>
    %66 = arith.mulf %63, %63 : vector<2x128xf32>
    %67 = arith.addf %64, %66 : vector<2x128xf32>
    %cst_29 = arith.constant 5.000000e-01 : f32
    %68 = vector.broadcast %cst_29 : f32 to vector<2x128xf32>
    %69 = arith.mulf %65, %68 : vector<2x128xf32>
    %cst_30 = arith.constant 5.000000e-01 : f32
    %70 = vector.broadcast %cst_30 : f32 to vector<2x128xf32>
    %71 = arith.mulf %67, %70 : vector<2x128xf32>
    %72 = arith.mulf %69, %69 : vector<2x128xf32>
    %73 = arith.subf %71, %72 : vector<2x128xf32>
    %cst_31 = arith.constant 9.99999974E-6 : f32
    %74 = vector.broadcast %cst_31 : f32 to vector<2x128xf32>
    %75 = arith.addf %73, %74 : vector<2x128xf32>
    %76 = math.rsqrt %75 : vector<2x128xf32>
    %77 = arith.subf %62, %69 : vector<2x128xf32>
    %78 = arith.mulf %77, %76 : vector<2x128xf32>
    %c0_32 = arith.constant 0 : index
    %79 = memref.load %arg7[%c0_32] : memref<8xf32, #tpu.memory_space<smem>>
    %80 = vector.broadcast %79 : f32 to vector<2x128xf32>
    %81 = arith.mulf %78, %80 : vector<2x128xf32>
    %c0_33 = arith.constant 0 : index
    %82 = memref.load %arg8[%c0_33] : memref<8xf32, #tpu.memory_space<smem>>
    %83 = vector.broadcast %82 : f32 to vector<2x128xf32>
    %84 = arith.addf %81, %83 : vector<2x128xf32>
    %85 = arith.subf %63, %69 : vector<2x128xf32>
    %86 = arith.mulf %85, %76 : vector<2x128xf32>
    %c1 = arith.constant 1 : index
    %87 = memref.load %arg7[%c1] : memref<8xf32, #tpu.memory_space<smem>>
    %88 = vector.broadcast %87 : f32 to vector<2x128xf32>
    %89 = arith.mulf %86, %88 : vector<2x128xf32>
    %c1_34 = arith.constant 1 : index
    %90 = memref.load %arg8[%c1_34] : memref<8xf32, #tpu.memory_space<smem>>
    %91 = vector.broadcast %90 : f32 to vector<2x128xf32>
    %92 = arith.addf %89, %91 : vector<2x128xf32>
    %c0_35 = arith.constant 0 : index
    %93 = memref.load %arg9[%c0_35] : memref<16xf32, #tpu.memory_space<smem>>
    %94 = vector.broadcast %93 : f32 to vector<2x128xf32>
    %95 = arith.mulf %84, %94 : vector<2x128xf32>
    %c1_36 = arith.constant 1 : index
    %96 = memref.load %arg9[%c1_36] : memref<16xf32, #tpu.memory_space<smem>>
    %97 = vector.broadcast %96 : f32 to vector<2x128xf32>
    %98 = arith.mulf %92, %97 : vector<2x128xf32>
    %99 = arith.addf %95, %98 : vector<2x128xf32>
    %c0_37 = arith.constant 0 : index
    %100 = memref.load %arg10[%c0_37] : memref<8xf32, #tpu.memory_space<smem>>
    %101 = vector.broadcast %100 : f32 to vector<2x128xf32>
    %102 = arith.addf %99, %101 : vector<2x128xf32>
    %cst_38 = arith.constant 5.000000e-01 : f32
    %103 = vector.broadcast %cst_38 : f32 to vector<2x128xf32>
    %104 = arith.mulf %103, %102 : vector<2x128xf32>
    %cst_39 = arith.constant 4.471500e-02 : f32
    %105 = vector.broadcast %cst_39 : f32 to vector<2x128xf32>
    %106 = arith.mulf %105, %102 : vector<2x128xf32>
    %107 = arith.mulf %106, %102 : vector<2x128xf32>
    %108 = arith.mulf %107, %102 : vector<2x128xf32>
    %109 = arith.addf %102, %108 : vector<2x128xf32>
    %cst_40 = arith.constant 0.797884583 : f32
    %110 = vector.broadcast %cst_40 : f32 to vector<2x128xf32>
    %111 = arith.mulf %110, %109 : vector<2x128xf32>
    %112 = math.tanh %111 : vector<2x128xf32>
    %cst_41 = arith.constant 1.000000e+00 : f32
    %113 = vector.broadcast %cst_41 : f32 to vector<2x128xf32>
    %114 = arith.addf %113, %112 : vector<2x128xf32>
    %115 = arith.mulf %104, %114 : vector<2x128xf32>
    %c2 = arith.constant 2 : index
    %116 = memref.load %arg9[%c2] : memref<16xf32, #tpu.memory_space<smem>>
    %117 = vector.broadcast %116 : f32 to vector<2x128xf32>
    %118 = arith.mulf %84, %117 : vector<2x128xf32>
    %c3 = arith.constant 3 : index
    %119 = memref.load %arg9[%c3] : memref<16xf32, #tpu.memory_space<smem>>
    %120 = vector.broadcast %119 : f32 to vector<2x128xf32>
    %121 = arith.mulf %92, %120 : vector<2x128xf32>
    %122 = arith.addf %118, %121 : vector<2x128xf32>
    %c1_42 = arith.constant 1 : index
    %123 = memref.load %arg10[%c1_42] : memref<8xf32, #tpu.memory_space<smem>>
    %124 = vector.broadcast %123 : f32 to vector<2x128xf32>
    %125 = arith.addf %122, %124 : vector<2x128xf32>
    %cst_43 = arith.constant 5.000000e-01 : f32
    %126 = vector.broadcast %cst_43 : f32 to vector<2x128xf32>
    %127 = arith.mulf %126, %125 : vector<2x128xf32>
    %cst_44 = arith.constant 4.471500e-02 : f32
    %128 = vector.broadcast %cst_44 : f32 to vector<2x128xf32>
    %129 = arith.mulf %128, %125 : vector<2x128xf32>
    %130 = arith.mulf %129, %125 : vector<2x128xf32>
    %131 = arith.mulf %130, %125 : vector<2x128xf32>
    %132 = arith.addf %125, %131 : vector<2x128xf32>
    %cst_45 = arith.constant 0.797884583 : f32
    %133 = vector.broadcast %cst_45 : f32 to vector<2x128xf32>
    %134 = arith.mulf %133, %132 : vector<2x128xf32>
    %135 = math.tanh %134 : vector<2x128xf32>
    %cst_46 = arith.constant 1.000000e+00 : f32
    %136 = vector.broadcast %cst_46 : f32 to vector<2x128xf32>
    %137 = arith.addf %136, %135 : vector<2x128xf32>
    %138 = arith.mulf %127, %137 : vector<2x128xf32>
    %c0_47 = arith.constant 0 : index
    %139 = memref.load %arg11[%c0_47] : memref<16xf32, #tpu.memory_space<smem>>
    %140 = vector.broadcast %139 : f32 to vector<2x128xf32>
    %141 = arith.mulf %115, %140 : vector<2x128xf32>
    %c1_48 = arith.constant 1 : index
    %142 = memref.load %arg11[%c1_48] : memref<16xf32, #tpu.memory_space<smem>>
    %143 = vector.broadcast %142 : f32 to vector<2x128xf32>
    %144 = arith.mulf %138, %143 : vector<2x128xf32>
    %145 = arith.addf %141, %144 : vector<2x128xf32>
    %c0_49 = arith.constant 0 : index
    %146 = memref.load %arg12[%c0_49] : memref<8xf32, #tpu.memory_space<smem>>
    %147 = vector.broadcast %146 : f32 to vector<2x128xf32>
    %148 = arith.addf %145, %147 : vector<2x128xf32>
    %149 = vector.extract_strided_slice %5 {offsets = [0, 0], sizes = [2, 128], strides = [1, 1]} : vector<4x128xf32> to vector<2x128xf32>
    %150 = arith.addf %148, %149 : vector<2x128xf32>
    %c2_50 = arith.constant 2 : index
    %151 = memref.load %arg11[%c2_50] : memref<16xf32, #tpu.memory_space<smem>>
    %152 = vector.broadcast %151 : f32 to vector<2x128xf32>
    %153 = arith.mulf %115, %152 : vector<2x128xf32>
    %c3_51 = arith.constant 3 : index
    %154 = memref.load %arg11[%c3_51] : memref<16xf32, #tpu.memory_space<smem>>
    %155 = vector.broadcast %154 : f32 to vector<2x128xf32>
    %156 = arith.mulf %138, %155 : vector<2x128xf32>
    %157 = arith.addf %153, %156 : vector<2x128xf32>
    %c1_52 = arith.constant 1 : index
    %158 = memref.load %arg12[%c1_52] : memref<8xf32, #tpu.memory_space<smem>>
    %159 = vector.broadcast %158 : f32 to vector<2x128xf32>
    %160 = arith.addf %157, %159 : vector<2x128xf32>
    %161 = vector.extract_strided_slice %5 {offsets = [2, 0], sizes = [2, 128], strides = [1, 1]} : vector<4x128xf32> to vector<2x128xf32>
    %162 = arith.addf %160, %161 : vector<2x128xf32>
    %163 = tpu.concatenate %150, %162 in 0 : vector<2x128xf32>, vector<2x128xf32> -> vector<4x128xf32>
    %c1_53 = arith.constant 1 : index
    %c0_54 = arith.constant 0 : index
    %c0_55 = arith.constant 0 : index
    %164 = vector.load %arg1[%c1_53, %c0_54, %c0_55] : memref<4x1x128xf32, #tpu.memory_space<vmem>>, vector<1x1x128xf32>
    %165 = vector.shape_cast %164 : vector<1x1x128xf32> to vector<1x128xf32>
    %c1_56 = arith.constant 1 : index
    %c0_57 = arith.constant 0 : index
    %c0_58 = arith.constant 0 : index
    %166 = vector.load %arg2[%c1_56, %c0_57, %c0_58] : memref<4x1x128xf32, #tpu.memory_space<vmem>>, vector<1x1x128xf32>
    %167 = vector.shape_cast %166 : vector<1x1x128xf32> to vector<1x128xf32>
    %cst_59 = arith.constant dense<0.000000e+00> : vector<4xf32>
    %168 = vector.multi_reduction <add>, %163, %cst_59 [1] : vector<4x128xf32> to vector<4xf32>
    %169 = vector.shape_cast %168 : vector<4xf32> to vector<4x1xf32>
    %170 = arith.mulf %163, %163 : vector<4x128xf32>
    %cst_60 = arith.constant dense<0.000000e+00> : vector<4xf32>
    %171 = vector.multi_reduction <add>, %170, %cst_60 [1] : vector<4x128xf32> to vector<4xf32>
    %172 = vector.shape_cast %171 : vector<4xf32> to vector<4x1xf32>
    %cst_61 = arith.constant 7.812500e-03 : f32
    %173 = vector.broadcast %cst_61 : f32 to vector<4x1xf32>
    %174 = arith.mulf %169, %173 : vector<4x1xf32>
    %cst_62 = arith.constant 7.812500e-03 : f32
    %175 = vector.broadcast %cst_62 : f32 to vector<4x1xf32>
    %176 = arith.mulf %172, %175 : vector<4x1xf32>
    %177 = arith.mulf %174, %174 : vector<4x1xf32>
    %178 = arith.subf %176, %177 : vector<4x1xf32>
    %179 = vector.broadcast %174 : vector<4x1xf32> to vector<4x128xf32>
    %180 = arith.subf %163, %179 : vector<4x128xf32>
    %cst_63 = arith.constant 9.99999974E-6 : f32
    %181 = vector.broadcast %cst_63 : f32 to vector<4x1xf32>
    %182 = arith.addf %178, %181 : vector<4x1xf32>
    %183 = math.rsqrt %182 : vector<4x1xf32>
    %184 = vector.broadcast %183 : vector<4x1xf32> to vector<4x128xf32>
    %185 = arith.mulf %180, %184 : vector<4x128xf32>
    %186 = vector.broadcast %165 : vector<1x128xf32> to vector<4x128xf32>
    %187 = arith.mulf %185, %186 : vector<4x128xf32>
    %188 = vector.broadcast %167 : vector<1x128xf32> to vector<4x128xf32>
    %189 = arith.addf %187, %188 : vector<4x128xf32>
    %190 = arith.truncf %189 : vector<4x128xf32> to vector<4x128xbf16>
    %c1_64 = arith.constant 1 : index
    %c0_65 = arith.constant 0 : index
    %c0_66 = arith.constant 0 : index
    %191 = vector.load %arg3[%c1_64, %c0_65, %c0_66] : memref<4x128x128xbf16, #tpu.memory_space<vmem>>, vector<1x128x128xbf16>
    %192 = vector.shape_cast %191 : vector<1x128x128xbf16> to vector<128x128xbf16>
    %cst_67 = arith.constant dense<0.000000e+00> : vector<4x128xf32>
    %193 = tpu.matmul %190, %192, %cst_67 {dimension_numbers = #tpu.dot_dimension_numbers<[1], [0], [0], [1], [0, 0, 1, 1], [], []>} : vector<4x128xbf16>, vector<128x128xbf16>, vector<4x128xf32> -> vector<4x128xf32>
    %c1_68 = arith.constant 1 : index
    %c0_69 = arith.constant 0 : index
    %c0_70 = arith.constant 0 : index
    %194 = vector.load %arg4[%c1_68, %c0_69, %c0_70] : memref<4x1x128xf32, #tpu.memory_space<vmem>>, vector<1x1x128xf32>
    %195 = vector.shape_cast %194 : vector<1x1x128xf32> to vector<1x128xf32>
    %196 = vector.broadcast %195 : vector<1x128xf32> to vector<4x128xf32>
    %197 = arith.addf %193, %196 : vector<4x128xf32>
    %cst_71 = arith.constant 5.000000e-01 : f32
    %198 = vector.broadcast %cst_71 : f32 to vector<4x128xf32>
    %199 = arith.mulf %198, %197 : vector<4x128xf32>
    %cst_72 = arith.constant 4.471500e-02 : f32
    %200 = vector.broadcast %cst_72 : f32 to vector<4x128xf32>
    %201 = arith.mulf %200, %197 : vector<4x128xf32>
    %202 = arith.mulf %201, %197 : vector<4x128xf32>
    %203 = arith.mulf %202, %197 : vector<4x128xf32>
    %204 = arith.addf %197, %203 : vector<4x128xf32>
    %cst_73 = arith.constant 0.797884583 : f32
    %205 = vector.broadcast %cst_73 : f32 to vector<4x128xf32>
    %206 = arith.mulf %205, %204 : vector<4x128xf32>
    %207 = math.tanh %206 : vector<4x128xf32>
    %cst_74 = arith.constant 1.000000e+00 : f32
    %208 = vector.broadcast %cst_74 : f32 to vector<4x128xf32>
    %209 = arith.addf %208, %207 : vector<4x128xf32>
    %210 = arith.mulf %199, %209 : vector<4x128xf32>
    %211 = arith.truncf %210 : vector<4x128xf32> to vector<4x128xbf16>
    %c1_75 = arith.constant 1 : index
    %c0_76 = arith.constant 0 : index
    %c0_77 = arith.constant 0 : index
    %212 = vector.load %arg5[%c1_75, %c0_76, %c0_77] : memref<4x128x128xbf16, #tpu.memory_space<vmem>>, vector<1x128x128xbf16>
    %213 = vector.shape_cast %212 : vector<1x128x128xbf16> to vector<128x128xbf16>
    %cst_78 = arith.constant dense<0.000000e+00> : vector<4x128xf32>
    %214 = tpu.matmul %211, %213, %cst_78 {dimension_numbers = #tpu.dot_dimension_numbers<[1], [0], [0], [1], [0, 0, 1, 1], [], []>} : vector<4x128xbf16>, vector<128x128xbf16>, vector<4x128xf32> -> vector<4x128xf32>
    %c1_79 = arith.constant 1 : index
    %c0_80 = arith.constant 0 : index
    %c0_81 = arith.constant 0 : index
    %215 = vector.load %arg6[%c1_79, %c0_80, %c0_81] : memref<4x1x128xf32, #tpu.memory_space<vmem>>, vector<1x1x128xf32>
    %216 = vector.shape_cast %215 : vector<1x1x128xf32> to vector<1x128xf32>
    %217 = vector.broadcast %216 : vector<1x128xf32> to vector<4x128xf32>
    %218 = arith.addf %214, %217 : vector<4x128xf32>
    %219 = arith.addf %218, %61 : vector<4x128xf32>
    %220 = vector.extract_strided_slice %219 {offsets = [0, 0], sizes = [2, 128], strides = [1, 1]} : vector<4x128xf32> to vector<2x128xf32>
    %221 = vector.extract_strided_slice %219 {offsets = [2, 0], sizes = [2, 128], strides = [1, 1]} : vector<4x128xf32> to vector<2x128xf32>
    %222 = arith.mulf %220, %220 : vector<2x128xf32>
    %223 = arith.addf %220, %221 : vector<2x128xf32>
    %224 = arith.mulf %221, %221 : vector<2x128xf32>
    %225 = arith.addf %222, %224 : vector<2x128xf32>
    %cst_82 = arith.constant 5.000000e-01 : f32
    %226 = vector.broadcast %cst_82 : f32 to vector<2x128xf32>
    %227 = arith.mulf %223, %226 : vector<2x128xf32>
    %cst_83 = arith.constant 5.000000e-01 : f32
    %228 = vector.broadcast %cst_83 : f32 to vector<2x128xf32>
    %229 = arith.mulf %225, %228 : vector<2x128xf32>
    %230 = arith.mulf %227, %227 : vector<2x128xf32>
    %231 = arith.subf %229, %230 : vector<2x128xf32>
    %cst_84 = arith.constant 9.99999974E-6 : f32
    %232 = vector.broadcast %cst_84 : f32 to vector<2x128xf32>
    %233 = arith.addf %231, %232 : vector<2x128xf32>
    %234 = math.rsqrt %233 : vector<2x128xf32>
    %235 = arith.subf %220, %227 : vector<2x128xf32>
    %236 = arith.mulf %235, %234 : vector<2x128xf32>
    %c2_85 = arith.constant 2 : index
    %237 = memref.load %arg7[%c2_85] : memref<8xf32, #tpu.memory_space<smem>>
    %238 = vector.broadcast %237 : f32 to vector<2x128xf32>
    %239 = arith.mulf %236, %238 : vector<2x128xf32>
    %c2_86 = arith.constant 2 : index
    %240 = memref.load %arg8[%c2_86] : memref<8xf32, #tpu.memory_space<smem>>
    %241 = vector.broadcast %240 : f32 to vector<2x128xf32>
    %242 = arith.addf %239, %241 : vector<2x128xf32>
    %243 = arith.subf %221, %227 : vector<2x128xf32>
    %244 = arith.mulf %243, %234 : vector<2x128xf32>
    %c3_87 = arith.constant 3 : index
    %245 = memref.load %arg7[%c3_87] : memref<8xf32, #tpu.memory_space<smem>>
    %246 = vector.broadcast %245 : f32 to vector<2x128xf32>
    %247 = arith.mulf %244, %246 : vector<2x128xf32>
    %c3_88 = arith.constant 3 : index
    %248 = memref.load %arg8[%c3_88] : memref<8xf32, #tpu.memory_space<smem>>
    %249 = vector.broadcast %248 : f32 to vector<2x128xf32>
    %250 = arith.addf %247, %249 : vector<2x128xf32>
    %c4 = arith.constant 4 : index
    %251 = memref.load %arg9[%c4] : memref<16xf32, #tpu.memory_space<smem>>
    %252 = vector.broadcast %251 : f32 to vector<2x128xf32>
    %253 = arith.mulf %242, %252 : vector<2x128xf32>
    %c5 = arith.constant 5 : index
    %254 = memref.load %arg9[%c5] : memref<16xf32, #tpu.memory_space<smem>>
    %255 = vector.broadcast %254 : f32 to vector<2x128xf32>
    %256 = arith.mulf %250, %255 : vector<2x128xf32>
    %257 = arith.addf %253, %256 : vector<2x128xf32>
    %c2_89 = arith.constant 2 : index
    %258 = memref.load %arg10[%c2_89] : memref<8xf32, #tpu.memory_space<smem>>
    %259 = vector.broadcast %258 : f32 to vector<2x128xf32>
    %260 = arith.addf %257, %259 : vector<2x128xf32>
    %cst_90 = arith.constant 5.000000e-01 : f32
    %261 = vector.broadcast %cst_90 : f32 to vector<2x128xf32>
    %262 = arith.mulf %261, %260 : vector<2x128xf32>
    %cst_91 = arith.constant 4.471500e-02 : f32
    %263 = vector.broadcast %cst_91 : f32 to vector<2x128xf32>
    %264 = arith.mulf %263, %260 : vector<2x128xf32>
    %265 = arith.mulf %264, %260 : vector<2x128xf32>
    %266 = arith.mulf %265, %260 : vector<2x128xf32>
    %267 = arith.addf %260, %266 : vector<2x128xf32>
    %cst_92 = arith.constant 0.797884583 : f32
    %268 = vector.broadcast %cst_92 : f32 to vector<2x128xf32>
    %269 = arith.mulf %268, %267 : vector<2x128xf32>
    %270 = math.tanh %269 : vector<2x128xf32>
    %cst_93 = arith.constant 1.000000e+00 : f32
    %271 = vector.broadcast %cst_93 : f32 to vector<2x128xf32>
    %272 = arith.addf %271, %270 : vector<2x128xf32>
    %273 = arith.mulf %262, %272 : vector<2x128xf32>
    %c6 = arith.constant 6 : index
    %274 = memref.load %arg9[%c6] : memref<16xf32, #tpu.memory_space<smem>>
    %275 = vector.broadcast %274 : f32 to vector<2x128xf32>
    %276 = arith.mulf %242, %275 : vector<2x128xf32>
    %c7 = arith.constant 7 : index
    %277 = memref.load %arg9[%c7] : memref<16xf32, #tpu.memory_space<smem>>
    %278 = vector.broadcast %277 : f32 to vector<2x128xf32>
    %279 = arith.mulf %250, %278 : vector<2x128xf32>
    %280 = arith.addf %276, %279 : vector<2x128xf32>
    %c3_94 = arith.constant 3 : index
    %281 = memref.load %arg10[%c3_94] : memref<8xf32, #tpu.memory_space<smem>>
    %282 = vector.broadcast %281 : f32 to vector<2x128xf32>
    %283 = arith.addf %280, %282 : vector<2x128xf32>
    %cst_95 = arith.constant 5.000000e-01 : f32
    %284 = vector.broadcast %cst_95 : f32 to vector<2x128xf32>
    %285 = arith.mulf %284, %283 : vector<2x128xf32>
    %cst_96 = arith.constant 4.471500e-02 : f32
    %286 = vector.broadcast %cst_96 : f32 to vector<2x128xf32>
    %287 = arith.mulf %286, %283 : vector<2x128xf32>
    %288 = arith.mulf %287, %283 : vector<2x128xf32>
    %289 = arith.mulf %288, %283 : vector<2x128xf32>
    %290 = arith.addf %283, %289 : vector<2x128xf32>
    %cst_97 = arith.constant 0.797884583 : f32
    %291 = vector.broadcast %cst_97 : f32 to vector<2x128xf32>
    %292 = arith.mulf %291, %290 : vector<2x128xf32>
    %293 = math.tanh %292 : vector<2x128xf32>
    %cst_98 = arith.constant 1.000000e+00 : f32
    %294 = vector.broadcast %cst_98 : f32 to vector<2x128xf32>
    %295 = arith.addf %294, %293 : vector<2x128xf32>
    %296 = arith.mulf %285, %295 : vector<2x128xf32>
    %c4_99 = arith.constant 4 : index
    %297 = memref.load %arg11[%c4_99] : memref<16xf32, #tpu.memory_space<smem>>
    %298 = vector.broadcast %297 : f32 to vector<2x128xf32>
    %299 = arith.mulf %273, %298 : vector<2x128xf32>
    %c5_100 = arith.constant 5 : index
    %300 = memref.load %arg11[%c5_100] : memref<16xf32, #tpu.memory_space<smem>>
    %301 = vector.broadcast %300 : f32 to vector<2x128xf32>
    %302 = arith.mulf %296, %301 : vector<2x128xf32>
    %303 = arith.addf %299, %302 : vector<2x128xf32>
    %c2_101 = arith.constant 2 : index
    %304 = memref.load %arg12[%c2_101] : memref<8xf32, #tpu.memory_space<smem>>
    %305 = vector.broadcast %304 : f32 to vector<2x128xf32>
    %306 = arith.addf %303, %305 : vector<2x128xf32>
    %307 = vector.extract_strided_slice %163 {offsets = [0, 0], sizes = [2, 128], strides = [1, 1]} : vector<4x128xf32> to vector<2x128xf32>
    %308 = arith.addf %306, %307 : vector<2x128xf32>
    %c6_102 = arith.constant 6 : index
    %309 = memref.load %arg11[%c6_102] : memref<16xf32, #tpu.memory_space<smem>>
    %310 = vector.broadcast %309 : f32 to vector<2x128xf32>
    %311 = arith.mulf %273, %310 : vector<2x128xf32>
    %c7_103 = arith.constant 7 : index
    %312 = memref.load %arg11[%c7_103] : memref<16xf32, #tpu.memory_space<smem>>
    %313 = vector.broadcast %312 : f32 to vector<2x128xf32>
    %314 = arith.mulf %296, %313 : vector<2x128xf32>
    %315 = arith.addf %311, %314 : vector<2x128xf32>
    %c3_104 = arith.constant 3 : index
    %316 = memref.load %arg12[%c3_104] : memref<8xf32, #tpu.memory_space<smem>>
    %317 = vector.broadcast %316 : f32 to vector<2x128xf32>
    %318 = arith.addf %315, %317 : vector<2x128xf32>
    %319 = vector.extract_strided_slice %163 {offsets = [2, 0], sizes = [2, 128], strides = [1, 1]} : vector<4x128xf32> to vector<2x128xf32>
    %320 = arith.addf %318, %319 : vector<2x128xf32>
    %321 = tpu.concatenate %308, %320 in 0 : vector<2x128xf32>, vector<2x128xf32> -> vector<4x128xf32>
    %c2_105 = arith.constant 2 : index
    %c0_106 = arith.constant 0 : index
    %c0_107 = arith.constant 0 : index
    %322 = vector.load %arg1[%c2_105, %c0_106, %c0_107] : memref<4x1x128xf32, #tpu.memory_space<vmem>>, vector<1x1x128xf32>
    %323 = vector.shape_cast %322 : vector<1x1x128xf32> to vector<1x128xf32>
    %c2_108 = arith.constant 2 : index
    %c0_109 = arith.constant 0 : index
    %c0_110 = arith.constant 0 : index
    %324 = vector.load %arg2[%c2_108, %c0_109, %c0_110] : memref<4x1x128xf32, #tpu.memory_space<vmem>>, vector<1x1x128xf32>
    %325 = vector.shape_cast %324 : vector<1x1x128xf32> to vector<1x128xf32>
    %cst_111 = arith.constant dense<0.000000e+00> : vector<4xf32>
    %326 = vector.multi_reduction <add>, %321, %cst_111 [1] : vector<4x128xf32> to vector<4xf32>
    %327 = vector.shape_cast %326 : vector<4xf32> to vector<4x1xf32>
    %328 = arith.mulf %321, %321 : vector<4x128xf32>
    %cst_112 = arith.constant dense<0.000000e+00> : vector<4xf32>
    %329 = vector.multi_reduction <add>, %328, %cst_112 [1] : vector<4x128xf32> to vector<4xf32>
    %330 = vector.shape_cast %329 : vector<4xf32> to vector<4x1xf32>
    %cst_113 = arith.constant 7.812500e-03 : f32
    %331 = vector.broadcast %cst_113 : f32 to vector<4x1xf32>
    %332 = arith.mulf %327, %331 : vector<4x1xf32>
    %cst_114 = arith.constant 7.812500e-03 : f32
    %333 = vector.broadcast %cst_114 : f32 to vector<4x1xf32>
    %334 = arith.mulf %330, %333 : vector<4x1xf32>
    %335 = arith.mulf %332, %332 : vector<4x1xf32>
    %336 = arith.subf %334, %335 : vector<4x1xf32>
    %337 = vector.broadcast %332 : vector<4x1xf32> to vector<4x128xf32>
    %338 = arith.subf %321, %337 : vector<4x128xf32>
    %cst_115 = arith.constant 9.99999974E-6 : f32
    %339 = vector.broadcast %cst_115 : f32 to vector<4x1xf32>
    %340 = arith.addf %336, %339 : vector<4x1xf32>
    %341 = math.rsqrt %340 : vector<4x1xf32>
    %342 = vector.broadcast %341 : vector<4x1xf32> to vector<4x128xf32>
    %343 = arith.mulf %338, %342 : vector<4x128xf32>
    %344 = vector.broadcast %323 : vector<1x128xf32> to vector<4x128xf32>
    %345 = arith.mulf %343, %344 : vector<4x128xf32>
    %346 = vector.broadcast %325 : vector<1x128xf32> to vector<4x128xf32>
    %347 = arith.addf %345, %346 : vector<4x128xf32>
    %348 = arith.truncf %347 : vector<4x128xf32> to vector<4x128xbf16>
    %c2_116 = arith.constant 2 : index
    %c0_117 = arith.constant 0 : index
    %c0_118 = arith.constant 0 : index
    %349 = vector.load %arg3[%c2_116, %c0_117, %c0_118] : memref<4x128x128xbf16, #tpu.memory_space<vmem>>, vector<1x128x128xbf16>
    %350 = vector.shape_cast %349 : vector<1x128x128xbf16> to vector<128x128xbf16>
    %cst_119 = arith.constant dense<0.000000e+00> : vector<4x128xf32>
    %351 = tpu.matmul %348, %350, %cst_119 {dimension_numbers = #tpu.dot_dimension_numbers<[1], [0], [0], [1], [0, 0, 1, 1], [], []>} : vector<4x128xbf16>, vector<128x128xbf16>, vector<4x128xf32> -> vector<4x128xf32>
    %c2_120 = arith.constant 2 : index
    %c0_121 = arith.constant 0 : index
    %c0_122 = arith.constant 0 : index
    %352 = vector.load %arg4[%c2_120, %c0_121, %c0_122] : memref<4x1x128xf32, #tpu.memory_space<vmem>>, vector<1x1x128xf32>
    %353 = vector.shape_cast %352 : vector<1x1x128xf32> to vector<1x128xf32>
    %354 = vector.broadcast %353 : vector<1x128xf32> to vector<4x128xf32>
    %355 = arith.addf %351, %354 : vector<4x128xf32>
    %cst_123 = arith.constant 5.000000e-01 : f32
    %356 = vector.broadcast %cst_123 : f32 to vector<4x128xf32>
    %357 = arith.mulf %356, %355 : vector<4x128xf32>
    %cst_124 = arith.constant 4.471500e-02 : f32
    %358 = vector.broadcast %cst_124 : f32 to vector<4x128xf32>
    %359 = arith.mulf %358, %355 : vector<4x128xf32>
    %360 = arith.mulf %359, %355 : vector<4x128xf32>
    %361 = arith.mulf %360, %355 : vector<4x128xf32>
    %362 = arith.addf %355, %361 : vector<4x128xf32>
    %cst_125 = arith.constant 0.797884583 : f32
    %363 = vector.broadcast %cst_125 : f32 to vector<4x128xf32>
    %364 = arith.mulf %363, %362 : vector<4x128xf32>
    %365 = math.tanh %364 : vector<4x128xf32>
    %cst_126 = arith.constant 1.000000e+00 : f32
    %366 = vector.broadcast %cst_126 : f32 to vector<4x128xf32>
    %367 = arith.addf %366, %365 : vector<4x128xf32>
    %368 = arith.mulf %357, %367 : vector<4x128xf32>
    %369 = arith.truncf %368 : vector<4x128xf32> to vector<4x128xbf16>
    %c2_127 = arith.constant 2 : index
    %c0_128 = arith.constant 0 : index
    %c0_129 = arith.constant 0 : index
    %370 = vector.load %arg5[%c2_127, %c0_128, %c0_129] : memref<4x128x128xbf16, #tpu.memory_space<vmem>>, vector<1x128x128xbf16>
    %371 = vector.shape_cast %370 : vector<1x128x128xbf16> to vector<128x128xbf16>
    %cst_130 = arith.constant dense<0.000000e+00> : vector<4x128xf32>
    %372 = tpu.matmul %369, %371, %cst_130 {dimension_numbers = #tpu.dot_dimension_numbers<[1], [0], [0], [1], [0, 0, 1, 1], [], []>} : vector<4x128xbf16>, vector<128x128xbf16>, vector<4x128xf32> -> vector<4x128xf32>
    %c2_131 = arith.constant 2 : index
    %c0_132 = arith.constant 0 : index
    %c0_133 = arith.constant 0 : index
    %373 = vector.load %arg6[%c2_131, %c0_132, %c0_133] : memref<4x1x128xf32, #tpu.memory_space<vmem>>, vector<1x1x128xf32>
    %374 = vector.shape_cast %373 : vector<1x1x128xf32> to vector<1x128xf32>
    %375 = vector.broadcast %374 : vector<1x128xf32> to vector<4x128xf32>
    %376 = arith.addf %372, %375 : vector<4x128xf32>
    %377 = arith.addf %376, %219 : vector<4x128xf32>
    %378 = vector.extract_strided_slice %377 {offsets = [0, 0], sizes = [2, 128], strides = [1, 1]} : vector<4x128xf32> to vector<2x128xf32>
    %379 = vector.extract_strided_slice %377 {offsets = [2, 0], sizes = [2, 128], strides = [1, 1]} : vector<4x128xf32> to vector<2x128xf32>
    %380 = arith.mulf %378, %378 : vector<2x128xf32>
    %381 = arith.addf %378, %379 : vector<2x128xf32>
    %382 = arith.mulf %379, %379 : vector<2x128xf32>
    %383 = arith.addf %380, %382 : vector<2x128xf32>
    %cst_134 = arith.constant 5.000000e-01 : f32
    %384 = vector.broadcast %cst_134 : f32 to vector<2x128xf32>
    %385 = arith.mulf %381, %384 : vector<2x128xf32>
    %cst_135 = arith.constant 5.000000e-01 : f32
    %386 = vector.broadcast %cst_135 : f32 to vector<2x128xf32>
    %387 = arith.mulf %383, %386 : vector<2x128xf32>
    %388 = arith.mulf %385, %385 : vector<2x128xf32>
    %389 = arith.subf %387, %388 : vector<2x128xf32>
    %cst_136 = arith.constant 9.99999974E-6 : f32
    %390 = vector.broadcast %cst_136 : f32 to vector<2x128xf32>
    %391 = arith.addf %389, %390 : vector<2x128xf32>
    %392 = math.rsqrt %391 : vector<2x128xf32>
    %393 = arith.subf %378, %385 : vector<2x128xf32>
    %394 = arith.mulf %393, %392 : vector<2x128xf32>
    %c4_137 = arith.constant 4 : index
    %395 = memref.load %arg7[%c4_137] : memref<8xf32, #tpu.memory_space<smem>>
    %396 = vector.broadcast %395 : f32 to vector<2x128xf32>
    %397 = arith.mulf %394, %396 : vector<2x128xf32>
    %c4_138 = arith.constant 4 : index
    %398 = memref.load %arg8[%c4_138] : memref<8xf32, #tpu.memory_space<smem>>
    %399 = vector.broadcast %398 : f32 to vector<2x128xf32>
    %400 = arith.addf %397, %399 : vector<2x128xf32>
    %401 = arith.subf %379, %385 : vector<2x128xf32>
    %402 = arith.mulf %401, %392 : vector<2x128xf32>
    %c5_139 = arith.constant 5 : index
    %403 = memref.load %arg7[%c5_139] : memref<8xf32, #tpu.memory_space<smem>>
    %404 = vector.broadcast %403 : f32 to vector<2x128xf32>
    %405 = arith.mulf %402, %404 : vector<2x128xf32>
    %c5_140 = arith.constant 5 : index
    %406 = memref.load %arg8[%c5_140] : memref<8xf32, #tpu.memory_space<smem>>
    %407 = vector.broadcast %406 : f32 to vector<2x128xf32>
    %408 = arith.addf %405, %407 : vector<2x128xf32>
    %c8 = arith.constant 8 : index
    %409 = memref.load %arg9[%c8] : memref<16xf32, #tpu.memory_space<smem>>
    %410 = vector.broadcast %409 : f32 to vector<2x128xf32>
    %411 = arith.mulf %400, %410 : vector<2x128xf32>
    %c9 = arith.constant 9 : index
    %412 = memref.load %arg9[%c9] : memref<16xf32, #tpu.memory_space<smem>>
    %413 = vector.broadcast %412 : f32 to vector<2x128xf32>
    %414 = arith.mulf %408, %413 : vector<2x128xf32>
    %415 = arith.addf %411, %414 : vector<2x128xf32>
    %c4_141 = arith.constant 4 : index
    %416 = memref.load %arg10[%c4_141] : memref<8xf32, #tpu.memory_space<smem>>
    %417 = vector.broadcast %416 : f32 to vector<2x128xf32>
    %418 = arith.addf %415, %417 : vector<2x128xf32>
    %cst_142 = arith.constant 5.000000e-01 : f32
    %419 = vector.broadcast %cst_142 : f32 to vector<2x128xf32>
    %420 = arith.mulf %419, %418 : vector<2x128xf32>
    %cst_143 = arith.constant 4.471500e-02 : f32
    %421 = vector.broadcast %cst_143 : f32 to vector<2x128xf32>
    %422 = arith.mulf %421, %418 : vector<2x128xf32>
    %423 = arith.mulf %422, %418 : vector<2x128xf32>
    %424 = arith.mulf %423, %418 : vector<2x128xf32>
    %425 = arith.addf %418, %424 : vector<2x128xf32>
    %cst_144 = arith.constant 0.797884583 : f32
    %426 = vector.broadcast %cst_144 : f32 to vector<2x128xf32>
    %427 = arith.mulf %426, %425 : vector<2x128xf32>
    %428 = math.tanh %427 : vector<2x128xf32>
    %cst_145 = arith.constant 1.000000e+00 : f32
    %429 = vector.broadcast %cst_145 : f32 to vector<2x128xf32>
    %430 = arith.addf %429, %428 : vector<2x128xf32>
    %431 = arith.mulf %420, %430 : vector<2x128xf32>
    %c10 = arith.constant 10 : index
    %432 = memref.load %arg9[%c10] : memref<16xf32, #tpu.memory_space<smem>>
    %433 = vector.broadcast %432 : f32 to vector<2x128xf32>
    %434 = arith.mulf %400, %433 : vector<2x128xf32>
    %c11 = arith.constant 11 : index
    %435 = memref.load %arg9[%c11] : memref<16xf32, #tpu.memory_space<smem>>
    %436 = vector.broadcast %435 : f32 to vector<2x128xf32>
    %437 = arith.mulf %408, %436 : vector<2x128xf32>
    %438 = arith.addf %434, %437 : vector<2x128xf32>
    %c5_146 = arith.constant 5 : index
    %439 = memref.load %arg10[%c5_146] : memref<8xf32, #tpu.memory_space<smem>>
    %440 = vector.broadcast %439 : f32 to vector<2x128xf32>
    %441 = arith.addf %438, %440 : vector<2x128xf32>
    %cst_147 = arith.constant 5.000000e-01 : f32
    %442 = vector.broadcast %cst_147 : f32 to vector<2x128xf32>
    %443 = arith.mulf %442, %441 : vector<2x128xf32>
    %cst_148 = arith.constant 4.471500e-02 : f32
    %444 = vector.broadcast %cst_148 : f32 to vector<2x128xf32>
    %445 = arith.mulf %444, %441 : vector<2x128xf32>
    %446 = arith.mulf %445, %441 : vector<2x128xf32>
    %447 = arith.mulf %446, %441 : vector<2x128xf32>
    %448 = arith.addf %441, %447 : vector<2x128xf32>
    %cst_149 = arith.constant 0.797884583 : f32
    %449 = vector.broadcast %cst_149 : f32 to vector<2x128xf32>
    %450 = arith.mulf %449, %448 : vector<2x128xf32>
    %451 = math.tanh %450 : vector<2x128xf32>
    %cst_150 = arith.constant 1.000000e+00 : f32
    %452 = vector.broadcast %cst_150 : f32 to vector<2x128xf32>
    %453 = arith.addf %452, %451 : vector<2x128xf32>
    %454 = arith.mulf %443, %453 : vector<2x128xf32>
    %c8_151 = arith.constant 8 : index
    %455 = memref.load %arg11[%c8_151] : memref<16xf32, #tpu.memory_space<smem>>
    %456 = vector.broadcast %455 : f32 to vector<2x128xf32>
    %457 = arith.mulf %431, %456 : vector<2x128xf32>
    %c9_152 = arith.constant 9 : index
    %458 = memref.load %arg11[%c9_152] : memref<16xf32, #tpu.memory_space<smem>>
    %459 = vector.broadcast %458 : f32 to vector<2x128xf32>
    %460 = arith.mulf %454, %459 : vector<2x128xf32>
    %461 = arith.addf %457, %460 : vector<2x128xf32>
    %c4_153 = arith.constant 4 : index
    %462 = memref.load %arg12[%c4_153] : memref<8xf32, #tpu.memory_space<smem>>
    %463 = vector.broadcast %462 : f32 to vector<2x128xf32>
    %464 = arith.addf %461, %463 : vector<2x128xf32>
    %465 = vector.extract_strided_slice %321 {offsets = [0, 0], sizes = [2, 128], strides = [1, 1]} : vector<4x128xf32> to vector<2x128xf32>
    %466 = arith.addf %464, %465 : vector<2x128xf32>
    %c10_154 = arith.constant 10 : index
    %467 = memref.load %arg11[%c10_154] : memref<16xf32, #tpu.memory_space<smem>>
    %468 = vector.broadcast %467 : f32 to vector<2x128xf32>
    %469 = arith.mulf %431, %468 : vector<2x128xf32>
    %c11_155 = arith.constant 11 : index
    %470 = memref.load %arg11[%c11_155] : memref<16xf32, #tpu.memory_space<smem>>
    %471 = vector.broadcast %470 : f32 to vector<2x128xf32>
    %472 = arith.mulf %454, %471 : vector<2x128xf32>
    %473 = arith.addf %469, %472 : vector<2x128xf32>
    %c5_156 = arith.constant 5 : index
    %474 = memref.load %arg12[%c5_156] : memref<8xf32, #tpu.memory_space<smem>>
    %475 = vector.broadcast %474 : f32 to vector<2x128xf32>
    %476 = arith.addf %473, %475 : vector<2x128xf32>
    %477 = vector.extract_strided_slice %321 {offsets = [2, 0], sizes = [2, 128], strides = [1, 1]} : vector<4x128xf32> to vector<2x128xf32>
    %478 = arith.addf %476, %477 : vector<2x128xf32>
    %479 = tpu.concatenate %466, %478 in 0 : vector<2x128xf32>, vector<2x128xf32> -> vector<4x128xf32>
    %c3_157 = arith.constant 3 : index
    %c0_158 = arith.constant 0 : index
    %c0_159 = arith.constant 0 : index
    %480 = vector.load %arg1[%c3_157, %c0_158, %c0_159] : memref<4x1x128xf32, #tpu.memory_space<vmem>>, vector<1x1x128xf32>
    %481 = vector.shape_cast %480 : vector<1x1x128xf32> to vector<1x128xf32>
    %c3_160 = arith.constant 3 : index
    %c0_161 = arith.constant 0 : index
    %c0_162 = arith.constant 0 : index
    %482 = vector.load %arg2[%c3_160, %c0_161, %c0_162] : memref<4x1x128xf32, #tpu.memory_space<vmem>>, vector<1x1x128xf32>
    %483 = vector.shape_cast %482 : vector<1x1x128xf32> to vector<1x128xf32>
    %cst_163 = arith.constant dense<0.000000e+00> : vector<4xf32>
    %484 = vector.multi_reduction <add>, %479, %cst_163 [1] : vector<4x128xf32> to vector<4xf32>
    %485 = vector.shape_cast %484 : vector<4xf32> to vector<4x1xf32>
    %486 = arith.mulf %479, %479 : vector<4x128xf32>
    %cst_164 = arith.constant dense<0.000000e+00> : vector<4xf32>
    %487 = vector.multi_reduction <add>, %486, %cst_164 [1] : vector<4x128xf32> to vector<4xf32>
    %488 = vector.shape_cast %487 : vector<4xf32> to vector<4x1xf32>
    %cst_165 = arith.constant 7.812500e-03 : f32
    %489 = vector.broadcast %cst_165 : f32 to vector<4x1xf32>
    %490 = arith.mulf %485, %489 : vector<4x1xf32>
    %cst_166 = arith.constant 7.812500e-03 : f32
    %491 = vector.broadcast %cst_166 : f32 to vector<4x1xf32>
    %492 = arith.mulf %488, %491 : vector<4x1xf32>
    %493 = arith.mulf %490, %490 : vector<4x1xf32>
    %494 = arith.subf %492, %493 : vector<4x1xf32>
    %495 = vector.broadcast %490 : vector<4x1xf32> to vector<4x128xf32>
    %496 = arith.subf %479, %495 : vector<4x128xf32>
    %cst_167 = arith.constant 9.99999974E-6 : f32
    %497 = vector.broadcast %cst_167 : f32 to vector<4x1xf32>
    %498 = arith.addf %494, %497 : vector<4x1xf32>
    %499 = math.rsqrt %498 : vector<4x1xf32>
    %500 = vector.broadcast %499 : vector<4x1xf32> to vector<4x128xf32>
    %501 = arith.mulf %496, %500 : vector<4x128xf32>
    %502 = vector.broadcast %481 : vector<1x128xf32> to vector<4x128xf32>
    %503 = arith.mulf %501, %502 : vector<4x128xf32>
    %504 = vector.broadcast %483 : vector<1x128xf32> to vector<4x128xf32>
    %505 = arith.addf %503, %504 : vector<4x128xf32>
    %506 = arith.truncf %505 : vector<4x128xf32> to vector<4x128xbf16>
    %c3_168 = arith.constant 3 : index
    %c0_169 = arith.constant 0 : index
    %c0_170 = arith.constant 0 : index
    %507 = vector.load %arg3[%c3_168, %c0_169, %c0_170] : memref<4x128x128xbf16, #tpu.memory_space<vmem>>, vector<1x128x128xbf16>
    %508 = vector.shape_cast %507 : vector<1x128x128xbf16> to vector<128x128xbf16>
    %cst_171 = arith.constant dense<0.000000e+00> : vector<4x128xf32>
    %509 = tpu.matmul %506, %508, %cst_171 {dimension_numbers = #tpu.dot_dimension_numbers<[1], [0], [0], [1], [0, 0, 1, 1], [], []>} : vector<4x128xbf16>, vector<128x128xbf16>, vector<4x128xf32> -> vector<4x128xf32>
    %c3_172 = arith.constant 3 : index
    %c0_173 = arith.constant 0 : index
    %c0_174 = arith.constant 0 : index
    %510 = vector.load %arg4[%c3_172, %c0_173, %c0_174] : memref<4x1x128xf32, #tpu.memory_space<vmem>>, vector<1x1x128xf32>
    %511 = vector.shape_cast %510 : vector<1x1x128xf32> to vector<1x128xf32>
    %512 = vector.broadcast %511 : vector<1x128xf32> to vector<4x128xf32>
    %513 = arith.addf %509, %512 : vector<4x128xf32>
    %cst_175 = arith.constant 5.000000e-01 : f32
    %514 = vector.broadcast %cst_175 : f32 to vector<4x128xf32>
    %515 = arith.mulf %514, %513 : vector<4x128xf32>
    %cst_176 = arith.constant 4.471500e-02 : f32
    %516 = vector.broadcast %cst_176 : f32 to vector<4x128xf32>
    %517 = arith.mulf %516, %513 : vector<4x128xf32>
    %518 = arith.mulf %517, %513 : vector<4x128xf32>
    %519 = arith.mulf %518, %513 : vector<4x128xf32>
    %520 = arith.addf %513, %519 : vector<4x128xf32>
    %cst_177 = arith.constant 0.797884583 : f32
    %521 = vector.broadcast %cst_177 : f32 to vector<4x128xf32>
    %522 = arith.mulf %521, %520 : vector<4x128xf32>
    %523 = math.tanh %522 : vector<4x128xf32>
    %cst_178 = arith.constant 1.000000e+00 : f32
    %524 = vector.broadcast %cst_178 : f32 to vector<4x128xf32>
    %525 = arith.addf %524, %523 : vector<4x128xf32>
    %526 = arith.mulf %515, %525 : vector<4x128xf32>
    %527 = arith.truncf %526 : vector<4x128xf32> to vector<4x128xbf16>
    %c3_179 = arith.constant 3 : index
    %c0_180 = arith.constant 0 : index
    %c0_181 = arith.constant 0 : index
    %528 = vector.load %arg5[%c3_179, %c0_180, %c0_181] : memref<4x128x128xbf16, #tpu.memory_space<vmem>>, vector<1x128x128xbf16>
    %529 = vector.shape_cast %528 : vector<1x128x128xbf16> to vector<128x128xbf16>
    %cst_182 = arith.constant dense<0.000000e+00> : vector<4x128xf32>
    %530 = tpu.matmul %527, %529, %cst_182 {dimension_numbers = #tpu.dot_dimension_numbers<[1], [0], [0], [1], [0, 0, 1, 1], [], []>} : vector<4x128xbf16>, vector<128x128xbf16>, vector<4x128xf32> -> vector<4x128xf32>
    %c3_183 = arith.constant 3 : index
    %c0_184 = arith.constant 0 : index
    %c0_185 = arith.constant 0 : index
    %531 = vector.load %arg6[%c3_183, %c0_184, %c0_185] : memref<4x1x128xf32, #tpu.memory_space<vmem>>, vector<1x1x128xf32>
    %532 = vector.shape_cast %531 : vector<1x1x128xf32> to vector<1x128xf32>
    %533 = vector.broadcast %532 : vector<1x128xf32> to vector<4x128xf32>
    %534 = arith.addf %530, %533 : vector<4x128xf32>
    %535 = arith.addf %534, %377 : vector<4x128xf32>
    %536 = vector.extract_strided_slice %535 {offsets = [0, 0], sizes = [2, 128], strides = [1, 1]} : vector<4x128xf32> to vector<2x128xf32>
    %537 = vector.extract_strided_slice %535 {offsets = [2, 0], sizes = [2, 128], strides = [1, 1]} : vector<4x128xf32> to vector<2x128xf32>
    %538 = arith.mulf %536, %536 : vector<2x128xf32>
    %539 = arith.addf %536, %537 : vector<2x128xf32>
    %540 = arith.mulf %537, %537 : vector<2x128xf32>
    %541 = arith.addf %538, %540 : vector<2x128xf32>
    %cst_186 = arith.constant 5.000000e-01 : f32
    %542 = vector.broadcast %cst_186 : f32 to vector<2x128xf32>
    %543 = arith.mulf %539, %542 : vector<2x128xf32>
    %cst_187 = arith.constant 5.000000e-01 : f32
    %544 = vector.broadcast %cst_187 : f32 to vector<2x128xf32>
    %545 = arith.mulf %541, %544 : vector<2x128xf32>
    %546 = arith.mulf %543, %543 : vector<2x128xf32>
    %547 = arith.subf %545, %546 : vector<2x128xf32>
    %cst_188 = arith.constant 9.99999974E-6 : f32
    %548 = vector.broadcast %cst_188 : f32 to vector<2x128xf32>
    %549 = arith.addf %547, %548 : vector<2x128xf32>
    %550 = math.rsqrt %549 : vector<2x128xf32>
    %551 = arith.subf %536, %543 : vector<2x128xf32>
    %552 = arith.mulf %551, %550 : vector<2x128xf32>
    %c6_189 = arith.constant 6 : index
    %553 = memref.load %arg7[%c6_189] : memref<8xf32, #tpu.memory_space<smem>>
    %554 = vector.broadcast %553 : f32 to vector<2x128xf32>
    %555 = arith.mulf %552, %554 : vector<2x128xf32>
    %c6_190 = arith.constant 6 : index
    %556 = memref.load %arg8[%c6_190] : memref<8xf32, #tpu.memory_space<smem>>
    %557 = vector.broadcast %556 : f32 to vector<2x128xf32>
    %558 = arith.addf %555, %557 : vector<2x128xf32>
    %559 = arith.subf %537, %543 : vector<2x128xf32>
    %560 = arith.mulf %559, %550 : vector<2x128xf32>
    %c7_191 = arith.constant 7 : index
    %561 = memref.load %arg7[%c7_191] : memref<8xf32, #tpu.memory_space<smem>>
    %562 = vector.broadcast %561 : f32 to vector<2x128xf32>
    %563 = arith.mulf %560, %562 : vector<2x128xf32>
    %c7_192 = arith.constant 7 : index
    %564 = memref.load %arg8[%c7_192] : memref<8xf32, #tpu.memory_space<smem>>
    %565 = vector.broadcast %564 : f32 to vector<2x128xf32>
    %566 = arith.addf %563, %565 : vector<2x128xf32>
    %c12 = arith.constant 12 : index
    %567 = memref.load %arg9[%c12] : memref<16xf32, #tpu.memory_space<smem>>
    %568 = vector.broadcast %567 : f32 to vector<2x128xf32>
    %569 = arith.mulf %558, %568 : vector<2x128xf32>
    %c13 = arith.constant 13 : index
    %570 = memref.load %arg9[%c13] : memref<16xf32, #tpu.memory_space<smem>>
    %571 = vector.broadcast %570 : f32 to vector<2x128xf32>
    %572 = arith.mulf %566, %571 : vector<2x128xf32>
    %573 = arith.addf %569, %572 : vector<2x128xf32>
    %c6_193 = arith.constant 6 : index
    %574 = memref.load %arg10[%c6_193] : memref<8xf32, #tpu.memory_space<smem>>
    %575 = vector.broadcast %574 : f32 to vector<2x128xf32>
    %576 = arith.addf %573, %575 : vector<2x128xf32>
    %cst_194 = arith.constant 5.000000e-01 : f32
    %577 = vector.broadcast %cst_194 : f32 to vector<2x128xf32>
    %578 = arith.mulf %577, %576 : vector<2x128xf32>
    %cst_195 = arith.constant 4.471500e-02 : f32
    %579 = vector.broadcast %cst_195 : f32 to vector<2x128xf32>
    %580 = arith.mulf %579, %576 : vector<2x128xf32>
    %581 = arith.mulf %580, %576 : vector<2x128xf32>
    %582 = arith.mulf %581, %576 : vector<2x128xf32>
    %583 = arith.addf %576, %582 : vector<2x128xf32>
    %cst_196 = arith.constant 0.797884583 : f32
    %584 = vector.broadcast %cst_196 : f32 to vector<2x128xf32>
    %585 = arith.mulf %584, %583 : vector<2x128xf32>
    %586 = math.tanh %585 : vector<2x128xf32>
    %cst_197 = arith.constant 1.000000e+00 : f32
    %587 = vector.broadcast %cst_197 : f32 to vector<2x128xf32>
    %588 = arith.addf %587, %586 : vector<2x128xf32>
    %589 = arith.mulf %578, %588 : vector<2x128xf32>
    %c14 = arith.constant 14 : index
    %590 = memref.load %arg9[%c14] : memref<16xf32, #tpu.memory_space<smem>>
    %591 = vector.broadcast %590 : f32 to vector<2x128xf32>
    %592 = arith.mulf %558, %591 : vector<2x128xf32>
    %c15 = arith.constant 15 : index
    %593 = memref.load %arg9[%c15] : memref<16xf32, #tpu.memory_space<smem>>
    %594 = vector.broadcast %593 : f32 to vector<2x128xf32>
    %595 = arith.mulf %566, %594 : vector<2x128xf32>
    %596 = arith.addf %592, %595 : vector<2x128xf32>
    %c7_198 = arith.constant 7 : index
    %597 = memref.load %arg10[%c7_198] : memref<8xf32, #tpu.memory_space<smem>>
    %598 = vector.broadcast %597 : f32 to vector<2x128xf32>
    %599 = arith.addf %596, %598 : vector<2x128xf32>
    %cst_199 = arith.constant 5.000000e-01 : f32
    %600 = vector.broadcast %cst_199 : f32 to vector<2x128xf32>
    %601 = arith.mulf %600, %599 : vector<2x128xf32>
    %cst_200 = arith.constant 4.471500e-02 : f32
    %602 = vector.broadcast %cst_200 : f32 to vector<2x128xf32>
    %603 = arith.mulf %602, %599 : vector<2x128xf32>
    %604 = arith.mulf %603, %599 : vector<2x128xf32>
    %605 = arith.mulf %604, %599 : vector<2x128xf32>
    %606 = arith.addf %599, %605 : vector<2x128xf32>
    %cst_201 = arith.constant 0.797884583 : f32
    %607 = vector.broadcast %cst_201 : f32 to vector<2x128xf32>
    %608 = arith.mulf %607, %606 : vector<2x128xf32>
    %609 = math.tanh %608 : vector<2x128xf32>
    %cst_202 = arith.constant 1.000000e+00 : f32
    %610 = vector.broadcast %cst_202 : f32 to vector<2x128xf32>
    %611 = arith.addf %610, %609 : vector<2x128xf32>
    %612 = arith.mulf %601, %611 : vector<2x128xf32>
    %c12_203 = arith.constant 12 : index
    %613 = memref.load %arg11[%c12_203] : memref<16xf32, #tpu.memory_space<smem>>
    %614 = vector.broadcast %613 : f32 to vector<2x128xf32>
    %615 = arith.mulf %589, %614 : vector<2x128xf32>
    %c13_204 = arith.constant 13 : index
    %616 = memref.load %arg11[%c13_204] : memref<16xf32, #tpu.memory_space<smem>>
    %617 = vector.broadcast %616 : f32 to vector<2x128xf32>
    %618 = arith.mulf %612, %617 : vector<2x128xf32>
    %619 = arith.addf %615, %618 : vector<2x128xf32>
    %c6_205 = arith.constant 6 : index
    %620 = memref.load %arg12[%c6_205] : memref<8xf32, #tpu.memory_space<smem>>
    %621 = vector.broadcast %620 : f32 to vector<2x128xf32>
    %622 = arith.addf %619, %621 : vector<2x128xf32>
    %623 = vector.extract_strided_slice %479 {offsets = [0, 0], sizes = [2, 128], strides = [1, 1]} : vector<4x128xf32> to vector<2x128xf32>
    %624 = arith.addf %622, %623 : vector<2x128xf32>
    %c14_206 = arith.constant 14 : index
    %625 = memref.load %arg11[%c14_206] : memref<16xf32, #tpu.memory_space<smem>>
    %626 = vector.broadcast %625 : f32 to vector<2x128xf32>
    %627 = arith.mulf %589, %626 : vector<2x128xf32>
    %c15_207 = arith.constant 15 : index
    %628 = memref.load %arg11[%c15_207] : memref<16xf32, #tpu.memory_space<smem>>
    %629 = vector.broadcast %628 : f32 to vector<2x128xf32>
    %630 = arith.mulf %612, %629 : vector<2x128xf32>
    %631 = arith.addf %627, %630 : vector<2x128xf32>
    %c7_208 = arith.constant 7 : index
    %632 = memref.load %arg12[%c7_208] : memref<8xf32, #tpu.memory_space<smem>>
    %633 = vector.broadcast %632 : f32 to vector<2x128xf32>
    %634 = arith.addf %631, %633 : vector<2x128xf32>
    %635 = vector.extract_strided_slice %479 {offsets = [2, 0], sizes = [2, 128], strides = [1, 1]} : vector<4x128xf32> to vector<2x128xf32>
    %636 = arith.addf %634, %635 : vector<2x128xf32>
    %637 = tpu.concatenate %624, %636 in 0 : vector<2x128xf32>, vector<2x128xf32> -> vector<4x128xf32>
    %638 = vector.extract_strided_slice %637 {offsets = [0, 0], sizes = [2, 128], strides = [1, 1]} : vector<4x128xf32> to vector<2x128xf32>
    %639 = vector.extract_strided_slice %637 {offsets = [2, 0], sizes = [2, 128], strides = [1, 1]} : vector<4x128xf32> to vector<2x128xf32>
    %640 = tpu.concatenate %638, %639 in 1 : vector<2x128xf32>, vector<2x128xf32> -> vector<2x256xf32>
    %641 = arith.truncf %640 : vector<2x256xf32> to vector<2x256xbf16>
    %c0_209 = arith.constant 0 : index
    %c0_210 = arith.constant 0 : index
    %642 = vector.load %arg13[%c0_209, %c0_210] : memref<256x128xbf16, #tpu.memory_space<vmem>>, vector<256x128xbf16>
    %cst_211 = arith.constant dense<0.000000e+00> : vector<2x128xf32>
    %643 = tpu.matmul %641, %642, %cst_211 {dimension_numbers = #tpu.dot_dimension_numbers<[1], [0], [0], [1], [0, 0, 1, 1], [], []>} : vector<2x256xbf16>, vector<256x128xbf16>, vector<2x128xf32> -> vector<2x128xf32>
    %c0_212 = arith.constant 0 : index
    %c0_213 = arith.constant 0 : index
    %644 = vector.load %arg14[%c0_212, %c0_213] : memref<1x128xf32, #tpu.memory_space<vmem>>, vector<1x128xf32>
    %645 = vector.broadcast %644 : vector<1x128xf32> to vector<2x128xf32>
    %646 = arith.addf %643, %645 : vector<2x128xf32>
    %c0_214 = arith.constant 0 : index
    %c0_215 = arith.constant 0 : index
    %647 = vector.load %arg19[%c0_214, %c0_215] : memref<2x128xf32, #tpu.memory_space<vmem>>, vector<2x128xf32>
    tpu.vector_store %arg19[%c0_214, %c0_215], %646 {strides = array<i32>} : memref<2x128xf32, #tpu.memory_space<vmem>>, vector<2x128xf32>,
    %c0_216 = arith.constant 0 : index
    %c0_217 = arith.constant 0 : index
    %c0_218 = arith.constant 0 : index
    %648 = vector.load %arg15[%c0_216, %c0_217, %c0_218] : memref<3x1x128xf32, #tpu.memory_space<vmem>>, vector<1x1x128xf32>
    %649 = vector.shape_cast %648 : vector<1x1x128xf32> to vector<1x128xf32>
    %c0_219 = arith.constant 0 : index
    %c0_220 = arith.constant 0 : index
    %c0_221 = arith.constant 0 : index
    %650 = vector.load %arg16[%c0_219, %c0_220, %c0_221] : memref<3x1x128xf32, #tpu.memory_space<vmem>>, vector<1x1x128xf32>
    %651 = vector.shape_cast %650 : vector<1x1x128xf32> to vector<1x128xf32>
    %cst_222 = arith.constant dense<0.000000e+00> : vector<2xf32>
    %652 = vector.multi_reduction <add>, %646, %cst_222 [1] : vector<2x128xf32> to vector<2xf32>
    %653 = vector.shape_cast %652 : vector<2xf32> to vector<2x1xf32>
    %654 = arith.mulf %646, %646 : vector<2x128xf32>
    %cst_223 = arith.constant dense<0.000000e+00> : vector<2xf32>
    %655 = vector.multi_reduction <add>, %654, %cst_223 [1] : vector<2x128xf32> to vector<2xf32>
    %656 = vector.shape_cast %655 : vector<2xf32> to vector<2x1xf32>
    %cst_224 = arith.constant 7.812500e-03 : f32
    %657 = vector.broadcast %cst_224 : f32 to vector<2x1xf32>
    %658 = arith.mulf %653, %657 : vector<2x1xf32>
    %cst_225 = arith.constant 7.812500e-03 : f32
    %659 = vector.broadcast %cst_225 : f32 to vector<2x1xf32>
    %660 = arith.mulf %656, %659 : vector<2x1xf32>
    %661 = arith.mulf %658, %658 : vector<2x1xf32>
    %662 = arith.subf %660, %661 : vector<2x1xf32>
    %663 = vector.broadcast %658 : vector<2x1xf32> to vector<2x128xf32>
    %664 = arith.subf %646, %663 : vector<2x128xf32>
    %cst_226 = arith.constant 9.99999974E-6 : f32
    %665 = vector.broadcast %cst_226 : f32 to vector<2x1xf32>
    %666 = arith.addf %662, %665 : vector<2x1xf32>
    %667 = math.rsqrt %666 : vector<2x1xf32>
    %668 = vector.broadcast %667 : vector<2x1xf32> to vector<2x128xf32>
    %669 = arith.mulf %664, %668 : vector<2x128xf32>
    %670 = vector.broadcast %649 : vector<1x128xf32> to vector<2x128xf32>
    %671 = arith.mulf %669, %670 : vector<2x128xf32>
    %672 = vector.broadcast %651 : vector<1x128xf32> to vector<2x128xf32>
    %673 = arith.addf %671, %672 : vector<2x128xf32>
    %cst_227 = arith.constant 5.000000e-01 : f32
    %674 = vector.broadcast %cst_227 : f32 to vector<2x128xf32>
    %675 = arith.mulf %674, %673 : vector<2x128xf32>
    %cst_228 = arith.constant 4.471500e-02 : f32
    %676 = vector.broadcast %cst_228 : f32 to vector<2x128xf32>
    %677 = arith.mulf %676, %673 : vector<2x128xf32>
    %678 = arith.mulf %677, %673 : vector<2x128xf32>
    %679 = arith.mulf %678, %673 : vector<2x128xf32>
    %680 = arith.addf %673, %679 : vector<2x128xf32>
    %cst_229 = arith.constant 0.797884583 : f32
    %681 = vector.broadcast %cst_229 : f32 to vector<2x128xf32>
    %682 = arith.mulf %681, %680 : vector<2x128xf32>
    %683 = math.tanh %682 : vector<2x128xf32>
    %cst_230 = arith.constant 1.000000e+00 : f32
    %684 = vector.broadcast %cst_230 : f32 to vector<2x128xf32>
    %685 = arith.addf %684, %683 : vector<2x128xf32>
    %686 = arith.mulf %675, %685 : vector<2x128xf32>
    %687 = arith.truncf %686 : vector<2x128xf32> to vector<2x128xbf16>
    %c0_231 = arith.constant 0 : index
    %c0_232 = arith.constant 0 : index
    %c0_233 = arith.constant 0 : index
    %688 = vector.load %arg17[%c0_231, %c0_232, %c0_233] : memref<3x128x128xbf16, #tpu.memory_space<vmem>>, vector<1x128x128xbf16>
    %689 = vector.shape_cast %688 : vector<1x128x128xbf16> to vector<128x128xbf16>
    %cst_234 = arith.constant dense<0.000000e+00> : vector<2x128xf32>
    %690 = tpu.matmul %687, %689, %cst_234 {dimension_numbers = #tpu.dot_dimension_numbers<[1], [0], [0], [1], [0, 0, 1, 1], [], []>} : vector<2x128xbf16>, vector<128x128xbf16>, vector<2x128xf32> -> vector<2x128xf32>
    %c0_235 = arith.constant 0 : index
    %c0_236 = arith.constant 0 : index
    %c0_237 = arith.constant 0 : index
    %691 = vector.load %arg18[%c0_235, %c0_236, %c0_237] : memref<3x1x128xf32, #tpu.memory_space<vmem>>, vector<1x1x128xf32>
    %692 = vector.shape_cast %691 : vector<1x1x128xf32> to vector<1x128xf32>
    %693 = vector.broadcast %692 : vector<1x128xf32> to vector<2x128xf32>
    %694 = arith.addf %690, %693 : vector<2x128xf32>
    %c1_238 = arith.constant 1 : index
    %c0_239 = arith.constant 0 : index
    %c0_240 = arith.constant 0 : index
    %695 = vector.load %arg15[%c1_238, %c0_239, %c0_240] : memref<3x1x128xf32, #tpu.memory_space<vmem>>, vector<1x1x128xf32>
    %696 = vector.shape_cast %695 : vector<1x1x128xf32> to vector<1x128xf32>
    %c1_241 = arith.constant 1 : index
    %c0_242 = arith.constant 0 : index
    %c0_243 = arith.constant 0 : index
    %697 = vector.load %arg16[%c1_241, %c0_242, %c0_243] : memref<3x1x128xf32, #tpu.memory_space<vmem>>, vector<1x1x128xf32>
    %698 = vector.shape_cast %697 : vector<1x1x128xf32> to vector<1x128xf32>
    %cst_244 = arith.constant dense<0.000000e+00> : vector<2xf32>
    %699 = vector.multi_reduction <add>, %694, %cst_244 [1] : vector<2x128xf32> to vector<2xf32>
    %700 = vector.shape_cast %699 : vector<2xf32> to vector<2x1xf32>
    %701 = arith.mulf %694, %694 : vector<2x128xf32>
    %cst_245 = arith.constant dense<0.000000e+00> : vector<2xf32>
    %702 = vector.multi_reduction <add>, %701, %cst_245 [1] : vector<2x128xf32> to vector<2xf32>
    %703 = vector.shape_cast %702 : vector<2xf32> to vector<2x1xf32>
    %cst_246 = arith.constant 7.812500e-03 : f32
    %704 = vector.broadcast %cst_246 : f32 to vector<2x1xf32>
    %705 = arith.mulf %700, %704 : vector<2x1xf32>
    %cst_247 = arith.constant 7.812500e-03 : f32
    %706 = vector.broadcast %cst_247 : f32 to vector<2x1xf32>
    %707 = arith.mulf %703, %706 : vector<2x1xf32>
    %708 = arith.mulf %705, %705 : vector<2x1xf32>
    %709 = arith.subf %707, %708 : vector<2x1xf32>
    %710 = vector.broadcast %705 : vector<2x1xf32> to vector<2x128xf32>
    %711 = arith.subf %694, %710 : vector<2x128xf32>
    %cst_248 = arith.constant 9.99999974E-6 : f32
    %712 = vector.broadcast %cst_248 : f32 to vector<2x1xf32>
    %713 = arith.addf %709, %712 : vector<2x1xf32>
    %714 = math.rsqrt %713 : vector<2x1xf32>
    %715 = vector.broadcast %714 : vector<2x1xf32> to vector<2x128xf32>
    %716 = arith.mulf %711, %715 : vector<2x128xf32>
    %717 = vector.broadcast %696 : vector<1x128xf32> to vector<2x128xf32>
    %718 = arith.mulf %716, %717 : vector<2x128xf32>
    %719 = vector.broadcast %698 : vector<1x128xf32> to vector<2x128xf32>
    %720 = arith.addf %718, %719 : vector<2x128xf32>
    %cst_249 = arith.constant 5.000000e-01 : f32
    %721 = vector.broadcast %cst_249 : f32 to vector<2x128xf32>
    %722 = arith.mulf %721, %720 : vector<2x128xf32>
    %cst_250 = arith.constant 4.471500e-02 : f32
    %723 = vector.broadcast %cst_250 : f32 to vector<2x128xf32>
    %724 = arith.mulf %723, %720 : vector<2x128xf32>
    %725 = arith.mulf %724, %720 : vector<2x128xf32>
    %726 = arith.mulf %725, %720 : vector<2x128xf32>
    %727 = arith.addf %720, %726 : vector<2x128xf32>
    %cst_251 = arith.constant 0.797884583 : f32
    %728 = vector.broadcast %cst_251 : f32 to vector<2x128xf32>
    %729 = arith.mulf %728, %727 : vector<2x128xf32>
    %730 = math.tanh %729 : vector<2x128xf32>
    %cst_252 = arith.constant 1.000000e+00 : f32
    %731 = vector.broadcast %cst_252 : f32 to vector<2x128xf32>
    %732 = arith.addf %731, %730 : vector<2x128xf32>
    %733 = arith.mulf %722, %732 : vector<2x128xf32>
    %734 = arith.truncf %733 : vector<2x128xf32> to vector<2x128xbf16>
    %c1_253 = arith.constant 1 : index
    %c0_254 = arith.constant 0 : index
    %c0_255 = arith.constant 0 : index
    %735 = vector.load %arg17[%c1_253, %c0_254, %c0_255] : memref<3x128x128xbf16, #tpu.memory_space<vmem>>, vector<1x128x128xbf16>
    %736 = vector.shape_cast %735 : vector<1x128x128xbf16> to vector<128x128xbf16>
    %cst_256 = arith.constant dense<0.000000e+00> : vector<2x128xf32>
    %737 = tpu.matmul %734, %736, %cst_256 {dimension_numbers = #tpu.dot_dimension_numbers<[1], [0], [0], [1], [0, 0, 1, 1], [], []>} : vector<2x128xbf16>, vector<128x128xbf16>, vector<2x128xf32> -> vector<2x128xf32>
    %c1_257 = arith.constant 1 : index
    %c0_258 = arith.constant 0 : index
    %c0_259 = arith.constant 0 : index
    %738 = vector.load %arg18[%c1_257, %c0_258, %c0_259] : memref<3x1x128xf32, #tpu.memory_space<vmem>>, vector<1x1x128xf32>
    %739 = vector.shape_cast %738 : vector<1x1x128xf32> to vector<1x128xf32>
    %740 = vector.broadcast %739 : vector<1x128xf32> to vector<2x128xf32>
    %741 = arith.addf %737, %740 : vector<2x128xf32>
    %c2_260 = arith.constant 2 : index
    %c0_261 = arith.constant 0 : index
    %c0_262 = arith.constant 0 : index
    %742 = vector.load %arg15[%c2_260, %c0_261, %c0_262] : memref<3x1x128xf32, #tpu.memory_space<vmem>>, vector<1x1x128xf32>
    %743 = vector.shape_cast %742 : vector<1x1x128xf32> to vector<1x128xf32>
    %c2_263 = arith.constant 2 : index
    %c0_264 = arith.constant 0 : index
    %c0_265 = arith.constant 0 : index
    %744 = vector.load %arg16[%c2_263, %c0_264, %c0_265] : memref<3x1x128xf32, #tpu.memory_space<vmem>>, vector<1x1x128xf32>
    %745 = vector.shape_cast %744 : vector<1x1x128xf32> to vector<1x128xf32>
    %cst_266 = arith.constant dense<0.000000e+00> : vector<2xf32>
    %746 = vector.multi_reduction <add>, %741, %cst_266 [1] : vector<2x128xf32> to vector<2xf32>
    %747 = vector.shape_cast %746 : vector<2xf32> to vector<2x1xf32>
    %748 = arith.mulf %741, %741 : vector<2x128xf32>
    %cst_267 = arith.constant dense<0.000000e+00> : vector<2xf32>
    %749 = vector.multi_reduction <add>, %748, %cst_267 [1] : vector<2x128xf32> to vector<2xf32>
    %750 = vector.shape_cast %749 : vector<2xf32> to vector<2x1xf32>
    %cst_268 = arith.constant 7.812500e-03 : f32
    %751 = vector.broadcast %cst_268 : f32 to vector<2x1xf32>
    %752 = arith.mulf %747, %751 : vector<2x1xf32>
    %cst_269 = arith.constant 7.812500e-03 : f32
    %753 = vector.broadcast %cst_269 : f32 to vector<2x1xf32>
    %754 = arith.mulf %750, %753 : vector<2x1xf32>
    %755 = arith.mulf %752, %752 : vector<2x1xf32>
    %756 = arith.subf %754, %755 : vector<2x1xf32>
    %757 = vector.broadcast %752 : vector<2x1xf32> to vector<2x128xf32>
    %758 = arith.subf %741, %757 : vector<2x128xf32>
    %cst_270 = arith.constant 9.99999974E-6 : f32
    %759 = vector.broadcast %cst_270 : f32 to vector<2x1xf32>
    %760 = arith.addf %756, %759 : vector<2x1xf32>
    %761 = math.rsqrt %760 : vector<2x1xf32>
    %762 = vector.broadcast %761 : vector<2x1xf32> to vector<2x128xf32>
    %763 = arith.mulf %758, %762 : vector<2x128xf32>
    %764 = vector.broadcast %743 : vector<1x128xf32> to vector<2x128xf32>
    %765 = arith.mulf %763, %764 : vector<2x128xf32>
    %766 = vector.broadcast %745 : vector<1x128xf32> to vector<2x128xf32>
    %767 = arith.addf %765, %766 : vector<2x128xf32>
    %cst_271 = arith.constant 5.000000e-01 : f32
    %768 = vector.broadcast %cst_271 : f32 to vector<2x128xf32>
    %769 = arith.mulf %768, %767 : vector<2x128xf32>
    %cst_272 = arith.constant 4.471500e-02 : f32
    %770 = vector.broadcast %cst_272 : f32 to vector<2x128xf32>
    %771 = arith.mulf %770, %767 : vector<2x128xf32>
    %772 = arith.mulf %771, %767 : vector<2x128xf32>
    %773 = arith.mulf %772, %767 : vector<2x128xf32>
    %774 = arith.addf %767, %773 : vector<2x128xf32>
    %cst_273 = arith.constant 0.797884583 : f32
    %775 = vector.broadcast %cst_273 : f32 to vector<2x128xf32>
    %776 = arith.mulf %775, %774 : vector<2x128xf32>
    %777 = math.tanh %776 : vector<2x128xf32>
    %cst_274 = arith.constant 1.000000e+00 : f32
    %778 = vector.broadcast %cst_274 : f32 to vector<2x128xf32>
    %779 = arith.addf %778, %777 : vector<2x128xf32>
    %780 = arith.mulf %769, %779 : vector<2x128xf32>
    %781 = arith.truncf %780 : vector<2x128xf32> to vector<2x128xbf16>
    %c2_275 = arith.constant 2 : index
    %c0_276 = arith.constant 0 : index
    %c0_277 = arith.constant 0 : index
    %782 = vector.load %arg17[%c2_275, %c0_276, %c0_277] : memref<3x128x128xbf16, #tpu.memory_space<vmem>>, vector<1x128x128xbf16>
    %783 = vector.shape_cast %782 : vector<1x128x128xbf16> to vector<128x128xbf16>
    %cst_278 = arith.constant dense<0.000000e+00> : vector<2x128xf32>
    %784 = tpu.matmul %781, %783, %cst_278 {dimension_numbers = #tpu.dot_dimension_numbers<[1], [0], [0], [1], [0, 0, 1, 1], [], []>} : vector<2x128xbf16>, vector<128x128xbf16>, vector<2x128xf32> -> vector<2x128xf32>
    %c2_279 = arith.constant 2 : index
    %c0_280 = arith.constant 0 : index
    %c0_281 = arith.constant 0 : index
    %785 = vector.load %arg18[%c2_279, %c0_280, %c0_281] : memref<3x1x128xf32, #tpu.memory_space<vmem>>, vector<1x1x128xf32>
    %786 = vector.shape_cast %785 : vector<1x1x128xf32> to vector<1x128xf32>
    %787 = vector.broadcast %786 : vector<1x128xf32> to vector<2x128xf32>
    %788 = arith.addf %784, %787 : vector<2x128xf32>
    %c0_282 = arith.constant 0 : index
    %c0_283 = arith.constant 0 : index
    %789 = vector.load %arg20[%c0_282, %c0_283] : memref<2x128xf32, #tpu.memory_space<vmem>>, vector<2x128xf32>
    tpu.vector_store %arg20[%c0_282, %c0_283], %788 {strides = array<i32>} : memref<2x128xf32, #tpu.memory_space<vmem>>, vector<2x128xf32>,
    return
  }
}

</mosaic_0001>

<bundles_post_ra>
// kernel: brain_network.1
= control target key start
LH: loop header
LB: loop body
LE: loop exit
PB: predicated region body
PF: predicated region fallthrough
CT: control target
= control target key end

     0   :  { %s3973_s0 = inlined_call_operand.hbm [shape: f32[4,128], index: 0, kind: input, shape index: {}]   ;;  %s3974_s1 = inlined_call_operand.vmem [shape: f32[4,1,128], index: 1, kind: input, shape index: {}]   ;;  %s3975_s2 = inlined_call_operand.vmem [shape: f32[4,1,128], index: 2, kind: input, shape index: {}]   ;;  %s3976_s3 = inlined_call_operand.hbm [shape: bf16[4,128,128], index: 3, kind: input, shape index: {}]   ;;  %s3977_s4 = inlined_call_operand.hbm [shape: f32[4,1,128], index: 4, kind: input, shape index: {}]   ;;  %s3978_s5 = inlined_call_operand.hbm [shape: bf16[4,128,128], index: 5, kind: input, shape index: {}]   ;;  %s3979_s6 = inlined_call_operand.hbm [shape: f32[4,1,128], index: 6, kind: input, shape index: {}]   ;;  %s3980_s7 = inlined_call_operand.vmem [shape: f32[8], index: 7, kind: input, shape index: {}]   ;;  %s3981_s8 = inlined_call_operand.vmem [shape: f32[8], index: 8, kind: input, shape index: {}]   ;;  %s3982_s9 = inlined_call_operand.vmem [shape: f32[16], index: 9, kind: input, shape index: {}]   ;;  %s3983_s10 = inlined_call_operand.hbm [shape: f32[8], index: 10, kind: input, shape index: {}]   ;;  %s3984_s11 = inlined_call_operand.vmem [shape: f32[16], index: 11, kind: input, shape index: {}]   ;;  %s3985_s12 = inlined_call_operand.hbm [shape: f32[8], index: 12, kind: input, shape index: {}]   ;;  %s3986_s13 = inlined_call_operand.hbm [shape: bf16[256,128], index: 13, kind: input, shape index: {}]   ;;  %s3987_s14 = inlined_call_operand.vmem [shape: f32[1,128], index: 14, kind: input, shape index: {}]   ;;  %s3988_s15 = inlined_call_operand.vmem [shape: f32[3,1,128], index: 15, kind: input, shape index: {}]   ;;  %s3989_s16 = inlined_call_operand.vmem [shape: f32[3,1,128], index: 16, kind: input, shape index: {}]   ;;  %s3990_s17 = inlined_call_operand.hbm [shape: bf16[3,128,128], index: 17, kind: input, shape index: {}]   ;;  %s3991_s18 = inlined_call_operand.vmem [shape: f32[3,1,128], index: 18, kind: input, shape index: {}]   ;;  %s3992_s19 = inlined_call_operand.hbm [shape: f32[2,128], index: 19, kind: output, shape index: {0}]   ;;  %s3993_s20 = inlined_call_operand.hbm [shape: f32[2,128], index: 20, kind: output, shape index: {1}]  }
   0x1   :  { %4002 = sst [smem:[#allocation39_spill]] %s3973_s0 }
   0x2   :  { %4003 = sst [smem:[#allocation40_spill]] %s3974_s1 }
   0x3   :  { %4004 = sst [smem:[#allocation41_spill]] %s3975_s2 }
   0x4   :  { %4005 = sst [smem:[#allocation42_spill]] %s3976_s3 }
   0x5   :  { %4006 = sst [smem:[#allocation43_spill]] %s3977_s4 }
   0x6   :  { %4007 = sst [smem:[#allocation44_spill]] %s3991_s18 }
   0x7   :  { %4008 = sst [smem:[#allocation45_spill]] %s3992_s19 }
   0x8   :  { %4009 = sst [smem:[#allocation46_spill]] %s3993_s20 }
   0x9   :  { %26 = vsyncpa [#allocation3], 0 }
   0xa   :  { %27 = vsyncpa [#allocation8], 0 }
   0xb   :  { %28 = vsyncpa [#allocation11], 0 }
   0xc   :  { %29 = vsyncpa [#allocation6], 0 }
   0xd   :  { %30 = vsyncpa [#allocation15], 0 }
   0xe   :  { %31 = vsyncpa [#allocation5], 0 }
   0xf   :  { %32 = vsyncpa [#allocation19], 0 }
  0x10   :  { %33 = vsyncpa [#allocation21], 0 }
  0x11   :  { %34 = vsyncpa [#allocation23], 0 }
  0x12   :  { %35 = vsyncpa [#allocation4], 0 }
  0x13   :  { %36 = vsyncpa [#allocation27], 0  ;;  %s3448_s1 = smov [#allocation7]   ;;  %s4010_s2 = sld [smem:[#allocation42_spill]] }
  0x14   :  { %s56_s22 = sshll.u32 %s3448_s1, 4  ;;  %s57_s22 = int_to_ptr.vmem [resolvable:$true] %s56_s22 }
  0x19   :  { %s3160_s25 = scalar_lea.hbm %s4010_s2, 4096 }
  0x1a   :  { %p3161_p0 = scmp.ne.s32.totalorder %s4010_s2, %s3160_s25  ;;  %p3164_p1 = scmp.lt.u32.totalorder %s3160_s25, %s4010_s2 }
  0x1c   :  { %p3166_p2 = pnand %p3164_p1, %p3161_p0 }
  0x1e   :  { %3169 = shalt.err (!%p3166_p2)
}
  0x1f   :  { %s3170_s4 = scalar_lea.vmem %s57_s22, 4096  ;;  %p3175_p4 = scmp.lt.s32.totalorder %s57_s22, %s57_s22 }
  0x20   :  { %p3171_p3 = scmp.ne.s32.totalorder %s57_s22, %s3170_s4  ;;  %p3176_p5 = scmp.lt.s32.totalorder %s3170_s4, %s3170_s4 }
  0x22   :  { %p3177_p6 = por %p3176_p5, %p3175_p4 }
  0x24   :  { %p3178_p7 = pnand %p3177_p6, %p3171_p3 }
  0x26   :  { %3181 = shalt.err (!%p3178_p7)
}
  0x27   :  { %s3449_s29 = smov 64   ;;  %s3450_s30 = smov 4  }
  0x28   :  { %62 = dma.hbm_to_vmem [thread:$0]  %s4010_s2, 4096, %s57_s22, [#allocation8], %s3449_s29, %s3449_s29, %s3450_s30  }
  0x29   :  { %s3451_s1 = smov [#allocation10]   ;;  %s115_s3 = sshll.u32 %s3981_s8, 4  ;;  %s116_s3 = int_to_ptr.vmem [resolvable:$true] %s115_s3 }
  0x2a   :  { %s80_s23 = sshll.u32 %s3451_s1, 4  ;;  %s3182_s28 = scalar_lea.hbm %s3978_s5, 4096  ;;  %s81_s23 = int_to_ptr.vmem [resolvable:$true] %s80_s23 }
  0x2b   :  { %p3183_p8 = scmp.ne.s32.totalorder %s3978_s5, %s3182_s28  ;;  %p3186_p9 = scmp.lt.u32.totalorder %s3182_s28, %s3978_s5 }
  0x2d   :  { %p3188_p10 = pnand %p3186_p9, %p3183_p8 }
  0x2f   :  { %3191 = shalt.err (!%p3188_p10)
}
  0x30   :  { %s3192_s22 = scalar_lea.vmem %s81_s23, 4096  ;;  %p3197_p12 = scmp.lt.s32.totalorder %s81_s23, %s81_s23 }
  0x31   :  { %p3193_p11 = scmp.ne.s32.totalorder %s81_s23, %s3192_s22  ;;  %p3198_p13 = scmp.lt.s32.totalorder %s3192_s22, %s3192_s22 }
  0x33   :  { %p3199_p0 = por %p3198_p13, %p3197_p12 }
  0x35   :  { %p3200_p1 = pnand %p3199_p0, %p3193_p11 }
  0x37   :  { %3203 = shalt.err (!%p3200_p1)
}
  0x38   :  { %86 = dma.hbm_to_vmem [thread:$0]  %s3978_s5, 4096, %s81_s23, [#allocation11], %s3449_s29, %s3449_s29, %s3450_s30  }
  0x39   :  { %s3204_s20 = scalar_lea.vmem %s116_s3, 16  ;;  %p3209_p3 = scmp.lt.s32.totalorder %s116_s3, %s116_s3 }
  0x3a   :  { %p3205_p2 = scmp.ne.s32.totalorder %s116_s3, %s3204_s20  ;;  %p3210_p4 = scmp.lt.s32.totalorder %s3204_s20, %s3204_s20 }
  0x3c   :  { %p3211_p5 = por %p3210_p4, %p3209_p3 }
  0x3e   :  { %p3212_p6 = pnand %p3211_p5, %p3205_p2 }
  0x40   :  { %3215 = shalt.err (!%p3212_p6)
}
  0x41   :  { %s3452_s18 = smov [#allocation14]   ;;  %s3453_s19 = smov [#allocation22]  }
  0x42   :  { %118 = dma.vmem_to_smem %s116_s3, 16, %s3452_s18, [#allocation15]  }
  0x43   :  { %s160_s0 = sshll.u32 %s3453_s19, 4  ;;  %s3454_s21 = smov [#allocation2]   ;;  %s161_s0 = int_to_ptr.vmem [resolvable:$true] %s160_s0 }
  0x44   :  { %s43_s1 = sshll.u32 %s3454_s21, 4  ;;  %s3216_s26 = scalar_lea.hbm %s3986_s13, 2048  ;;  %s44_s1 = int_to_ptr.vmem [resolvable:$true] %s43_s1 }
  0x45   :  { %p3217_p7 = scmp.ne.s32.totalorder %s3986_s13, %s3216_s26  ;;  %p3220_p8 = scmp.lt.u32.totalorder %s3216_s26, %s3986_s13 }
  0x47   :  { %p3222_p9 = pnand %p3220_p8, %p3217_p7 }
  0x49   :  { %3225 = shalt.err (!%p3222_p9)
}
  0x4a   :  { %s3226_s3 = scalar_lea.vmem %s161_s0, 2048  ;;  %p3231_p11 = scmp.lt.s32.totalorder %s161_s0, %s161_s0 }
  0x4b   :  { %p3227_p10 = scmp.ne.s32.totalorder %s161_s0, %s3226_s3  ;;  %p3232_p12 = scmp.lt.s32.totalorder %s3226_s3, %s3226_s3 }
  0x4d   :  { %p3233_p13 = por %p3232_p12, %p3231_p11 }
  0x4f   :  { %p3234_p0 = pnand %p3233_p13, %p3227_p10 }
  0x51   :  { %3237 = shalt.err (!%p3234_p0)
}
  0x52   :  { %166 = dma.hbm_to_vmem [thread:$0]  %s3986_s13, 2048, %s161_s0, [#allocation23], %s3449_s29, %s3449_s29, %s3450_s30  }
  0x53   :  { %s4011_s20 = sld [smem:[#allocation39_spill]] }
  0x59   :  { %s3238_s18 = scalar_lea.hbm %s4011_s20, 64 }
  0x5a   :  { %p3239_p1 = scmp.ne.s32.totalorder %s4011_s20, %s3238_s18  ;;  %p3242_p2 = scmp.lt.u32.totalorder %s3238_s18, %s4011_s20 }
  0x5c   :  { %p3244_p3 = pnand %p3242_p2, %p3239_p1 }
  0x5e   :  { %3247 = shalt.err (!%p3244_p3)
}
  0x5f   :  { %s3248_s26 = scalar_lea.vmem %s44_s1, 64  ;;  %p3253_p5 = scmp.lt.s32.totalorder %s44_s1, %s44_s1 }
  0x60   :  { %p3249_p4 = scmp.ne.s32.totalorder %s44_s1, %s3248_s26  ;;  %p3254_p6 = scmp.lt.s32.totalorder %s3248_s26, %s3248_s26 }
  0x62   :  { %p3255_p7 = por %p3254_p6, %p3253_p5 }
  0x64   :  { %p3256_p8 = pnand %p3255_p7, %p3249_p4 }
  0x66   :  { %3259 = shalt.err (!%p3256_p8)
}
  0x67   :  { %46 = dma.hbm_to_vmem [thread:$0]  %s4011_s20, 64, %s44_s1, [#allocation3]  }
  0x68   :  { %s3455_s27 = smov [#allocation9]   ;;  %s4012_s3 = sld [smem:[#allocation43_spill]] }
  0x69   :  { %s68_s5 = sshll.u32 %s3455_s27, 4  ;;  %s69_s5 = int_to_ptr.vmem [resolvable:$true] %s68_s5 }
  0x6e   :  { %s3260_s4 = scalar_lea.hbm %s4012_s3, 64 }
  0x6f   :  { %p3261_p9 = scmp.ne.s32.totalorder %s4012_s3, %s3260_s4  ;;  %p3264_p10 = scmp.lt.u32.totalorder %s3260_s4, %s4012_s3 }
  0x71   :  { %p3266_p11 = pnand %p3264_p10, %p3261_p9 }
  0x73   :  { %3269 = shalt.err (!%p3266_p11)
}
  0x74   :  { %s3270_s19 = scalar_lea.vmem %s69_s5, 64  ;;  %p3275_p13 = scmp.lt.s32.totalorder %s69_s5, %s69_s5 }
  0x75   :  { %p3271_p12 = scmp.ne.s32.totalorder %s69_s5, %s3270_s19  ;;  %p3276_p0 = scmp.lt.s32.totalorder %s3270_s19, %s3270_s19 }
  0x77   :  { %p3277_p1 = por %p3276_p0, %p3275_p13 }
  0x79   :  { %p3278_p2 = pnand %p3277_p1, %p3271_p12 }
  0x7b   :  { %3281 = shalt.err (!%p3278_p2)
}
  0x7c   :  { %s3456_s1 = smov 16   ;;  %s3457_s20 = smov 1  }
  0x7d   :  { %74 = dma.hbm_to_vmem [thread:$0]  %s4012_s3, 64, %s69_s5, [#allocation8], %s3456_s1, %s3456_s1, %s3457_s20  }
  0x7e   :  { %s105_s13 = sshll.u32 %s3980_s7, 4  ;;  %s3458_s0 = smov [#allocation12]   ;;  %s106_s13 = int_to_ptr.vmem [resolvable:$true] %s105_s13 }
  0x7f   :  { %s92_s27 = sshll.u32 %s3458_s0, 4  ;;  %s3282_s4 = scalar_lea.hbm %s3979_s6, 64  ;;  %s93_s27 = int_to_ptr.vmem [resolvable:$true] %s92_s27 }
  0x80   :  { %p3283_p3 = scmp.ne.s32.totalorder %s3979_s6, %s3282_s4  ;;  %p3286_p4 = scmp.lt.u32.totalorder %s3282_s4, %s3979_s6 }
  0x82   :  { %p3288_p5 = pnand %p3286_p4, %p3283_p3 }
  0x84   :  { %3291 = shalt.err (!%p3288_p5)
}
  0x85   :  { %s3292_s5 = scalar_lea.vmem %s93_s27, 64  ;;  %p3297_p7 = scmp.lt.s32.totalorder %s93_s27, %s93_s27 }
  0x86   :  { %p3293_p6 = scmp.ne.s32.totalorder %s93_s27, %s3292_s5  ;;  %p3298_p8 = scmp.lt.s32.totalorder %s3292_s5, %s3292_s5 }
  0x88   :  { %p3299_p9 = por %p3298_p8, %p3297_p7 }
  0x8a   :  { %p3300_p10 = pnand %p3299_p9, %p3293_p6 }
  0x8c   :  { %3303 = shalt.err (!%p3300_p10)
}
  0x8d   :  { %98 = dma.hbm_to_vmem [thread:$0]  %s3979_s6, 64, %s93_s27, [#allocation11], %s3456_s1, %s3456_s1, %s3457_s20  }
  0x8e   :  { %s3304_s19 = scalar_lea.vmem %s106_s13, 16  ;;  %p3309_p12 = scmp.lt.s32.totalorder %s106_s13, %s106_s13 }
  0x8f   :  { %p3305_p11 = scmp.ne.s32.totalorder %s106_s13, %s3304_s19  ;;  %p3310_p13 = scmp.lt.s32.totalorder %s3304_s19, %s3304_s19 }
  0x91   :  { %p3311_p0 = por %p3310_p13, %p3309_p12 }
  0x93   :  { %p3312_p1 = pnand %p3311_p0, %p3305_p11 }
  0x95   :  { %3315 = shalt.err (!%p3312_p1)
}
  0x96   :  { %s3459_s21 = smov [#allocation13]   ;;  %s125_s26 = sshll.u32 %s3982_s9, 4  ;;  %s126_s26 = int_to_ptr.vmem [resolvable:$true] %s125_s26 }
  0x97   :  { %108 = dma.vmem_to_smem %s106_s13, 16, %s3459_s21, [#allocation6]  }
  0x98   :  { %s3316_s0 = scalar_lea.vmem %s126_s26, 16  ;;  %p3321_p3 = scmp.lt.s32.totalorder %s126_s26, %s126_s26 }
  0x99   :  { %p3317_p2 = scmp.ne.s32.totalorder %s126_s26, %s3316_s0  ;;  %p3322_p4 = scmp.lt.s32.totalorder %s3316_s0, %s3316_s0 }
  0x9b   :  { %p3323_p5 = por %p3322_p4, %p3321_p3 }
  0x9d   :  { %p3324_p6 = pnand %p3323_p5, %p3317_p2 }
  0x9f   :  { %3327 = shalt.err (!%p3324_p6)
}
  0xa0   :  { %s3460_s6 = smov [#allocation16]   ;;  %s3328_s27 = scalar_lea.hbm %s3983_s10, 16 }
  0xa1   :  { %128 = dma.vmem_to_smem %s126_s26, 16, %s3460_s6, [#allocation15]  }
  0xa2   :  { %p3329_p7 = scmp.ne.s32.totalorder %s3983_s10, %s3328_s27  ;;  %p3332_p8 = scmp.lt.u32.totalorder %s3328_s27, %s3983_s10 }
  0xa4   :  { %p3334_p9 = pnand %p3332_p8, %p3329_p7 }
  0xa6   :  { %3337 = shalt.err (!%p3334_p9)
}
  0xa7   :  { %s3461_s4 = smov [#allocation17]   ;;  %s143_s5 = sshll.u32 %s3984_s11, 4  ;;  %s144_s5 = int_to_ptr.vmem [resolvable:$true] %s143_s5 }
  0xa8   :  { %136 = dma.hbm_to_smem %s3983_s10, 16, %s3461_s4, [#allocation5]  }
  0xa9   :  { %s3338_s7 = scalar_lea.vmem %s144_s5, 16  ;;  %p3343_p11 = scmp.lt.s32.totalorder %s144_s5, %s144_s5 }
  0xaa   :  { %p3339_p10 = scmp.ne.s32.totalorder %s144_s5, %s3338_s7  ;;  %p3344_p12 = scmp.lt.s32.totalorder %s3338_s7, %s3338_s7 }
  0xac   :  { %p3345_p13 = por %p3344_p12, %p3343_p11 }
  0xae   :  { %p3346_p0 = pnand %p3345_p13, %p3339_p10 }
  0xb0   :  { %3349 = shalt.err (!%p3346_p0)
}
  0xb1   :  { %s3462_s3 = smov [#allocation18]   ;;  %s3350_s24 = scalar_lea.hbm %s3985_s12, 16 }
  0xb2   :  { %146 = dma.vmem_to_smem %s144_s5, 16, %s3462_s3, [#allocation19]  }
  0xb3   :  { %p3351_p1 = scmp.ne.s32.totalorder %s3985_s12, %s3350_s24  ;;  %p3354_p2 = scmp.lt.u32.totalorder %s3350_s24, %s3985_s12 }
  0xb5   :  { %p3356_p3 = pnand %p3354_p2, %p3351_p1 }
  0xb7   :  { %3359 = shalt.err (!%p3356_p3)
}
  0xb8   :  { %s3463_s0 = smov [#allocation20]   ;;  %s3464_s20 = smov [#allocation24]  }
  0xb9   :  { %154 = dma.hbm_to_smem %s3985_s12, 16, %s3463_s0, [#allocation21]  }
  0xba   :  { %s178_s27 = sshll.u32 %s3464_s20, 4  ;;  %s3360_s28 = scalar_lea.hbm %s3990_s17, 3072  ;;  %s179_s27 = int_to_ptr.vmem [resolvable:$true] %s178_s27 }
  0xbb   :  { %p3361_p4 = scmp.ne.s32.totalorder %s3990_s17, %s3360_s28  ;;  %p3364_p5 = scmp.lt.u32.totalorder %s3360_s28, %s3990_s17 }
  0xbd   :  { %p3366_p6 = pnand %p3364_p5, %p3361_p4 }
  0xbf   :  { %3369 = shalt.err (!%p3366_p6)
}
  0xc0   :  { %s3370_s2 = scalar_lea.vmem %s179_s27, 3072  ;;  %p3375_p8 = scmp.lt.s32.totalorder %s179_s27, %s179_s27 }
  0xc1   :  { %p3371_p7 = scmp.ne.s32.totalorder %s179_s27, %s3370_s2  ;;  %p3376_p9 = scmp.lt.s32.totalorder %s3370_s2, %s3370_s2 }
  0xc3   :  { %p3377_p10 = por %p3376_p9, %p3375_p8 }
  0xc5   :  { %p3378_p11 = pnand %p3377_p10, %p3371_p7 }
  0xc7   :  { %3381 = shalt.err (!%p3378_p11)
}
  0xc8   :  { %184 = dma.hbm_to_vmem [thread:$0]  %s3990_s17, 3072, %s179_s27, [#allocation23], %s3449_s29, %s3449_s29, %s3450_s30  }
  0xc9   :  { %3426 = dma.done.wait [#allocation3], 64  }
  0xca   :  { %3427 = vsyncadd [#allocation3], 4294967232 }
  0xcb   :  { %3428 = dma.done.wait [#allocation8], 4160  }
  0xcc   :  { %3429 = vsyncadd [#allocation8], 4294963136 }
  0xcd   :  { %3430 = dma.done.wait [#allocation11], 4160  }
  0xce   :  { %3431 = vsyncadd [#allocation11], 4294963136 }
  0xcf   :  { %3432 = dma.done.wait [#allocation6], 16  }
  0xd0   :  { %3433 = vsyncadd [#allocation6], 4294967280 }
  0xd1   :  { %3434 = dma.done.wait [#allocation15], 32  }
  0xd2   :  { %3435 = vsyncadd [#allocation15], 4294967264 }
  0xd3   :  { %3436 = dma.done.wait [#allocation5], 16  }
  0xd4   :  { %3437 = vsyncadd [#allocation5], 4294967280 }
  0xd5   :  { %3438 = dma.done.wait [#allocation19], 16  }
  0xd6   :  { %3439 = vsyncadd [#allocation19], 4294967280 }
  0xd7   :  { %3440 = dma.done.wait [#allocation21], 16  }
  0xd8   :  { %3441 = vsyncadd [#allocation21], 4294967280 }
  0xd9   :  { %3442 = dma.done.wait [#allocation23], 5120  }
  0xda   :  { %3443 = vsyncadd [#allocation23], 4294962176 }
  0xdb   :  { %226 = sfence }
  0xdc   :  { %v228_v0 = vld [vmem:[#allocation2] sm:$0xf]  ;;  %vm234_vm0 = vcmask 1040384   ;;  %vm236_vm1 = vcmask 1041408   ;;  %vm238_vm2 = vcmask 1042432   ;;  %vm242_vm3 = vcmask 1043456  }
  0xdd   :  { %v230_v1 = vrot.slane %v228_v0, 1  ;;  %v232_v2 = vrot.slane %v228_v0, 7  ;;  %v3004_v3 = vld [vmem:[#allocation7] sm:$0xff]   ;;  %v3465_v4 = vmov 0.0   ;;  %v3005_v11 = vld [vmem:[#allocation7 + $0x8] sm:$0xff]   ;;  %v3006_v12 = vld [vmem:[#allocation7 + $0x10] sm:$0xff]  }
  0xde   :  { %2763 = vmatprep.subr.bf16.mxu0 %v3465_v4  ;;  %2783 = vmatprep.subr.bf16.mxu1 %v3465_v4  ;;  %v3007_v13 = vld [vmem:[#allocation7 + $0x18] sm:$0xff]   ;;  %v3008_v14 = vld [vmem:[#allocation7 + $0x20] sm:$0xff]   ;;  %vm3466_vm4 = vmmov 0   ;;  %v3009_v15 = vld [vmem:[#allocation7 + $0x28] sm:$0xff]   ;;  %s4013_s30 = sld [smem:[#allocation40_spill]]  ;;  %s4014_s3 = sld [smem:[#allocation41_spill]] }
  0xdf   :  { %v235_v5 = vsel %vm234_vm0, %v228_v0, %v230_v1  ;;  %2764 = vmatpush3.bf16.msra.mxu0 %v3004_v3  ;;  %2779 = vmatprep.mubr.msk.bf16.mxu0 %vm3466_vm4, %v3465_v4  ;;  %v3010_v16 = vld [vmem:[#allocation7 + $0x30] sm:$0xff]   ;;  %v3011_v17 = vld [vmem:[#allocation7 + $0x38] sm:$0xff]   ;;  %v3012_v18 = vld [vmem:[#allocation10] sm:$0xff]   ;;  %s523_s19 = sld [smem:[#allocation13]]  ;;  %s2462_s21 = sld [smem:[#allocation13 + $0x1]] }
  0xe0   :  { %v237_v6 = vsel %vm236_vm1, %v235_v5, %v232_v2  ;;  %2765 = vmatprep.subr.bf16.mxu0 %v3465_v4  ;;  %2799 = vmatprep.mubr.msk.bf16.mxu1 %vm3466_vm4, %v3465_v4  ;;  %v3013_v34 = vld [vmem:[#allocation10 + $0x8] sm:$0xff]   ;;  %v3014_v35 = vld [vmem:[#allocation10 + $0x10] sm:$0xff]   ;;  %v3015_v36 = vld [vmem:[#allocation10 + $0x18] sm:$0xff]   ;;  %s526_s24 = sld [smem:[#allocation14]]  ;;  %s2463_s25 = sld [smem:[#allocation14 + $0x1]] }
  0xe1   :  { %v3710_v7 = vsel %vm238_vm2, %v237_v6, %v228_v0  ;;  %2784 = vmatpush3.bf16.msra.mxu1 %v3012_v18  ;;  %v3016_v37 = vld [vmem:[#allocation10 + $0x20] sm:$0xff]   ;;  %v3017_v38 = vld [vmem:[#allocation10 + $0x28] sm:$0xff]   ;;  %v3018_v39 = vld [vmem:[#allocation10 + $0x30] sm:$0xff]   ;;  %s2464_s10 = sld [smem:[#allocation16 + $0x1]]  ;;  %s2466_s26 = sld [smem:[#allocation16 + $0x3]] }
  0xe2   :  { %v243_v8 = vsel %vm242_vm3, %v3710_v7, 0.0  ;;  %v246_v9 = vmul.f32 %v3710_v7, %v3710_v7  ;;  %2785 = vmatprep.subr.bf16.mxu1 %v3465_v4  ;;  %v3019_v40 = vld [vmem:[#allocation10 + $0x38] sm:$0xff]   ;;  %v2453_v58 = vld [vmem:[#allocation12] ss:$0 sm:$0xff]  ;;  %s543_s11 = sld [smem:[#allocation16]]  ;;  %s2465_s0 = sld [smem:[#allocation16 + $0x2]] }
  0xe3   :  { %244 = vadd.xlane.f32.xlu0 %v243_v8  ;;  %2766 = vmatpush3.bf16.msra.mxu0 %v3005_v11  ;;  %v2444_v41 = vld [vmem:[#allocation9] ss:$0 sm:$0xff]  ;;  %s553_s6 = sld [smem:[#allocation17]]  ;;  %s2467_s1 = sld [smem:[#allocation17 + $0x1]] }
  0xe4   :  { %v247_v10 = vsel %vm242_vm3, %v246_v9, 0.0  ;;  %2767 = vmatprep.subr.bf16.mxu0 %v3465_v4  ;;  %v2442_v28 = vld [vmem:[%s4013_s30] ss:$0 sm:$0xff]  ;;  %v3020_v57 = vld [vmem:[#allocation7 + $0x40] sm:$0xff]   ;;  %s587_s20 = sld [smem:[#allocation18]]  ;;  %s2469_s27 = sld [smem:[#allocation18 + $0x2]] }
  0xe5   :  { %v2443_v30 = vld [vmem:[%s4014_s3] ss:$0 sm:$0xff]  ;;  %2786 = vmatpush3.bf16.msra.mxu1 %v3013_v34  ;;  %s2468_s23 = sld [smem:[#allocation18 + $0x1]]  ;;  %s2470_s13 = sld [smem:[#allocation18 + $0x3]] }
  0xe6   :  { %2787 = vmatprep.subr.bf16.mxu1 %v3465_v4  ;;  %s594_s28 = sld [smem:[#allocation20]]  ;;  %s2471_s9 = sld [smem:[#allocation20 + $0x1]] }
  0xe7   :  { %248 = vadd.xlane.f32.xlu0 %v247_v10  ;;  %2768 = vmatpush3.bf16.msra.mxu0 %v3006_v12  ;;  %s2494_s12 = sld [smem:[#allocation13 + $0x2]]  ;;  %s2496_s18 = sld [smem:[#allocation13 + $0x3]] }
  0xe8   :  { %2769 = vmatprep.subr.bf16.mxu0 %v3465_v4  ;;  %s2495_s17 = sld [smem:[#allocation14 + $0x2]]  ;;  %s2497_s29 = sld [smem:[#allocation14 + $0x3]] }
  0xe9   :  { %2788 = vmatpush3.bf16.msra.mxu1 %v3014_v35  ;;  %s2499_s5 = sld [smem:[#allocation16 + $0x5]]  ;;  %s2502_s7 = sld [smem:[#allocation16 + $0x7]] }
  0xea   :  { %2789 = vmatprep.subr.bf16.mxu1 %v3465_v4  ;;  %s2533_s4 = sld [smem:[#allocation14 + $0x4]]  ;;  %s2535_s22 = sld [smem:[#allocation14 + $0x5]] }
  0xeb   :  { %2770 = vmatpush3.bf16.msra.mxu0 %v3007_v13  ;;  %s2537_s8 = sld [smem:[#allocation16 + $0x9]]  ;;  %s2540_s2 = sld [smem:[#allocation16 + $0xb]] }
  0xec   :  { %2771 = vmatprep.subr.bf16.mxu0 %v3465_v4 }
  0xed   :  { %2790 = vmatpush3.bf16.msra.mxu1 %v3015_v36 }
  0xee   :  { %2791 = vmatprep.subr.bf16.mxu1 %v3465_v4 }
  0xef   :  { %2772 = vmatpush3.bf16.msra.mxu0 %v3008_v14 }
  0xf0   :  { %2773 = vmatprep.subr.bf16.mxu0 %v3465_v4 }
  0xf1   :  { %2792 = vmatpush3.bf16.msra.mxu1 %v3016_v37 }
  0xf2   :  { %2793 = vmatprep.subr.bf16.mxu1 %v3465_v4 }
  0xf3   :  { %2774 = vmatpush3.bf16.msra.mxu0 %v3009_v15 }
  0xf4   :  { %2775 = vmatprep.subr.bf16.mxu0 %v3465_v4 }
  0xf5   :  { %2794 = vmatpush3.bf16.msra.mxu1 %v3017_v38  ;;  %v554_v38 = vstv %s553_s6  ;;  %s2506_s6 = sld [smem:[#allocation20 + $0x2]] }
  0xf6   :  { %2795 = vmatprep.subr.bf16.mxu1 %v3465_v4 }
  0xf7   :  { %2776 = vmatpush3.bf16.msra.mxu0 %v3010_v16  ;;  %v524_v16 = vstv %s523_s19  ;;  %s2498_s19 = sld [smem:[#allocation16 + $0x4]] }
  0xf8   :  { %2777 = vmatprep.subr.bf16.mxu0 %v3465_v4 }
  0xf9   :  { %2796 = vmatpush3.bf16.msra.mxu1 %v3018_v39  ;;  %v576_v39 = vstv %s2467_s1  ;;  %s2509_s1 = sld [smem:[#allocation20 + $0x3]] }
  0xfa   :  { %2797 = vmatprep.subr.bf16.mxu1 %v3465_v4 }
  0xfb   :  { %2778 = vmatpush3.bf16.msra.mxu0 %v3011_v17 }
  0xfc   :  { %2803 = vmatprep.subr.bf16.mxu0 %v3465_v4 }
  0xfd   :  { %2798 = vmatpush3.bf16.msra.mxu1 %v3019_v40 }
  0xfe   :  { %2823 = vmatprep.subr.bf16.mxu1 %v3465_v4 }
 0x170   :  { %v245_v19 = vpop.xlane.xlu0 %244 }
 0x171   :  { %v250_v20 = vmul.f32 0.0078125, %v245_v19 }
 0x173   :  { %v252_v22 = vmul.f32 %v250_v20, %v250_v20  ;;  %v254_v26 = vsub.f32 %v3710_v7, %v250_v20  ;;  %v538_v20 = vstv %s2462_s21  ;;  %s2501_s21 = sld [smem:[#allocation16 + $0x6]] }
 0x174   :  { %v249_v21 = vpop.xlane.xlu0 %248 }
 0x175   :  { %v251_v23 = vmul.f32 0.0078125, %v249_v21 }
 0x177   :  { %v253_v24 = vsub.f32 %v251_v23, %v252_v22  ;;  %v527_v23 = vstv %s526_s24  ;;  %s2500_s24 = sld [smem:[#allocation17 + $0x2]] }
 0x179   :  { %v255_v25 = vadd.f32 1e-05, %v253_v24  ;;  %v541_v24 = vstv %s2463_s25  ;;  %s2503_s25 = sld [smem:[#allocation17 + $0x3]] }
 0x17b   :  { %3108 = vrsqrt.f32 %v255_v25 }
 0x185   :  { %v3109_v27 = vpop.eup %3108 }
 0x186   :  { %v257_v29 = vmul.f32 %v3109_v27, %v254_v26  ;;  %v547_v26 = vstv %s2464_s10  ;;  %v569_v27 = vstv %s2466_s26  ;;  %s2504_s10 = sld [smem:[#allocation18 + $0x4]]  ;;  %s2507_s26 = sld [smem:[#allocation18 + $0x6]] }
 0x188   :  { %v264_v31 = vmul.f32 %v2442_v28, %v257_v29 }
 0x18a   :  { %v271_v32 = vadd.f32 %v2443_v30, %v264_v31  ;;  %v544_v30 = vstv %s543_s11  ;;  %v566_v31 = vstv %s2465_s0  ;;  %s2505_s11 = sld [smem:[#allocation18 + $0x5]]  ;;  %s2508_s0 = sld [smem:[#allocation18 + $0x7]] }
 0x18c   :  { %v272_v33 = vpack.c.bf16 %v271_v32, %v271_v32 }
 0x18e   :  { %2780 = vmatmul.mubr.bf16.vlgmr.msra.gmra.mrb[0].mxu0 %v272_v33 }
 0x18f   :  { %2819 = vmatprep.mubr.msk.bf16.mxu0 %vm3466_vm4, %v3465_v4  ;;  %2804 = vmatpush3.bf16.msra.mxu0 %v3020_v57 }
 0x190   :  { %2805 = vmatprep.subr.bf16.mxu0 %v3465_v4 }
 0x261   :  { %v378_v42 = vpop.f32.mrb[0].mxu0 }
 0x262   :  { %v379_v43 = vadd.f32 %v2444_v41, %v378_v42  ;;  %v2781_v44 = vpop.f32.mrb[1].mxu0 }
 0x263   :  { %v381_v45 = vpop.f32.mrb[2].mxu0 }
 0x264   :  { %v385_v46 = vmul.f32 0.044715, %v379_v43  ;;  %v2782_v47 = vpop.f32.mrb[3].mxu0  ;;  %v384_v53 = vmul.f32 0.5, %v379_v43 }
 0x266   :  { %v386_v48 = vmul.f32 %v385_v46, %v379_v43 }
 0x268   :  { %v387_v49 = vmul.f32 %v386_v48, %v379_v43 }
 0x26a   :  { %v388_v50 = vadd.f32 %v387_v49, %v379_v43 }
 0x26c   :  { %v389_v51 = vmul.f32 0.7978846, %v388_v50 }
 0x26e   :  { %3110 = vtanh.f32 %v389_v51 }
 0x278   :  { %v3111_v52 = vpop.eup %3110 }
 0x279   :  { %v391_v54 = vadd.f32 1.0, %v3111_v52 }
 0x27b   :  { %v392_v55 = vmul.f32 %v391_v54, %v384_v53 }
 0x27d   :  { %v393_v56 = vpack.c.bf16 %v392_v55, %v392_v55 }
 0x27f   :  { %2800 = vmatmul.mubr.bf16.vlgmr.msra.gmra.mrb[0].mxu1 %v393_v56 }
 0x280   :  { %2839 = vmatprep.mubr.msk.bf16.mxu1 %vm3466_vm4, %v3465_v4 }
 0x352   :  { %v499_v59 = vpop.f32.mrb[0].mxu1 }
 0x353   :  { %v500_v60 = vadd.f32 %v2453_v58, %v499_v59  ;;  %v2801_v61 = vpop.f32.mrb[1].mxu1 }
 0x354   :  { %v502_v62 = vpop.f32.mrb[2].mxu1  ;;  %v599_v61 = vstv %s2469_s27  ;;  %s2578_s27 = sld [smem:[#allocation16 + $0xf]] }
 0x355   :  { %v3749_v63 = vadd.f32 %v500_v60, %v3710_v7  ;;  %v2802_v0 = vpop.f32.mrb[3].mxu1  ;;  %v588_v60 = vstv %s587_s20  ;;  %s2575_s20 = sld [smem:[#allocation16 + $0xd]] }
 0x356   :  { %v591_v0 = vstv %s2468_s23  ;;  %s2574_s23 = sld [smem:[#allocation16 + $0xc]] }
 0x357   :  { %v506_v1 = vmul.f32 %v3749_v63, %v3749_v63  ;;  %v508_v2 = vrot.slane %v3749_v63, 2 }
 0x359   :  { %v510_v3 = vadd.f32 %v508_v2, %v3749_v63  ;;  %v512_v5 = vrot.slane %v506_v1, 2 }
 0x35b   :  { %v514_v6 = vadd.f32 %v512_v5, %v506_v1  ;;  %v515_v8 = vmul.f32 0.5, %v510_v3  ;;  %v602_v1 = vstv %s2470_s13  ;;  %s2577_s13 = sld [smem:[#allocation16 + $0xe]] }
 0x35d   :  { %v516_v9 = vmul.f32 0.5, %v514_v6  ;;  %v517_v10 = vmul.f32 %v515_v8, %v515_v8  ;;  %v530_v13 = vrot.slane %v515_v8, 6  ;;  %v521_v14 = vsub.f32 %v3749_v63, %v515_v8 }
 0x35f   :  { %v518_v11 = vsub.f32 %v516_v9, %v517_v10  ;;  %v532_v18 = vsub.f32 %v3749_v63, %v530_v13  ;;  %v595_v9 = vstv %s594_s28  ;;  %v606_v10 = vstv %s2471_s9  ;;  %s2532_s28 = sld [smem:[#allocation13 + $0x4]]  ;;  %s2534_s9 = sld [smem:[#allocation13 + $0x5]] }
 0x360   :  { %v609_v13 = vrot.slane %v3710_v7, 2 }
 0x361   :  { %v519_v12 = vadd.f32 1e-05, %v518_v11 }
 0x363   :  { %3112 = vrsqrt.f32 %v519_v12 }
 0x36d   :  { %v3113_v15 = vpop.eup %3112 }
 0x36e   :  { %v522_v17 = vmul.f32 %v3113_v15, %v521_v14  ;;  %v534_v19 = vrot.slane %v3113_v15, 6 }
 0x370   :  { %v525_v21 = vmul.f32 %v524_v16, %v522_v17  ;;  %v536_v22 = vmul.f32 %v534_v19, %v532_v18 }
 0x372   :  { %v539_v25 = vmul.f32 %v538_v20, %v536_v22  ;;  %v528_v28 = vadd.f32 %v527_v23, %v525_v21  ;;  %v3021_v23 = vld [vmem:[#allocation7 + $0x48] sm:$0xff]  }
 0x373   :  { %2806 = vmatpush3.bf16.msra.mxu0 %v3021_v23 }
 0x374   :  { %v542_v29 = vadd.f32 %v541_v24, %v539_v25  ;;  %v545_v34 = vmul.f32 %v544_v30, %v528_v28  ;;  %v567_v36 = vmul.f32 %v566_v31, %v528_v28  ;;  %2807 = vmatprep.subr.bf16.mxu0 %v3465_v4  ;;  %v3022_v24 = vld [vmem:[#allocation7 + $0x50] sm:$0xff]   ;;  %v3024_v25 = vld [vmem:[#allocation7 + $0x60] sm:$0xff]   ;;  %v3027_v28 = vld [vmem:[#allocation7 + $0x78] sm:$0xff]  }
 0x376   :  { %v548_v32 = vmul.f32 %v547_v26, %v542_v29  ;;  %v570_v33 = vmul.f32 %v569_v27, %v542_v29  ;;  %v3025_v26 = vld [vmem:[#allocation7 + $0x68] sm:$0xff]   ;;  %v3026_v27 = vld [vmem:[#allocation7 + $0x70] sm:$0xff]  }
 0x377   :  { %2808 = vmatpush3.bf16.msra.mxu0 %v3022_v24  ;;  %v3028_v29 = vld [vmem:[#allocation10 + $0x40] sm:$0xff]  }
 0x378   :  { %v550_v35 = vrot.slane %v548_v32, 2  ;;  %v572_v37 = vrot.slane %v570_v33, 2  ;;  %2809 = vmatprep.subr.bf16.mxu0 %v3465_v4  ;;  %2824 = vmatpush3.bf16.msra.mxu1 %v3028_v29 }
 0x379   :  { %2825 = vmatprep.subr.bf16.mxu1 %v3465_v4 }
 0x37a   :  { %v552_v40 = vadd.f32 %v550_v35, %v545_v34  ;;  %v574_v41 = vadd.f32 %v572_v37, %v567_v36 }
 0x37c   :  { %v555_v42 = vadd.f32 %v554_v38, %v552_v40  ;;  %v577_v43 = vadd.f32 %v576_v39, %v574_v41  ;;  %v2474_v39 = vld [vmem:[%s4013_s30 + $0x1] ss:$0 sm:$0xff] }
 0x37d   :  { %v2475_v41 = vld [vmem:[%s4014_s3 + $0x1] ss:$0 sm:$0xff] }
 0x37e   :  { %v557_v44 = vmul.f32 0.044715, %v555_v42  ;;  %v579_v45 = vmul.f32 0.044715, %v577_v43  ;;  %v556_v56 = vmul.f32 0.5, %v555_v42  ;;  %v578_v58 = vmul.f32 0.5, %v577_v43 }
 0x380   :  { %v558_v46 = vmul.f32 %v557_v44, %v555_v42  ;;  %v580_v47 = vmul.f32 %v579_v45, %v577_v43  ;;  %v3029_v45 = vld [vmem:[#allocation10 + $0x48] sm:$0xff]  }
 0x381   :  { %2826 = vmatpush3.bf16.msra.mxu1 %v3029_v45 }
 0x382   :  { %v559_v48 = vmul.f32 %v558_v46, %v555_v42  ;;  %v581_v49 = vmul.f32 %v580_v47, %v577_v43  ;;  %2827 = vmatprep.subr.bf16.mxu1 %v3465_v4  ;;  %v3030_v46 = vld [vmem:[#allocation10 + $0x50] sm:$0xff]   ;;  %v3031_v47 = vld [vmem:[#allocation10 + $0x58] sm:$0xff]  }
 0x384   :  { %v560_v50 = vadd.f32 %v559_v48, %v555_v42  ;;  %v582_v51 = vadd.f32 %v581_v49, %v577_v43  ;;  %v3032_v48 = vld [vmem:[#allocation10 + $0x60] sm:$0xff]   ;;  %v3033_v49 = vld [vmem:[#allocation10 + $0x68] sm:$0xff]  }
 0x385   :  { %2828 = vmatpush3.bf16.msra.mxu1 %v3030_v46 }
 0x386   :  { %v561_v52 = vmul.f32 0.7978846, %v560_v50  ;;  %v583_v53 = vmul.f32 0.7978846, %v582_v51  ;;  %2829 = vmatprep.subr.bf16.mxu1 %v3465_v4  ;;  %v3034_v50 = vld [vmem:[#allocation10 + $0x70] sm:$0xff]   ;;  %v3035_v51 = vld [vmem:[#allocation10 + $0x78] sm:$0xff]  }
 0x388   :  { %3114 = vtanh.f32 %v561_v52  ;;  %v2476_v52 = vld [vmem:[#allocation9 + $0x1] ss:$0 sm:$0xff] }
 0x389   :  { %3116 = vtanh.f32 %v583_v53  ;;  %2830 = vmatpush3.bf16.msra.mxu1 %v3031_v47 }
 0x38a   :  { %2831 = vmatprep.subr.bf16.mxu1 %v3465_v4 }
 0x38d   :  { %2832 = vmatpush3.bf16.msra.mxu1 %v3032_v48 }
 0x38e   :  { %2833 = vmatprep.subr.bf16.mxu1 %v3465_v4 }
 0x391   :  { %2834 = vmatpush3.bf16.msra.mxu1 %v3033_v49  ;;  %v935_v49 = vstv %s2500_s24  ;;  %s2544_s24 = sld [smem:[#allocation20 + $0x4]] }
 0x392   :  { %v3115_v54 = vpop.eup %3114  ;;  %2835 = vmatprep.subr.bf16.mxu1 %v3465_v4 }
 0x393   :  { %v3117_v55 = vpop.eup %3116  ;;  %v563_v57 = vadd.f32 1.0, %v3115_v54 }
 0x394   :  { %v585_v59 = vadd.f32 1.0, %v3117_v55 }
 0x395   :  { %v564_v62 = vmul.f32 %v563_v57, %v556_v56  ;;  %2836 = vmatpush3.bf16.msra.mxu1 %v3034_v50  ;;  %v957_v50 = vstv %s2503_s25  ;;  %s2547_s25 = sld [smem:[#allocation20 + $0x5]] }
 0x396   :  { %v586_v2 = vmul.f32 %v585_v59, %v578_v58  ;;  %2837 = vmatprep.subr.bf16.mxu1 %v3465_v4 }
 0x397   :  { %v589_v3 = vmul.f32 %v588_v60, %v564_v62  ;;  %v600_v5 = vmul.f32 %v599_v61, %v564_v62 }
 0x398   :  { %v592_v6 = vmul.f32 %v591_v0, %v586_v2  ;;  %v603_v8 = vmul.f32 %v602_v1, %v586_v2 }
 0x399   :  { %2838 = vmatpush3.bf16.msra.mxu1 %v3035_v51 }
 0x39a   :  { %v593_v11 = vadd.f32 %v592_v6, %v589_v3  ;;  %v604_v12 = vadd.f32 %v603_v8, %v600_v5  ;;  %2863 = vmatprep.subr.bf16.mxu1 %v3465_v4  ;;  %v3036_v6 = vld [vmem:[#allocation7 + $0x80] sm:$0xff]  }
 0x39b   :  { %v2485_v8 = vld [vmem:[#allocation12 + $0x1] ss:$0 sm:$0xff] }
 0x39c   :  { %v596_v14 = vadd.f32 %v595_v9, %v593_v11  ;;  %v607_v15 = vadd.f32 %v606_v10, %v604_v12 }
 0x39e   :  { %v611_v16 = vadd.f32 %v609_v13, %v607_v15  ;;  %v597_v17 = vadd.f32 %v596_v14, %v3710_v7  ;;  %v3023_v7 = vld [vmem:[#allocation7 + $0x58] sm:$0xff]  }
 0x39f   :  { %2810 = vmatpush3.bf16.msra.mxu0 %v3023_v7 }
 0x3a0   :  { %v613_v18 = vrot.slane %v611_v16, 6  ;;  %2811 = vmatprep.subr.bf16.mxu0 %v3465_v4 }
 0x3a2   :  { %v3760_v19 = vsel %vm236_vm1, %v597_v17, %v613_v18 }
 0x3a3   :  { %v620_v20 = vsel %vm242_vm3, %v3760_v19, 0.0  ;;  %v623_v21 = vmul.f32 %v3760_v19, %v3760_v19  ;;  %2812 = vmatpush3.bf16.msra.mxu0 %v3024_v25 }
 0x3a4   :  { %621 = vadd.xlane.f32.xlu1 %v620_v20  ;;  %2813 = vmatprep.subr.bf16.mxu0 %v3465_v4 }
 0x3a5   :  { %v624_v22 = vsel %vm242_vm3, %v623_v21, 0.0 }
 0x3a7   :  { %2814 = vmatpush3.bf16.msra.mxu0 %v3025_v26 }
 0x3a8   :  { %625 = vadd.xlane.f32.xlu1 %v624_v22  ;;  %2815 = vmatprep.subr.bf16.mxu0 %v3465_v4 }
 0x3ab   :  { %2816 = vmatpush3.bf16.msra.mxu0 %v3026_v27  ;;  %v905_v27 = vstv %s2494_s12  ;;  %s2536_s12 = sld [smem:[#allocation16 + $0x8]] }
 0x3ac   :  { %2817 = vmatprep.subr.bf16.mxu0 %v3465_v4 }
 0x3af   :  { %2818 = vmatpush3.bf16.msra.mxu0 %v3027_v28 }
 0x3b0   :  { %2843 = vmatprep.subr.bf16.mxu0 %v3465_v4 }
 0x431   :  { %v622_v30 = vpop.xlane.xlu1 %621 }
 0x432   :  { %v627_v31 = vmul.f32 0.0078125, %v622_v30 }
 0x434   :  { %v629_v33 = vmul.f32 %v627_v31, %v627_v31  ;;  %v631_v37 = vsub.f32 %v3760_v19, %v627_v31  ;;  %v919_v31 = vstv %s2496_s18  ;;  %s2539_s18 = sld [smem:[#allocation16 + $0xa]] }
 0x435   :  { %v626_v32 = vpop.xlane.xlu1 %625 }
 0x436   :  { %v628_v34 = vmul.f32 0.0078125, %v626_v32 }
 0x438   :  { %v630_v35 = vsub.f32 %v628_v34, %v629_v33  ;;  %v908_v34 = vstv %s2495_s17  ;;  %s2538_s17 = sld [smem:[#allocation17 + $0x4]] }
 0x43a   :  { %v632_v36 = vadd.f32 1e-05, %v630_v35  ;;  %v922_v35 = vstv %s2497_s29  ;;  %s2541_s29 = sld [smem:[#allocation17 + $0x5]] }
 0x43c   :  { %3118 = vrsqrt.f32 %v632_v36 }
 0x446   :  { %v3119_v38 = vpop.eup %3118 }
 0x447   :  { %v634_v40 = vmul.f32 %v3119_v38, %v631_v37  ;;  %v928_v37 = vstv %s2499_s5  ;;  %v950_v38 = vstv %s2502_s7  ;;  %s2542_s5 = sld [smem:[#allocation18 + $0x8]]  ;;  %s2545_s7 = sld [smem:[#allocation18 + $0xa]] }
 0x449   :  { %v641_v42 = vmul.f32 %v2474_v39, %v634_v40 }
 0x44b   :  { %v648_v43 = vadd.f32 %v2475_v41, %v641_v42  ;;  %v925_v41 = vstv %s2498_s19  ;;  %v947_v42 = vstv %s2501_s21  ;;  %s2543_s19 = sld [smem:[#allocation18 + $0x9]]  ;;  %s2546_s21 = sld [smem:[#allocation18 + $0xb]] }
 0x44d   :  { %v649_v44 = vpack.c.bf16 %v648_v43, %v648_v43 }
 0x44f   :  { %2820 = vmatmul.mubr.bf16.vlgmr.msra.gmra.mrb[4].mxu0 %v649_v44 }
 0x450   :  { %2859 = vmatprep.mubr.msk.bf16.mxu0 %vm3466_vm4, %v3465_v4  ;;  %2844 = vmatpush3.bf16.msra.mxu0 %v3036_v6 }
 0x451   :  { %2845 = vmatprep.subr.bf16.mxu0 %v3465_v4 }
 0x522   :  { %v757_v53 = vpop.f32.mrb[4].mxu0 }
 0x523   :  { %v758_v54 = vadd.f32 %v2476_v52, %v757_v53  ;;  %v2821_v55 = vpop.f32.mrb[5].mxu0 }
 0x524   :  { %v760_v56 = vpop.f32.mrb[6].mxu0 }
 0x525   :  { %v764_v57 = vmul.f32 0.044715, %v758_v54  ;;  %v2822_v58 = vpop.f32.mrb[7].mxu0  ;;  %v763_v1 = vmul.f32 0.5, %v758_v54 }
 0x527   :  { %v765_v59 = vmul.f32 %v764_v57, %v758_v54 }
 0x529   :  { %v766_v60 = vmul.f32 %v765_v59, %v758_v54 }
 0x52b   :  { %v767_v61 = vadd.f32 %v766_v60, %v758_v54 }
 0x52d   :  { %v768_v62 = vmul.f32 0.7978846, %v767_v61 }
 0x52f   :  { %3120 = vtanh.f32 %v768_v62 }
 0x539   :  { %v3121_v0 = vpop.eup %3120 }
 0x53a   :  { %v770_v2 = vadd.f32 1.0, %v3121_v0 }
 0x53c   :  { %v771_v3 = vmul.f32 %v770_v2, %v763_v1 }
 0x53e   :  { %v772_v5 = vpack.c.bf16 %v771_v3, %v771_v3 }
 0x540   :  { %2840 = vmatmul.mubr.bf16.vlgmr.msra.gmra.mrb[4].mxu1 %v772_v5 }
 0x541   :  { %2879 = vmatprep.mubr.msk.bf16.mxu1 %vm3466_vm4, %v3465_v4 }
 0x613   :  { %v880_v9 = vpop.f32.mrb[4].mxu1 }
 0x614   :  { %v881_v10 = vadd.f32 %v2485_v8, %v880_v9  ;;  %v2841_v11 = vpop.f32.mrb[5].mxu1 }
 0x615   :  { %v883_v12 = vpop.f32.mrb[6].mxu1  ;;  %v980_v11 = vstv %s2507_s26 }
 0x616   :  { %v3795_v13 = vadd.f32 %v881_v10, %v3749_v63  ;;  %v2842_v14 = vpop.f32.mrb[7].mxu1  ;;  %v969_v10 = vstv %s2504_s10 }
 0x617   :  { %v972_v14 = vstv %s2505_s11 }
 0x618   :  { %v887_v15 = vmul.f32 %v3795_v13, %v3795_v13  ;;  %v889_v16 = vrot.slane %v3795_v13, 2 }
 0x61a   :  { %v891_v17 = vadd.f32 %v889_v16, %v3795_v13  ;;  %v893_v18 = vrot.slane %v887_v15, 2 }
 0x61c   :  { %v895_v20 = vadd.f32 %v893_v18, %v887_v15  ;;  %v896_v21 = vmul.f32 0.5, %v891_v17  ;;  %v983_v15 = vstv %s2508_s0 }
 0x61e   :  { %v897_v22 = vmul.f32 0.5, %v895_v20  ;;  %v898_v23 = vmul.f32 %v896_v21, %v896_v21  ;;  %v911_v63 = vrot.slane %v896_v21, 6  ;;  %v902_v25 = vsub.f32 %v3795_v13, %v896_v21 }
 0x620   :  { %v899_v24 = vsub.f32 %v897_v22, %v898_v23  ;;  %v913_v29 = vsub.f32 %v3795_v13, %v911_v63  ;;  %v976_v22 = vstv %s2506_s6  ;;  %v987_v23 = vstv %s2509_s1  ;;  %s2571_s6 = sld [smem:[#allocation14 + $0x6]]  ;;  %s2573_s1 = sld [smem:[#allocation14 + $0x7]] }
 0x621   :  { %v990_v63 = vrot.slane %v3760_v19, 2 }
 0x622   :  { %v900_v7 = vadd.f32 1e-05, %v899_v24 }
 0x624   :  { %3122 = vrsqrt.f32 %v900_v7 }
 0x62e   :  { %v3123_v26 = vpop.eup %3122 }
 0x62f   :  { %v903_v28 = vmul.f32 %v3123_v26, %v902_v25  ;;  %v915_v30 = vrot.slane %v3123_v26, 6 }
 0x631   :  { %v906_v32 = vmul.f32 %v905_v27, %v903_v28  ;;  %v917_v33 = vmul.f32 %v915_v30, %v913_v29 }
 0x633   :  { %v920_v36 = vmul.f32 %v919_v31, %v917_v33  ;;  %v909_v39 = vadd.f32 %v908_v34, %v906_v32  ;;  %v3037_v34 = vld [vmem:[#allocation7 + $0x88] sm:$0xff]  }
 0x634   :  { %2846 = vmatpush3.bf16.msra.mxu0 %v3037_v34 }
 0x635   :  { %v923_v40 = vadd.f32 %v922_v35, %v920_v36  ;;  %v926_v45 = vmul.f32 %v925_v41, %v909_v39  ;;  %v948_v47 = vmul.f32 %v947_v42, %v909_v39  ;;  %2847 = vmatprep.subr.bf16.mxu0 %v3465_v4  ;;  %v3038_v35 = vld [vmem:[#allocation7 + $0x90] sm:$0xff]   ;;  %v3040_v36 = vld [vmem:[#allocation7 + $0xa0] sm:$0xff]   ;;  %v3043_v39 = vld [vmem:[#allocation7 + $0xb8] sm:$0xff]  }
 0x637   :  { %v929_v43 = vmul.f32 %v928_v37, %v923_v40  ;;  %v951_v44 = vmul.f32 %v950_v38, %v923_v40  ;;  %v3041_v37 = vld [vmem:[#allocation7 + $0xa8] sm:$0xff]   ;;  %v3042_v38 = vld [vmem:[#allocation7 + $0xb0] sm:$0xff]  }
 0x638   :  { %2848 = vmatpush3.bf16.msra.mxu0 %v3038_v35  ;;  %v3044_v40 = vld [vmem:[#allocation10 + $0x80] sm:$0xff]  }
 0x639   :  { %v931_v46 = vrot.slane %v929_v43, 2  ;;  %v953_v48 = vrot.slane %v951_v44, 2  ;;  %2849 = vmatprep.subr.bf16.mxu0 %v3465_v4  ;;  %2864 = vmatpush3.bf16.msra.mxu1 %v3044_v40 }
 0x63a   :  { %2865 = vmatprep.subr.bf16.mxu1 %v3465_v4 }
 0x63b   :  { %v933_v51 = vadd.f32 %v931_v46, %v926_v45  ;;  %v955_v52 = vadd.f32 %v953_v48, %v948_v47 }
 0x63d   :  { %v936_v53 = vadd.f32 %v935_v49, %v933_v51  ;;  %v958_v54 = vadd.f32 %v957_v50, %v955_v52  ;;  %v2512_v50 = vld [vmem:[%s4013_s30 + $0x2] ss:$0 sm:$0xff] }
 0x63e   :  { %v2513_v52 = vld [vmem:[%s4014_s3 + $0x2] ss:$0 sm:$0xff] }
 0x63f   :  { %v938_v55 = vmul.f32 0.044715, %v936_v53  ;;  %v960_v56 = vmul.f32 0.044715, %v958_v54  ;;  %v937_v5 = vmul.f32 0.5, %v936_v53  ;;  %v959_v8 = vmul.f32 0.5, %v958_v54 }
 0x641   :  { %v939_v57 = vmul.f32 %v938_v55, %v936_v53  ;;  %v961_v58 = vmul.f32 %v960_v56, %v958_v54  ;;  %v3045_v56 = vld [vmem:[#allocation10 + $0x88] sm:$0xff]  }
 0x642   :  { %2866 = vmatpush3.bf16.msra.mxu1 %v3045_v56 }
 0x643   :  { %v940_v59 = vmul.f32 %v939_v57, %v936_v53  ;;  %v962_v60 = vmul.f32 %v961_v58, %v958_v54  ;;  %2867 = vmatprep.subr.bf16.mxu1 %v3465_v4  ;;  %v3046_v57 = vld [vmem:[#allocation10 + $0x90] sm:$0xff]   ;;  %v3047_v58 = vld [vmem:[#allocation10 + $0x98] sm:$0xff]  }
 0x645   :  { %v941_v61 = vadd.f32 %v940_v59, %v936_v53  ;;  %v963_v62 = vadd.f32 %v962_v60, %v958_v54  ;;  %v3048_v59 = vld [vmem:[#allocation10 + $0xa0] sm:$0xff]   ;;  %v3049_v60 = vld [vmem:[#allocation10 + $0xa8] sm:$0xff]  }
 0x646   :  { %2868 = vmatpush3.bf16.msra.mxu1 %v3046_v57 }
 0x647   :  { %v942_v0 = vmul.f32 0.7978846, %v941_v61  ;;  %v964_v1 = vmul.f32 0.7978846, %v963_v62  ;;  %2869 = vmatprep.subr.bf16.mxu1 %v3465_v4  ;;  %v3050_v61 = vld [vmem:[#allocation10 + $0xb0] sm:$0xff]   ;;  %v3051_v62 = vld [vmem:[#allocation10 + $0xb8] sm:$0xff]  }
 0x649   :  { %3124 = vtanh.f32 %v942_v0  ;;  %v2514_v0 = vld [vmem:[#allocation9 + $0x2] ss:$0 sm:$0xff] }
 0x64a   :  { %3126 = vtanh.f32 %v964_v1  ;;  %2870 = vmatpush3.bf16.msra.mxu1 %v3047_v58 }
 0x64b   :  { %2871 = vmatprep.subr.bf16.mxu1 %v3465_v4 }
 0x64e   :  { %2872 = vmatpush3.bf16.msra.mxu1 %v3048_v59 }
 0x64f   :  { %2873 = vmatprep.subr.bf16.mxu1 %v3465_v4 }
 0x652   :  { %2874 = vmatpush3.bf16.msra.mxu1 %v3049_v60  ;;  %v1316_v60 = vstv %s2538_s17 }
 0x653   :  { %v3125_v2 = vpop.eup %3124  ;;  %2875 = vmatprep.subr.bf16.mxu1 %v3465_v4 }
 0x654   :  { %v3127_v3 = vpop.eup %3126  ;;  %v944_v6 = vadd.f32 1.0, %v3125_v2 }
 0x655   :  { %v966_v9 = vadd.f32 1.0, %v3127_v3 }
 0x656   :  { %v945_v12 = vmul.f32 %v944_v6, %v937_v5  ;;  %2876 = vmatpush3.bf16.msra.mxu1 %v3050_v61  ;;  %v1338_v61 = vstv %s2541_s29 }
 0x657   :  { %v967_v16 = vmul.f32 %v966_v9, %v959_v8  ;;  %2877 = vmatprep.subr.bf16.mxu1 %v3465_v4 }
 0x658   :  { %v970_v17 = vmul.f32 %v969_v10, %v945_v12  ;;  %v981_v18 = vmul.f32 %v980_v11, %v945_v12 }
 0x659   :  { %v973_v20 = vmul.f32 %v972_v14, %v967_v16  ;;  %v984_v21 = vmul.f32 %v983_v15, %v967_v16 }
 0x65a   :  { %2878 = vmatpush3.bf16.msra.mxu1 %v3051_v62 }
 0x65b   :  { %v974_v24 = vadd.f32 %v973_v20, %v970_v17  ;;  %v985_v7 = vadd.f32 %v984_v21, %v981_v18  ;;  %2903 = vmatprep.subr.bf16.mxu1 %v3465_v4  ;;  %v3052_v20 = vld [vmem:[#allocation7 + $0xc0] sm:$0xff]  }
 0x65c   :  { %v2523_v21 = vld [vmem:[#allocation12 + $0x2] ss:$0 sm:$0xff] }
 0x65d   :  { %v977_v25 = vadd.f32 %v976_v22, %v974_v24  ;;  %v988_v26 = vadd.f32 %v987_v23, %v985_v7 }
 0x65f   :  { %v992_v27 = vadd.f32 %v990_v63, %v988_v26  ;;  %v978_v28 = vadd.f32 %v977_v25, %v3760_v19  ;;  %v3039_v19 = vld [vmem:[#allocation7 + $0x98] sm:$0xff]  }
 0x660   :  { %2850 = vmatpush3.bf16.msra.mxu0 %v3039_v19 }
 0x661   :  { %v994_v29 = vrot.slane %v992_v27, 6  ;;  %2851 = vmatprep.subr.bf16.mxu0 %v3465_v4 }
 0x663   :  { %v3806_v30 = vsel %vm236_vm1, %v978_v28, %v994_v29 }
 0x664   :  { %v1001_v31 = vsel %vm242_vm3, %v3806_v30, 0.0  ;;  %v1004_v32 = vmul.f32 %v3806_v30, %v3806_v30  ;;  %2852 = vmatpush3.bf16.msra.mxu0 %v3040_v36 }
 0x665   :  { %1002 = vadd.xlane.f32.xlu0 %v1001_v31  ;;  %2853 = vmatprep.subr.bf16.mxu0 %v3465_v4 }
 0x666   :  { %v1005_v33 = vsel %vm242_vm3, %v1004_v32, 0.0 }
 0x667   :  { %1006 = vadd.xlane.f32.xlu1 %v1005_v33 }
 0x668   :  { %2854 = vmatpush3.bf16.msra.mxu0 %v3041_v37 }
 0x669   :  { %2855 = vmatprep.subr.bf16.mxu0 %v3465_v4 }
 0x66c   :  { %2856 = vmatpush3.bf16.msra.mxu0 %v3042_v38  ;;  %v1286_v38 = vstv %s2532_s28  ;;  %s2576_s28 = sld [smem:[#allocation17 + $0x6]] }
 0x66d   :  { %2857 = vmatprep.subr.bf16.mxu0 %v3465_v4 }
 0x670   :  { %2858 = vmatpush3.bf16.msra.mxu0 %v3043_v39 }
 0x671   :  { %2883 = vmatprep.subr.bf16.mxu0 %v3465_v4 }
 0x6f2   :  { %v1003_v41 = vpop.xlane.xlu0 %1002 }
 0x6f3   :  { %v1008_v42 = vmul.f32 0.0078125, %v1003_v41 }
 0x6f4   :  { %v1007_v43 = vpop.xlane.xlu1 %1006 }
 0x6f5   :  { %v1010_v44 = vmul.f32 %v1008_v42, %v1008_v42  ;;  %v1009_v45 = vmul.f32 0.0078125, %v1007_v43  ;;  %v1012_v48 = vsub.f32 %v3806_v30, %v1008_v42  ;;  %v1300_v42 = vstv %s2534_s9  ;;  %s2579_s9 = sld [smem:[#allocation17 + $0x7]] }
 0x6f7   :  { %v1011_v46 = vsub.f32 %v1009_v45, %v1010_v44  ;;  %v1289_v45 = vstv %s2533_s4  ;;  %s2580_s4 = sld [smem:[#allocation18 + $0xc]] }
 0x6f9   :  { %v1013_v47 = vadd.f32 1e-05, %v1011_v46  ;;  %v1303_v46 = vstv %s2535_s22  ;;  %s2583_s22 = sld [smem:[#allocation18 + $0xe]] }
 0x6fb   :  { %3128 = vrsqrt.f32 %v1013_v47 }
 0x705   :  { %v3129_v49 = vpop.eup %3128 }
 0x706   :  { %v1015_v51 = vmul.f32 %v3129_v49, %v1012_v48  ;;  %v1309_v48 = vstv %s2537_s8  ;;  %v1331_v49 = vstv %s2540_s2  ;;  %s2581_s8 = sld [smem:[#allocation18 + $0xd]]  ;;  %s2584_s2 = sld [smem:[#allocation18 + $0xf]] }
 0x708   :  { %v1022_v53 = vmul.f32 %v2512_v50, %v1015_v51 }
 0x70a   :  { %v1029_v54 = vadd.f32 %v2513_v52, %v1022_v53  ;;  %v1306_v52 = vstv %s2536_s12  ;;  %v1328_v53 = vstv %s2539_s18  ;;  %s2582_s12 = sld [smem:[#allocation20 + $0x6]]  ;;  %s2585_s18 = sld [smem:[#allocation20 + $0x7]] }
 0x70c   :  { %v1030_v55 = vpack.c.bf16 %v1029_v54, %v1029_v54 }
 0x70e   :  { %2860 = vmatmul.mubr.bf16.vlgmr.msra.gmra.mrb[8].mxu0 %v1030_v55 }
 0x70f   :  { %2899 = vmatprep.mubr.msk.bf16.mxu0 %vm3466_vm4, %v3465_v4  ;;  %2884 = vmatpush3.bf16.msra.mxu0 %v3052_v20 }
 0x710   :  { %2885 = vmatprep.subr.bf16.mxu0 %v3465_v4 }
 0x7e1   :  { %v1138_v1 = vpop.f32.mrb[8].mxu0 }
 0x7e2   :  { %v1139_v2 = vadd.f32 %v2514_v0, %v1138_v1  ;;  %v2861_v3 = vpop.f32.mrb[9].mxu0 }
 0x7e3   :  { %v1141_v5 = vpop.f32.mrb[10].mxu0 }
 0x7e4   :  { %v1145_v6 = vmul.f32 0.044715, %v1139_v2  ;;  %v2862_v8 = vpop.f32.mrb[11].mxu0  ;;  %v1144_v15 = vmul.f32 0.5, %v1139_v2 }
 0x7e6   :  { %v1146_v9 = vmul.f32 %v1145_v6, %v1139_v2 }
 0x7e8   :  { %v1147_v10 = vmul.f32 %v1146_v9, %v1139_v2 }
 0x7ea   :  { %v1148_v11 = vadd.f32 %v1147_v10, %v1139_v2 }
 0x7ec   :  { %v1149_v12 = vmul.f32 0.7978846, %v1148_v11 }
 0x7ee   :  { %3130 = vtanh.f32 %v1149_v12 }
 0x7f8   :  { %v3131_v14 = vpop.eup %3130 }
 0x7f9   :  { %v1151_v16 = vadd.f32 1.0, %v3131_v14 }
 0x7fb   :  { %v1152_v17 = vmul.f32 %v1151_v16, %v1144_v15 }
 0x7fd   :  { %v1153_v18 = vpack.c.bf16 %v1152_v17, %v1152_v17 }
 0x7ff   :  { %2880 = vmatmul.mubr.bf16.vlgmr.msra.gmra.mrb[8].mxu1 %v1153_v18 }
 0x800   :  { %2919 = vmatprep.mubr.msk.bf16.mxu1 %vm3466_vm4, %v3465_v4 }
 0x8d2   :  { %v1261_v22 = vpop.f32.mrb[8].mxu1 }
 0x8d3   :  { %v1262_v23 = vadd.f32 %v2523_v21, %v1261_v22  ;;  %v2881_v24 = vpop.f32.mrb[9].mxu1 }
 0x8d4   :  { %v1264_v7 = vpop.f32.mrb[10].mxu1  ;;  %v1361_v24 = vstv %s2545_s7 }
 0x8d5   :  { %v3841_v63 = vadd.f32 %v1262_v23, %v3795_v13  ;;  %v2882_v25 = vpop.f32.mrb[11].mxu1  ;;  %v1350_v23 = vstv %s2542_s5 }
 0x8d6   :  { %v1353_v25 = vstv %s2543_s19 }
 0x8d7   :  { %v1268_v26 = vmul.f32 %v3841_v63, %v3841_v63  ;;  %v1270_v27 = vrot.slane %v3841_v63, 2 }
 0x8d9   :  { %v1272_v28 = vadd.f32 %v1270_v27, %v3841_v63  ;;  %v1274_v29 = vrot.slane %v1268_v26, 2 }
 0x8db   :  { %v1276_v31 = vadd.f32 %v1274_v29, %v1268_v26  ;;  %v1277_v32 = vmul.f32 0.5, %v1272_v28  ;;  %v1364_v26 = vstv %s2546_s21 }
 0x8dd   :  { %v1278_v33 = vmul.f32 0.5, %v1276_v31  ;;  %v1279_v34 = vmul.f32 %v1277_v32, %v1277_v32  ;;  %v1292_v13 = vrot.slane %v1277_v32, 6  ;;  %v1283_v36 = vsub.f32 %v3841_v63, %v1277_v32 }
 0x8df   :  { %v1280_v35 = vsub.f32 %v1278_v33, %v1279_v34  ;;  %v1294_v40 = vsub.f32 %v3841_v63, %v1292_v13  ;;  %v1357_v33 = vstv %s2544_s24  ;;  %v1368_v34 = vstv %s2547_s25  ;;  %s4015_s25 = sld [smem:[#allocation44_spill]] }
 0x8e0   :  { %v1371_v13 = vrot.slane %v3806_v30, 2 }
 0x8e1   :  { %v1281_v19 = vadd.f32 1e-05, %v1280_v35 }
 0x8e3   :  { %3132 = vrsqrt.f32 %v1281_v19 }
 0x8ed   :  { %v3133_v37 = vpop.eup %3132 }
 0x8ee   :  { %v1284_v39 = vmul.f32 %v3133_v37, %v1283_v36  ;;  %v1296_v41 = vrot.slane %v3133_v37, 6 }
 0x8f0   :  { %v1287_v43 = vmul.f32 %v1286_v38, %v1284_v39  ;;  %v1298_v44 = vmul.f32 %v1296_v41, %v1294_v40 }
 0x8f2   :  { %v1301_v47 = vmul.f32 %v1300_v42, %v1298_v44  ;;  %v1290_v50 = vadd.f32 %v1289_v45, %v1287_v43  ;;  %v3053_v45 = vld [vmem:[#allocation7 + $0xc8] sm:$0xff]  }
 0x8f3   :  { %2886 = vmatpush3.bf16.msra.mxu0 %v3053_v45  ;;  %v3083_v45 = vld [vmem:[#allocation22 + $0x38] sm:$0xff]  }
 0x8f4   :  { %v1304_v51 = vadd.f32 %v1303_v46, %v1301_v47  ;;  %v1307_v56 = vmul.f32 %v1306_v52, %v1290_v50  ;;  %v1329_v58 = vmul.f32 %v1328_v53, %v1290_v50  ;;  %2887 = vmatprep.subr.bf16.mxu0 %v3465_v4  ;;  %v3054_v46 = vld [vmem:[#allocation7 + $0xd0] sm:$0xff]   ;;  %v3056_v47 = vld [vmem:[#allocation7 + $0xe0] sm:$0xff]   ;;  %v3059_v50 = vld [vmem:[#allocation7 + $0xf8] sm:$0xff]  }
 0x8f6   :  { %v1310_v54 = vmul.f32 %v1309_v48, %v1304_v51  ;;  %v1332_v55 = vmul.f32 %v1331_v49, %v1304_v51  ;;  %v3057_v48 = vld [vmem:[#allocation7 + $0xe8] sm:$0xff]   ;;  %v3058_v49 = vld [vmem:[#allocation7 + $0xf0] sm:$0xff]  }
 0x8f7   :  { %2888 = vmatpush3.bf16.msra.mxu0 %v3054_v46  ;;  %v3060_v51 = vld [vmem:[#allocation10 + $0xc0] sm:$0xff]  }
 0x8f8   :  { %v1312_v57 = vrot.slane %v1310_v54, 2  ;;  %v1334_v59 = vrot.slane %v1332_v55, 2  ;;  %2889 = vmatprep.subr.bf16.mxu0 %v3465_v4  ;;  %2904 = vmatpush3.bf16.msra.mxu1 %v3060_v51  ;;  %v2561_v46 = vld [vmem:[#allocation12 + $0x3] ss:$0 sm:$0xff] }
 0x8f9   :  { %2905 = vmatprep.subr.bf16.mxu1 %v3465_v4 }
 0x8fa   :  { %v1314_v62 = vadd.f32 %v1312_v57, %v1307_v56  ;;  %v1336_v0 = vadd.f32 %v1334_v59, %v1329_v58 }
 0x8fc   :  { %v1317_v1 = vadd.f32 %v1316_v60, %v1314_v62  ;;  %v1339_v2 = vadd.f32 %v1338_v61, %v1336_v0  ;;  %v2550_v61 = vld [vmem:[%s4013_s30 + $0x3] ss:$0 sm:$0xff]  ;;  %s2570_s30 = sld [smem:[#allocation13 + $0x6]] }
 0x8fd   :  { %v2551_v0 = vld [vmem:[%s4014_s3 + $0x3] ss:$0 sm:$0xff]  ;;  %s2572_s3 = sld [smem:[#allocation13 + $0x7]] }
 0x8fe   :  { %v1319_v3 = vmul.f32 0.044715, %v1317_v1  ;;  %v1341_v5 = vmul.f32 0.044715, %v1339_v2  ;;  %v1318_v18 = vmul.f32 0.5, %v1317_v1  ;;  %v1340_v21 = vmul.f32 0.5, %v1339_v2 }
 0x900   :  { %v1320_v6 = vmul.f32 %v1319_v3, %v1317_v1  ;;  %v1342_v8 = vmul.f32 %v1341_v5, %v1339_v2  ;;  %v3061_v5 = vld [vmem:[#allocation10 + $0xc8] sm:$0xff]  }
 0x901   :  { %2906 = vmatpush3.bf16.msra.mxu1 %v3061_v5 }
 0x902   :  { %v1321_v9 = vmul.f32 %v1320_v6, %v1317_v1  ;;  %v1343_v10 = vmul.f32 %v1342_v8, %v1339_v2  ;;  %2907 = vmatprep.subr.bf16.mxu1 %v3465_v4  ;;  %v3062_v6 = vld [vmem:[#allocation10 + $0xd0] sm:$0xff]   ;;  %v3063_v8 = vld [vmem:[#allocation10 + $0xd8] sm:$0xff]  }
 0x904   :  { %v1322_v11 = vadd.f32 %v1321_v9, %v1317_v1  ;;  %v1344_v12 = vadd.f32 %v1343_v10, %v1339_v2  ;;  %v3064_v9 = vld [vmem:[#allocation10 + $0xe0] sm:$0xff]   ;;  %v3065_v10 = vld [vmem:[#allocation10 + $0xe8] sm:$0xff]  }
 0x905   :  { %2908 = vmatpush3.bf16.msra.mxu1 %v3062_v6  ;;  %v1681_v6 = vstv %s2572_s3 }
 0x906   :  { %v1323_v14 = vmul.f32 0.7978846, %v1322_v11  ;;  %v1345_v15 = vmul.f32 0.7978846, %v1344_v12  ;;  %2909 = vmatprep.subr.bf16.mxu1 %v3465_v4  ;;  %v3066_v11 = vld [vmem:[#allocation10 + $0xf0] sm:$0xff]   ;;  %v3067_v12 = vld [vmem:[#allocation10 + $0xf8] sm:$0xff]  }
 0x908   :  { %3134 = vtanh.f32 %v1323_v14  ;;  %v2552_v14 = vld [vmem:[#allocation9 + $0x3] ss:$0 sm:$0xff] }
 0x909   :  { %3136 = vtanh.f32 %v1345_v15  ;;  %2910 = vmatpush3.bf16.msra.mxu1 %v3063_v8 }
 0x90a   :  { %2911 = vmatprep.subr.bf16.mxu1 %v3465_v4 }
 0x90d   :  { %2912 = vmatpush3.bf16.msra.mxu1 %v3064_v9 }
 0x90e   :  { %2913 = vmatprep.subr.bf16.mxu1 %v3465_v4 }
 0x911   :  { %2914 = vmatpush3.bf16.msra.mxu1 %v3065_v10  ;;  %v1670_v10 = vstv %s2571_s6 }
 0x912   :  { %v3135_v16 = vpop.eup %3134  ;;  %2915 = vmatprep.subr.bf16.mxu1 %v3465_v4 }
 0x913   :  { %v3137_v17 = vpop.eup %3136  ;;  %v1325_v20 = vadd.f32 1.0, %v3135_v16 }
 0x914   :  { %v1347_v22 = vadd.f32 1.0, %v3137_v17 }
 0x915   :  { %v1326_v7 = vmul.f32 %v1325_v20, %v1318_v18  ;;  %2916 = vmatpush3.bf16.msra.mxu1 %v3066_v11  ;;  %v1684_v11 = vstv %s2573_s1 }
 0x916   :  { %v1348_v27 = vmul.f32 %v1347_v22, %v1340_v21  ;;  %2917 = vmatprep.subr.bf16.mxu1 %v3465_v4 }
 0x917   :  { %v1351_v28 = vmul.f32 %v1350_v23, %v1326_v7  ;;  %v1362_v29 = vmul.f32 %v1361_v24, %v1326_v7 }
 0x918   :  { %v1354_v31 = vmul.f32 %v1353_v25, %v1348_v27  ;;  %v1365_v32 = vmul.f32 %v1364_v26, %v1348_v27 }
 0x919   :  { %2918 = vmatpush3.bf16.msra.mxu1 %v3067_v12 }
 0x91a   :  { %v1355_v35 = vadd.f32 %v1354_v31, %v1351_v28  ;;  %v1366_v19 = vadd.f32 %v1365_v32, %v1362_v29  ;;  %2923 = vmatprep.subr.bf16.mxu1 %v3465_v4  ;;  %v3068_v31 = vld [vmem:[#allocation22 + $0x40] sm:$0xff]  }
 0x91b   :  { %v3069_v32 = vld [vmem:[#allocation22] sm:$0xff]  }
 0x91c   :  { %v1358_v36 = vadd.f32 %v1357_v33, %v1355_v35  ;;  %v1369_v37 = vadd.f32 %v1368_v34, %v1366_v19  ;;  %v3070_v33 = vld [vmem:[#allocation22 + $0x48] sm:$0xff]   ;;  %v3072_v35 = vld [vmem:[#allocation22 + $0x50] sm:$0xff]  }
 0x91d   :  { %v3071_v34 = vld [vmem:[#allocation22 + $0x8] sm:$0xff]   ;;  %v3073_v19 = vld [vmem:[#allocation22 + $0x10] sm:$0xff]  }
 0x91e   :  { %v1373_v38 = vadd.f32 %v1371_v13, %v1369_v37  ;;  %v1359_v39 = vadd.f32 %v1358_v36, %v3806_v30  ;;  %v3055_v30 = vld [vmem:[#allocation7 + $0xd8] sm:$0xff]   ;;  %v3074_v13 = vld [vmem:[#allocation22 + $0x58] sm:$0xff]   ;;  %v3076_v37 = vld [vmem:[#allocation22 + $0x60] sm:$0xff]  }
 0x91f   :  { %2890 = vmatpush3.bf16.msra.mxu0 %v3055_v30  ;;  %v3075_v36 = vld [vmem:[#allocation22 + $0x18] sm:$0xff]  }
 0x920   :  { %v1375_v40 = vrot.slane %v1373_v38, 6  ;;  %2891 = vmatprep.subr.bf16.mxu0 %v3465_v4  ;;  %v3077_v38 = vld [vmem:[#allocation22 + $0x20] sm:$0xff]  }
 0x922   :  { %v3852_v41 = vsel %vm236_vm1, %v1359_v39, %v1375_v40  ;;  %v3078_v39 = vld [vmem:[#allocation22 + $0x68] sm:$0xff]  }
 0x923   :  { %v1382_v42 = vsel %vm242_vm3, %v3852_v41, 0.0  ;;  %v1385_v43 = vmul.f32 %v3852_v41, %v3852_v41  ;;  %2892 = vmatpush3.bf16.msra.mxu0 %v3056_v47  ;;  %v3079_v40 = vld [vmem:[#allocation22 + $0x28] sm:$0xff]  }
 0x924   :  { %1383 = vadd.xlane.f32.xlu0 %v1382_v42  ;;  %2893 = vmatprep.subr.bf16.mxu0 %v3465_v4  ;;  %v3080_v42 = vld [vmem:[#allocation22 + $0x70] sm:$0xff]  }
 0x925   :  { %v1386_v44 = vsel %vm242_vm3, %v1385_v43, 0.0  ;;  %v3081_v43 = vld [vmem:[#allocation22 + $0x30] sm:$0xff]  }
 0x926   :  { %1387 = vadd.xlane.f32.xlu1 %v1386_v44  ;;  %v3082_v44 = vld [vmem:[#allocation22 + $0x78] sm:$0xff]  }
 0x927   :  { %2894 = vmatpush3.bf16.msra.mxu0 %v3057_v48 }
 0x928   :  { %2895 = vmatprep.subr.bf16.mxu0 %v3465_v4 }
 0x92b   :  { %2896 = vmatpush3.bf16.msra.mxu0 %v3058_v49 }
 0x92c   :  { %2897 = vmatprep.subr.bf16.mxu0 %v3465_v4 }
 0x92f   :  { %2898 = vmatpush3.bf16.msra.mxu0 %v3059_v50 }
 0x930   :  { %2714 = vmatprep.subr.bf16.mxu0 %v3068_v31 }
 0x9b1   :  { %v1384_v52 = vpop.xlane.xlu0 %1383 }
 0x9b2   :  { %v1389_v53 = vmul.f32 0.0078125, %v1384_v52 }
 0x9b3   :  { %v1388_v54 = vpop.xlane.xlu1 %1387 }
 0x9b4   :  { %v1391_v55 = vmul.f32 %v1389_v53, %v1389_v53  ;;  %v1390_v56 = vmul.f32 0.0078125, %v1388_v54  ;;  %v1393_v59 = vsub.f32 %v3852_v41, %v1389_v53 }
 0x9b6   :  { %v1392_v57 = vsub.f32 %v1390_v56, %v1391_v55 }
 0x9b8   :  { %v1394_v58 = vadd.f32 1e-05, %v1392_v57 }
 0x9ba   :  { %3138 = vrsqrt.f32 %v1394_v58 }
 0x9c4   :  { %v3139_v60 = vpop.eup %3138 }
 0x9c5   :  { %v1396_v62 = vmul.f32 %v3139_v60, %v1393_v59 }
 0x9c7   :  { %v1403_v1 = vmul.f32 %v2550_v61, %v1396_v62 }
 0x9c9   :  { %v1410_v2 = vadd.f32 %v2551_v0, %v1403_v1  ;;  %v1667_v1 = vstv %s2570_s30 }
 0x9cb   :  { %v1411_v3 = vpack.c.bf16 %v1410_v2, %v1410_v2 }
 0x9cd   :  { %2900 = vmatmul.mubr.bf16.vlgmr.msra.gmra.mrb[12].mxu0 %v1411_v3 }
 0x9ce   :  { %2715 = vmatpush3.bf16.msra.mxu0 %v3069_v32 }
 0x9cf   :  { %2716 = vmatprep.subr.bf16.mxu0 %v3070_v33 }
 0x9d2   :  { %2717 = vmatpush3.bf16.msra.mxu0 %v3071_v34 }
 0x9d3   :  { %2718 = vmatprep.subr.bf16.mxu0 %v3072_v35 }
 0x9d6   :  { %2719 = vmatpush3.bf16.msra.mxu0 %v3073_v19 }
 0x9d7   :  { %2720 = vmatprep.subr.bf16.mxu0 %v3074_v13 }
 0x9da   :  { %2721 = vmatpush3.bf16.msra.mxu0 %v3075_v36 }
 0x9db   :  { %2722 = vmatprep.subr.bf16.mxu0 %v3076_v37 }
 0x9de   :  { %2723 = vmatpush3.bf16.msra.mxu0 %v3077_v38 }
 0x9df   :  { %2724 = vmatprep.subr.bf16.mxu0 %v3078_v39 }
 0x9e2   :  { %2725 = vmatpush3.bf16.msra.mxu0 %v3079_v40 }
 0x9e3   :  { %2726 = vmatprep.subr.bf16.mxu0 %v3080_v42 }
 0x9e6   :  { %2727 = vmatpush3.bf16.msra.mxu0 %v3081_v43 }
 0x9e7   :  { %2728 = vmatprep.subr.bf16.mxu0 %v3082_v44 }
 0x9ea   :  { %2729 = vmatpush3.bf16.msra.mxu0 %v3083_v45 }
 0x9eb   :  { %2943 = vmatprep.subr.bf16.mxu0 %v3465_v4 }
 0xaa0   :  { %v1519_v15 = vpop.f32.mrb[12].mxu0 }
 0xaa1   :  { %v1520_v16 = vadd.f32 %v2552_v14, %v1519_v15  ;;  %v2901_v17 = vpop.f32.mrb[13].mxu0  ;;  %v1690_v14 = vstv %s2575_s20  ;;  %v1712_v15 = vstv %s2578_s27 }
 0xaa2   :  { %v1522_v18 = vpop.f32.mrb[14].mxu0 }
 0xaa3   :  { %v1526_v20 = vmul.f32 0.044715, %v1520_v16  ;;  %v2902_v21 = vpop.f32.mrb[15].mxu0  ;;  %v1525_v26 = vmul.f32 0.5, %v1520_v16  ;;  %v1687_v18 = vstv %s2574_s23 }
 0xaa5   :  { %v1527_v22 = vmul.f32 %v1526_v20, %v1520_v16  ;;  %v1709_v20 = vstv %s2577_s13 }
 0xaa7   :  { %v1528_v23 = vmul.f32 %v1527_v22, %v1520_v16 }
 0xaa9   :  { %v1529_v24 = vadd.f32 %v1528_v23, %v1520_v16 }
 0xaab   :  { %v1530_v7 = vmul.f32 0.7978846, %v1529_v24 }
 0xaad   :  { %3140 = vtanh.f32 %v1530_v7 }
 0xab7   :  { %v3141_v25 = vpop.eup %3140 }
 0xab8   :  { %v1532_v27 = vadd.f32 1.0, %v3141_v25 }
 0xaba   :  { %v1533_v28 = vmul.f32 %v1532_v27, %v1525_v26  ;;  %v1697_v26 = vstv %s2576_s28  ;;  %v1719_v27 = vstv %s2579_s9 }
 0xabc   :  { %v1534_v29 = vpack.c.bf16 %v1533_v28, %v1533_v28 }
 0xabe   :  { %2920 = vmatmul.mubr.bf16.vlgmr.msra.gmra.mrb[12].mxu1 %v1534_v29 }
 0xabf   :  { %2939 = vmatprep.mubr.msk.bf16.mxu1 %vm3466_vm4, %v3465_v4 }
 0xb91   :  { %v1642_v30 = vpop.f32.mrb[12].mxu1 }
 0xb92   :  { %v1643_v47 = vadd.f32 %v2561_v46, %v1642_v30  ;;  %v2921_v48 = vpop.f32.mrb[13].mxu1 }
 0xb93   :  { %v1645_v49 = vpop.f32.mrb[14].mxu1  ;;  %v1742_v48 = vstv %s2583_s22 }
 0xb94   :  { %v1648_v50 = vadd.f32 %v1643_v47, %v3841_v63  ;;  %v2922_v51 = vpop.f32.mrb[15].mxu1  ;;  %v1731_v47 = vstv %s2580_s4 }
 0xb95   :  { %v1745_v51 = vstv %s2584_s2 }
 0xb96   :  { %v1649_v52 = vmul.f32 %v1648_v50, %v1648_v50  ;;  %v1651_v53 = vrot.slane %v1648_v50, 2 }
 0xb98   :  { %v1653_v54 = vadd.f32 %v1651_v53, %v1648_v50  ;;  %v1655_v55 = vrot.slane %v1649_v52, 2 }
 0xb9a   :  { %v1657_v56 = vadd.f32 %v1655_v55, %v1649_v52  ;;  %v1658_v57 = vmul.f32 0.5, %v1653_v54 }
 0xb9c   :  { %v1659_v58 = vmul.f32 0.5, %v1657_v56  ;;  %v1660_v59 = vmul.f32 %v1658_v57, %v1658_v57  ;;  %v1673_v62 = vrot.slane %v1658_v57, 6  ;;  %v1664_v63 = vsub.f32 %v1648_v50, %v1658_v57 }
 0xb9d   :  { %v1738_v57 = vstv %s2582_s12 }
 0xb9e   :  { %v1661_v60 = vsub.f32 %v1659_v58, %v1660_v59  ;;  %v1675_v3 = vsub.f32 %v1648_v50, %v1673_v62  ;;  %v1734_v50 = vstv %s2581_s8  ;;  %v1749_v58 = vstv %s2585_s18 }
 0xba0   :  { %v1662_v61 = vadd.f32 1e-05, %v1661_v60 }
 0xba2   :  { %3142 = vrsqrt.f32 %v1662_v61 }
 0xbac   :  { %v3143_v0 = vpop.eup %3142 }
 0xbad   :  { %v1665_v2 = vmul.f32 %v3143_v0, %v1664_v63  ;;  %v1677_v5 = vrot.slane %v3143_v0, 6  ;;  %v1752_v63 = vrot.slane %v3852_v41, 2 }
 0xbaf   :  { %v1668_v8 = vmul.f32 %v1667_v1, %v1665_v2  ;;  %v1679_v9 = vmul.f32 %v1677_v5, %v1675_v3 }
 0xbb1   :  { %v1682_v12 = vmul.f32 %v1681_v6, %v1679_v9  ;;  %v1671_v16 = vadd.f32 %v1670_v10, %v1668_v8  ;;  %v2586_v10 = vld [vmem:[%s3987_s14] ss:$0 sm:$0xff] }
 0xbb3   :  { %v1685_v17 = vadd.f32 %v1684_v11, %v1682_v12  ;;  %v1688_v23 = vmul.f32 %v1687_v18, %v1671_v16  ;;  %v1710_v7 = vmul.f32 %v1709_v20, %v1671_v16  ;;  %v3084_v20 = vld [vmem:[#allocation24] sm:$0xff]  }
 0xbb4   :  { %2924 = vmatpush3.bf16.msra.mxu1 %v3084_v20 }
 0xbb5   :  { %v1691_v21 = vmul.f32 %v1690_v14, %v1685_v17  ;;  %v1713_v22 = vmul.f32 %v1712_v15, %v1685_v17  ;;  %2925 = vmatprep.subr.bf16.mxu1 %v3465_v4 }
 0xbb7   :  { %v1693_v24 = vrot.slane %v1691_v21, 2  ;;  %v1715_v25 = vrot.slane %v1713_v22, 2  ;;  %v3085_v21 = vld [vmem:[#allocation24 + $0x8] sm:$0xff]   ;;  %v3086_v22 = vld [vmem:[#allocation24 + $0x10] sm:$0xff]  }
 0xbb8   :  { %2926 = vmatpush3.bf16.msra.mxu1 %v3085_v21 }
 0xbb9   :  { %v1695_v28 = vadd.f32 %v1693_v24, %v1688_v23  ;;  %v1717_v29 = vadd.f32 %v1715_v25, %v1710_v7  ;;  %2927 = vmatprep.subr.bf16.mxu1 %v3465_v4  ;;  %v3087_v23 = vld [vmem:[#allocation24 + $0x18] sm:$0xff]   ;;  %v3088_v24 = vld [vmem:[#allocation24 + $0x20] sm:$0xff]   ;;  %v3089_v7 = vld [vmem:[#allocation24 + $0x28] sm:$0xff]  }
 0xbba   :  { %v3090_v25 = vld [vmem:[#allocation24 + $0x30] sm:$0xff]  }
 0xbbb   :  { %v1698_v31 = vadd.f32 %v1697_v26, %v1695_v28  ;;  %v1720_v32 = vadd.f32 %v1719_v27, %v1717_v29  ;;  %v3091_v26 = vld [vmem:[#allocation24 + $0x38] sm:$0xff]  }
 0xbbc   :  { %2928 = vmatpush3.bf16.msra.mxu1 %v3086_v22 }
 0xbbd   :  { %v1700_v33 = vmul.f32 0.044715, %v1698_v31  ;;  %v1722_v34 = vmul.f32 0.044715, %v1720_v32  ;;  %v1699_v44 = vmul.f32 0.5, %v1698_v31  ;;  %v1721_v46 = vmul.f32 0.5, %v1720_v32  ;;  %2929 = vmatprep.subr.bf16.mxu1 %v3465_v4 }
 0xbbf   :  { %v1701_v35 = vmul.f32 %v1700_v33, %v1698_v31  ;;  %v1723_v19 = vmul.f32 %v1722_v34, %v1720_v32 }
 0xbc0   :  { %2930 = vmatpush3.bf16.msra.mxu1 %v3087_v23 }
 0xbc1   :  { %v1702_v13 = vmul.f32 %v1701_v35, %v1698_v31  ;;  %v1724_v36 = vmul.f32 %v1723_v19, %v1720_v32  ;;  %2931 = vmatprep.subr.bf16.mxu1 %v3465_v4 }
 0xbc3   :  { %v1703_v37 = vadd.f32 %v1702_v13, %v1698_v31  ;;  %v1725_v38 = vadd.f32 %v1724_v36, %v1720_v32  ;;  %v2603_v13 = vld [vmem:[%s3988_s15] ss:$0 sm:$0xff] }
 0xbc4   :  { %2932 = vmatpush3.bf16.msra.mxu1 %v3088_v24 }
 0xbc5   :  { %v1704_v39 = vmul.f32 0.7978846, %v1703_v37  ;;  %v1726_v40 = vmul.f32 0.7978846, %v1725_v38  ;;  %2933 = vmatprep.subr.bf16.mxu1 %v3465_v4  ;;  %v2604_v37 = vld [vmem:[%s3989_s16] ss:$0 sm:$0xff] }
 0xbc7   :  { %3144 = vtanh.f32 %v1704_v39 }
 0xbc8   :  { %3146 = vtanh.f32 %v1726_v40  ;;  %2934 = vmatpush3.bf16.msra.mxu1 %v3089_v7 }
 0xbc9   :  { %2935 = vmatprep.subr.bf16.mxu1 %v3465_v4 }
 0xbcc   :  { %2936 = vmatpush3.bf16.msra.mxu1 %v3090_v25 }
 0xbcd   :  { %2937 = vmatprep.subr.bf16.mxu1 %v3465_v4 }
 0xbd0   :  { %2938 = vmatpush3.bf16.msra.mxu1 %v3091_v26 }
 0xbd1   :  { %v3145_v42 = vpop.eup %3144  ;;  %2963 = vmatprep.subr.bf16.mxu1 %v3465_v4 }
 0xbd2   :  { %v3147_v43 = vpop.eup %3146  ;;  %v1706_v45 = vadd.f32 1.0, %v3145_v42 }
 0xbd3   :  { %v1728_v30 = vadd.f32 1.0, %v3147_v43 }
 0xbd4   :  { %v1707_v49 = vmul.f32 %v1706_v45, %v1699_v44 }
 0xbd5   :  { %v1729_v52 = vmul.f32 %v1728_v30, %v1721_v46 }
 0xbd6   :  { %v1732_v53 = vmul.f32 %v1731_v47, %v1707_v49  ;;  %v1743_v54 = vmul.f32 %v1742_v48, %v1707_v49 }
 0xbd7   :  { %v1735_v55 = vmul.f32 %v1734_v50, %v1729_v52  ;;  %v1746_v56 = vmul.f32 %v1745_v51, %v1729_v52  ;;  %v2605_v50 = vld [vmem:[%s4015_s25] ss:$0 sm:$0xff] }
 0xbd9   :  { %v1736_v59 = vadd.f32 %v1735_v55, %v1732_v53  ;;  %v1747_v60 = vadd.f32 %v1746_v56, %v1743_v54 }
 0xbdb   :  { %v1739_v61 = vadd.f32 %v1738_v57, %v1736_v59  ;;  %v1750_v62 = vadd.f32 %v1749_v58, %v1747_v60  ;;  %v3092_v59 = vld [vmem:[#allocation24 + $0x40] sm:$0xff]   ;;  %v3093_v60 = vld [vmem:[#allocation24 + $0x48] sm:$0xff]  }
 0xbdd   :  { %v1754_v0 = vadd.f32 %v1752_v63, %v1750_v62  ;;  %v1740_v1 = vadd.f32 %v1739_v61, %v3852_v41  ;;  %v3094_v61 = vld [vmem:[#allocation24 + $0x50] sm:$0xff]   ;;  %v3095_v62 = vld [vmem:[#allocation24 + $0x58] sm:$0xff]   ;;  %v3096_v63 = vld [vmem:[#allocation24 + $0x60] sm:$0xff]  }
 0xbdf   :  { %v1756_v2 = vrot.slane %v1754_v0, 6  ;;  %v3097_v0 = vld [vmem:[#allocation24 + $0x68] sm:$0xff]  }
 0xbe1   :  { %v1758_v3 = vsel %vm236_vm1, %v1740_v1, %v1756_v2  ;;  %v3098_v1 = vld [vmem:[#allocation24 + $0x70] sm:$0xff]   ;;  %v3099_v2 = vld [vmem:[#allocation24 + $0x78] sm:$0xff]  }
 0xbe2   :  { %v1760_v5 = vrot.slane %v1758_v3, 2  ;;  %v1762_v8 = vpack.c.bf16 %v1758_v3, %v1758_v3 }
 0xbe4   :  { %v1763_v6 = vpack.c.bf16 %v1760_v5, %v1760_v5 }
 0xbe6   :  { %1931 = vmatprep.mubr.bf16.mxu0 %v1763_v6 }
 0xbe7   :  { %1932 = vmatmul.mubr.bf16.vlgmr.msra.gmra.mrb[16].mxu0 %v1762_v8 }
 0xbe8   :  { %2959 = vmatprep.mubr.msk.bf16.mxu0 %vm3466_vm4, %v3465_v4  ;;  %2944 = vmatpush3.bf16.msra.mxu0 %v3092_v59 }
 0xbe9   :  { %2945 = vmatprep.subr.bf16.mxu0 %v3465_v4 }
 0xbec   :  { %2946 = vmatpush3.bf16.msra.mxu0 %v3093_v60 }
 0xbed   :  { %2947 = vmatprep.subr.bf16.mxu0 %v3465_v4 }
 0xbf0   :  { %2948 = vmatpush3.bf16.msra.mxu0 %v3094_v61 }
 0xbf1   :  { %2949 = vmatprep.subr.bf16.mxu0 %v3465_v4 }
 0xbf4   :  { %2950 = vmatpush3.bf16.msra.mxu0 %v3095_v62 }
 0xbf5   :  { %2951 = vmatprep.subr.bf16.mxu0 %v3465_v4 }
 0xbf8   :  { %2952 = vmatpush3.bf16.msra.mxu0 %v3096_v63 }
 0xbf9   :  { %2953 = vmatprep.subr.bf16.mxu0 %v3465_v4 }
 0xbfc   :  { %2954 = vmatpush3.bf16.msra.mxu0 %v3097_v0 }
 0xbfd   :  { %2955 = vmatprep.subr.bf16.mxu0 %v3465_v4 }
 0xc00   :  { %2956 = vmatpush3.bf16.msra.mxu0 %v3098_v1 }
 0xc01   :  { %2957 = vmatprep.subr.bf16.mxu0 %v3465_v4 }
 0xc04   :  { %2958 = vmatpush3.bf16.msra.mxu0 %v3099_v2 }
 0xcba   :  { %v2730_v9 = vpop.f32.mrb[16].mxu0 }
 0xcbb   :  { %v2731_v11 = vpop.f32.mrb[17].mxu0 }
 0xcbc   :  { %v2732_v12 = vadd.f32 %v2731_v11, %v2730_v9  ;;  %v2733_v14 = vpop.f32.mrb[18].mxu0 }
 0xcbd   :  { %v2734_v41 = vpop.f32.mrb[19].mxu0 }
 0xcbe   :  { %v1934_v15 = vadd.f32 %v2732_v12, %v2586_v10  ;;  %v2616_v41 = vld [vmem:[%s3988_s15 + $0x1] ss:$0 sm:$0xff] }
 0xcc0   :  { %1939 = vst [vmem:[#allocation25] sm:$0x3] %v1934_v15  ;;  %v1942_v16 = vsel %vm236_vm1, %v1934_v15, 0.0  ;;  %v1945_v17 = vmul.f32 %v1934_v15, %v1934_v15 }
 0xcc1   :  { %1943 = vadd.xlane.f32.xlu0 %v1942_v16  ;;  %v2617_v16 = vld [vmem:[%s3989_s16 + $0x1] ss:$0 sm:$0xff] }
 0xcc2   :  { %v1946_v18 = vsel %vm236_vm1, %v1945_v17, 0.0 }
 0xcc3   :  { %1947 = vadd.xlane.f32.xlu1 %v1946_v18 }
 0xd4e   :  { %v1944_v27 = vpop.xlane.xlu0 %1943 }
 0xd4f   :  { %v1949_v28 = vmul.f32 0.0078125, %v1944_v27 }
 0xd50   :  { %v1948_v29 = vpop.xlane.xlu1 %1947 }
 0xd51   :  { %v1951_v31 = vmul.f32 %v1949_v28, %v1949_v28  ;;  %v1950_v32 = vmul.f32 0.0078125, %v1948_v29  ;;  %v1953_v35 = vsub.f32 %v1934_v15, %v1949_v28  ;;  %v2619_v29 = vld [vmem:[%s4015_s25 + $0x1] ss:$0 sm:$0xff] }
 0xd53   :  { %v1952_v33 = vsub.f32 %v1950_v32, %v1951_v31 }
 0xd55   :  { %v1954_v34 = vadd.f32 1e-05, %v1952_v33 }
 0xd57   :  { %3148 = vrsqrt.f32 %v1954_v34 }
 0xd61   :  { %v3149_v19 = vpop.eup %3148 }
 0xd62   :  { %v1956_v36 = vmul.f32 %v3149_v19, %v1953_v35 }
 0xd64   :  { %v1963_v38 = vmul.f32 %v2603_v13, %v1956_v36 }
 0xd66   :  { %v1970_v39 = vadd.f32 %v2604_v37, %v1963_v38  ;;  %v3100_v37 = vld [vmem:[#allocation24 + $0x80] sm:$0xff]   ;;  %v3101_v38 = vld [vmem:[#allocation24 + $0x88] sm:$0xff]  }
 0xd68   :  { %v1972_v40 = vmul.f32 0.044715, %v1970_v39  ;;  %v1971_v30 = vmul.f32 0.5, %v1970_v39 }
 0xd6a   :  { %v1973_v42 = vmul.f32 %v1972_v40, %v1970_v39  ;;  %v3103_v40 = vld [vmem:[#allocation24 + $0x98] sm:$0xff]  }
 0xd6c   :  { %v1974_v43 = vmul.f32 %v1973_v42, %v1970_v39  ;;  %v3104_v42 = vld [vmem:[#allocation24 + $0xa0] sm:$0xff]  }
 0xd6e   :  { %v1975_v44 = vadd.f32 %v1974_v43, %v1970_v39  ;;  %v3102_v39 = vld [vmem:[#allocation24 + $0x90] sm:$0xff]   ;;  %v3105_v43 = vld [vmem:[#allocation24 + $0xa8] sm:$0xff]  }
 0xd70   :  { %v1976_v45 = vmul.f32 0.7978846, %v1975_v44  ;;  %v3106_v44 = vld [vmem:[#allocation24 + $0xb0] sm:$0xff]  }
 0xd72   :  { %3150 = vtanh.f32 %v1976_v45  ;;  %v3107_v45 = vld [vmem:[#allocation24 + $0xb8] sm:$0xff]  }
 0xd7c   :  { %v3151_v46 = vpop.eup %3150 }
 0xd7d   :  { %v1978_v47 = vadd.f32 1.0, %v3151_v46 }
 0xd7f   :  { %v1979_v48 = vmul.f32 %v1978_v47, %v1971_v30 }
 0xd81   :  { %v1980_v49 = vpack.c.bf16 %v1979_v48, %v1979_v48 }
 0xd83   :  { %2940 = vmatmul.mubr.bf16.vlgmr.msra.gmra.mrb[16].mxu1 %v1980_v49 }
 0xd84   :  { %2979 = vmatprep.mubr.msk.bf16.mxu1 %vm3466_vm4, %v3465_v4  ;;  %2964 = vmatpush3.bf16.msra.mxu1 %v3100_v37 }
 0xd85   :  { %2965 = vmatprep.subr.bf16.mxu1 %v3465_v4 }
 0xd88   :  { %2966 = vmatpush3.bf16.msra.mxu1 %v3101_v38 }
 0xd89   :  { %2967 = vmatprep.subr.bf16.mxu1 %v3465_v4 }
 0xd8c   :  { %2968 = vmatpush3.bf16.msra.mxu1 %v3102_v39 }
 0xd8d   :  { %2969 = vmatprep.subr.bf16.mxu1 %v3465_v4 }
 0xd90   :  { %2970 = vmatpush3.bf16.msra.mxu1 %v3103_v40 }
 0xd91   :  { %2971 = vmatprep.subr.bf16.mxu1 %v3465_v4 }
 0xd94   :  { %2972 = vmatpush3.bf16.msra.mxu1 %v3104_v42 }
 0xd95   :  { %2973 = vmatprep.subr.bf16.mxu1 %v3465_v4 }
 0xd98   :  { %2974 = vmatpush3.bf16.msra.mxu1 %v3105_v43 }
 0xd99   :  { %2975 = vmatprep.subr.bf16.mxu1 %v3465_v4 }
 0xd9c   :  { %2976 = vmatpush3.bf16.msra.mxu1 %v3106_v44 }
 0xd9d   :  { %2977 = vmatprep.subr.bf16.mxu1 %v3465_v4  ;;  %v2631_v4 = vld [vmem:[%s3989_s16 + $0x2] ss:$0 sm:$0xff] }
 0xda0   :  { %2978 = vmatpush3.bf16.msra.mxu1 %v3107_v45 }
 0xe56   :  { %v2086_v51 = vpop.f32.mrb[16].mxu1 }
 0xe57   :  { %v2087_v52 = vadd.f32 %v2605_v50, %v2086_v51  ;;  %v2941_v53 = vpop.f32.mrb[17].mxu1 }
 0xe58   :  { %v2089_v54 = vpop.f32.mrb[18].mxu1 }
 0xe59   :  { %v2942_v55 = vpop.f32.mrb[19].mxu1  ;;  %v2096_v56 = vsel %vm236_vm1, %v2087_v52, 0.0  ;;  %v2099_v57 = vmul.f32 %v2087_v52, %v2087_v52  ;;  %v2630_v54 = vld [vmem:[%s3988_s15 + $0x2] ss:$0 sm:$0xff]  ;;  %s3467_s15 = smov [#allocation25]  }
 0xe5a   :  { %2097 = vadd.xlane.f32.xlu0 %v2096_v56  ;;  %s2411_s23 = sshll.u32 %s3467_s15, 4  ;;  %s2412_s23 = int_to_ptr.vmem [resolvable:$true] %s2411_s23 }
 0xe5b   :  { %v2100_v58 = vsel %vm236_vm1, %v2099_v57, 0.0  ;;  %s3382_s13 = scalar_lea.vmem %s2412_s23, 32  ;;  %p3387_p13 = scmp.lt.s32.totalorder %s2412_s23, %s2412_s23 }
 0xe5c   :  { %2101 = vadd.xlane.f32.xlu1 %v2100_v58  ;;  %p3383_p12 = scmp.ne.s32.totalorder %s2412_s23, %s3382_s13  ;;  %p3388_p0 = scmp.lt.s32.totalorder %s3382_s13, %s3382_s13 }
 0xe5e   :  { %p3389_p1 = por %p3388_p0, %p3387_p13 }
 0xe60   :  { %p3390_p2 = pnand %p3389_p1, %p3383_p12 }
 0xee7   :  { %v2098_v3 = vpop.xlane.xlu0 %2097 }
 0xee8   :  { %v2103_v5 = vmul.f32 0.0078125, %v2098_v3 }
 0xee9   :  { %v2102_v6 = vpop.xlane.xlu1 %2101 }
 0xeea   :  { %v2105_v8 = vmul.f32 %v2103_v5, %v2103_v5  ;;  %v2104_v9 = vmul.f32 0.0078125, %v2102_v6  ;;  %v2107_v12 = vsub.f32 %v2087_v52, %v2103_v5 }
 0xeec   :  { %v2106_v10 = vsub.f32 %v2104_v9, %v2105_v8 }
 0xeee   :  { %v2108_v11 = vadd.f32 1e-05, %v2106_v10 }
 0xef0   :  { %3152 = vrsqrt.f32 %v2108_v11 }
 0xefa   :  { %v3153_v14 = vpop.eup %3152 }
 0xefb   :  { %v2110_v15 = vmul.f32 %v3153_v14, %v2107_v12 }
 0xefd   :  { %v2117_v17 = vmul.f32 %v2616_v41, %v2110_v15 }
 0xeff   :  { %v2124_v18 = vadd.f32 %v2617_v16, %v2117_v17 }
 0xf01   :  { %v2126_v20 = vmul.f32 0.044715, %v2124_v18  ;;  %v2125_v25 = vmul.f32 0.5, %v2124_v18 }
 0xf03   :  { %v2127_v21 = vmul.f32 %v2126_v20, %v2124_v18 }
 0xf05   :  { %v2128_v22 = vmul.f32 %v2127_v21, %v2124_v18 }
 0xf07   :  { %v2129_v23 = vadd.f32 %v2128_v22, %v2124_v18 }
 0xf09   :  { %v2130_v24 = vmul.f32 0.7978846, %v2129_v23 }
 0xf0b   :  { %3154 = vtanh.f32 %v2130_v24 }
 0xf15   :  { %v3155_v7 = vpop.eup %3154 }
 0xf16   :  { %v2132_v26 = vadd.f32 1.0, %v3155_v7 }
 0xf18   :  { %v2133_v27 = vmul.f32 %v2132_v26, %v2125_v25 }
 0xf1a   :  { %v2134_v28 = vpack.c.bf16 %v2133_v27, %v2133_v27 }
 0xf1c   :  { %2960 = vmatmul.mubr.bf16.vlgmr.msra.gmra.mrb[20].mxu0 %v2134_v28 }
 0xfef   :  { %v2242_v31 = vpop.f32.mrb[20].mxu0 }
 0xff0   :  { %v2243_v32 = vadd.f32 %v2619_v29, %v2242_v31  ;;  %v2961_v33 = vpop.f32.mrb[21].mxu0 }
 0xff1   :  { %v2245_v34 = vpop.f32.mrb[22].mxu0 }
 0xff2   :  { %v2962_v35 = vpop.f32.mrb[23].mxu0  ;;  %v2252_v19 = vsel %vm236_vm1, %v2243_v32, 0.0  ;;  %v2255_v13 = vmul.f32 %v2243_v32, %v2243_v32 }
 0xff3   :  { %2253 = vadd.xlane.f32.xlu0 %v2252_v19 }
 0xff4   :  { %v2256_v36 = vsel %vm236_vm1, %v2255_v13, 0.0 }
 0xff5   :  { %2257 = vadd.xlane.f32.xlu1 %v2256_v36 }
0x1080   :  { %v2254_v46 = vpop.xlane.xlu0 %2253 }
0x1081   :  { %v2259_v30 = vmul.f32 0.0078125, %v2254_v46 }
0x1082   :  { %v2258_v47 = vpop.xlane.xlu1 %2257 }
0x1083   :  { %v2261_v48 = vmul.f32 %v2259_v30, %v2259_v30  ;;  %v2260_v49 = vmul.f32 0.0078125, %v2258_v47  ;;  %v2263_v52 = vsub.f32 %v2243_v32, %v2259_v30 }
0x1085   :  { %v2262_v50 = vsub.f32 %v2260_v49, %v2261_v48 }
0x1087   :  { %v2264_v51 = vadd.f32 1e-05, %v2262_v50 }
0x1089   :  { %3156 = vrsqrt.f32 %v2264_v51 }
0x1093   :  { %v3157_v53 = vpop.eup %3156 }
0x1094   :  { %v2266_v55 = vmul.f32 %v3157_v53, %v2263_v52 }
0x1096   :  { %v2273_v56 = vmul.f32 %v2630_v54, %v2266_v55 }
0x1098   :  { %v2280_v57 = vadd.f32 %v2631_v4, %v2273_v56 }
0x109a   :  { %v2282_v58 = vmul.f32 0.044715, %v2280_v57  ;;  %v2281_v0 = vmul.f32 0.5, %v2280_v57 }
0x109c   :  { %v2283_v59 = vmul.f32 %v2282_v58, %v2280_v57 }
0x109e   :  { %v2284_v60 = vmul.f32 %v2283_v59, %v2280_v57 }
0x10a0   :  { %v2285_v61 = vadd.f32 %v2284_v60, %v2280_v57 }
0x10a2   :  { %v2286_v62 = vmul.f32 0.7978846, %v2285_v61 }
0x10a4   :  { %3158 = vtanh.f32 %v2286_v62 }
0x10ae   :  { %v3159_v63 = vpop.eup %3158 }
0x10af   :  { %v2288_v1 = vadd.f32 1.0, %v3159_v63 }
0x10b1   :  { %v2289_v2 = vmul.f32 %v2288_v1, %v2281_v0 }
0x10b3   :  { %v2290_v3 = vpack.c.bf16 %v2289_v2, %v2289_v2 }
0x10b5   :  { %2980 = vmatmul.mubr.bf16.vlgmr.msra.gmra.mrb[20].mxu1 %v2290_v3 }
0x10b6   :  { %3393 = shalt.err (!%p3390_p2)
}
0x10b7   :  { %s4016_s9 = sld [smem:[#allocation45_spill]] }
0x10bd   :  { %s3394_s4 = scalar_lea.hbm %s4016_s9, 32 }
0x10be   :  { %p3395_p3 = scmp.ne.s32.totalorder %s4016_s9, %s3394_s4  ;;  %p3398_p4 = scmp.lt.u32.totalorder %s3394_s4, %s4016_s9 }
0x10c0   :  { %p3400_p5 = pnand %p3398_p4, %p3395_p3 }
0x10c2   :  { %3403 = shalt.err (!%p3400_p5)
}
0x10c3   :  { %2414 = dma.vmem_to_hbm [thread:$0]  %s2412_s23, 32, %s4016_s9, [#allocation4]   ;;  %v2633_v5 = vld [vmem:[%s4015_s25 + $0x2] ss:$0 sm:$0xff] }
0x10c4   :  { %s3468_s5 = smov [#allocation26]  }
0x10c5   :  { %s2421_s7 = sshll.u32 %s3468_s5, 4  ;;  %s2422_s7 = int_to_ptr.vmem [resolvable:$true] %s2421_s7 }
0x10c6   :  { %s3404_s19 = scalar_lea.vmem %s2422_s7, 32  ;;  %p3409_p7 = scmp.lt.s32.totalorder %s2422_s7, %s2422_s7 }
0x10c7   :  { %p3405_p6 = scmp.ne.s32.totalorder %s2422_s7, %s3404_s19  ;;  %p3410_p8 = scmp.lt.s32.totalorder %s3404_s19, %s3404_s19 }
0x10c9   :  { %p3411_p9 = por %p3410_p8, %p3409_p7 }
0x10cb   :  { %p3412_p10 = pnand %p3411_p9, %p3405_p6 }
0x1188   :  { %v2398_v6 = vpop.f32.mrb[20].mxu1 }
0x1189   :  { %v2399_v8 = vadd.f32 %v2633_v5, %v2398_v6  ;;  %v2981_v9 = vpop.f32.mrb[21].mxu1 }
0x118a   :  { %v2401_v10 = vpop.f32.mrb[22].mxu1 }
0x118b   :  { %2404 = vst [vmem:[#allocation26] sm:$0x3] %v2399_v8  ;;  %v2982_v11 = vpop.f32.mrb[23].mxu1 }
0x118c   :  { %3415 = shalt.err (!%p3412_p10)
}
0x118d   :  { %s4017_s10 = sld [smem:[#allocation46_spill]] }
0x1193   :  { %s3416_s25 = scalar_lea.hbm %s4017_s10, 32 }
0x1194   :  { %p3417_p11 = scmp.ne.s32.totalorder %s4017_s10, %s3416_s25  ;;  %p3420_p12 = scmp.lt.u32.totalorder %s3416_s25, %s4017_s10 }
0x1196   :  { %p3422_p13 = pnand %p3420_p12, %p3417_p11 }
0x1198   :  { %3425 = shalt.err (!%p3422_p13)
}
0x1199   :  { %2424 = dma.vmem_to_hbm [thread:$0]  %s2422_s7, 32, %s4017_s10, [#allocation27]  }
0x119a   :  { %3444 = dma.done.wait [#allocation4], 32  }
0x119b   :  { %3445 = vsyncadd [#allocation4], 4294967264 }
0x119c   :  { %3446 = dma.done.wait [#allocation27], 32  }
0x119d   :  { %3447 = vsyncadd [#allocation27], 4294967264 }
0x119e   :  { %2431 = vsyncpa [#allocation3], 1 }
0x119f   :  { %2432 = vsyncpa [#allocation8], 1 }
0x11a0   :  { %2433 = vsyncpa [#allocation11], 1 }
0x11a1   :  { %2434 = vsyncpa [#allocation23], 1 }
0x11a2   :  { %2435 = vsyncpa [#allocation4], 1 }
0x11a3   :  { %2436 = vsyncpa [#allocation27], 1 }
0x11a4   :  { %2437 = vsyncpa [#allocation5], 1 }
0x11a5   :  { %2438 = vsyncpa [#allocation21], 1 }
0x11a6   :  { %2439 = vsyncpa [#allocation6], 1 }
0x11a7   :  { %2440 = vsyncpa [#allocation15], 1 }
0x11a8   :  { %2441 = vsyncpa [#allocation19], 1 }

</bundles_post_ra>
